<compile_context>
chip_gen: v7x
topology: tpu7x:2x2x1
jax: 0.10.0
libtpu: 0.0.40
codegen_flags: <defaults>
</compile_context>

<pallas_src>
import functools

import jax
import jax.numpy as jnp
from jax.experimental import pallas as pl
from jax.experimental.pallas import tpu as pltpu

_INV_SQRT2 = 0.7071067811865476
_LANE = 128


def _round_up(n, m):
    return ((n + m - 1) // m) * m


def _nbytes(shape, dtype):
    n = 1
    for d in shape:
        n *= d
    return n * jnp.dtype(dtype).itemsize


def _vmem_limit(per_step_bytes):
    # ~3x the per-step block footprint covers double-buffering + Mosaic
    # scratch; capped well under v7x's 64 MiB/TC so both TensorCores can run.
    return int(min(24 * 1024 * 1024, max(6 * 1024 * 1024, 3 * per_step_bytes)))


def _gelu_exact(x):
    # matches torch.nn.functional.gelu (default, erf-based)
    return 0.5 * x * (1.0 + jax.lax.erf(x * _INV_SQRT2))


def _choose_tile_rows(n, max_tile=4096):
    """Pick (tile_rows, padded_rows).

    Always >= 2 (even) grid steps when n is non-trivial, so v7x's second
    TensorCore gets work and DMA/compute pipelining exists.  Tile is a
    multiple of 8; awkward row counts are padded (a few rows) rather than
    falling onto tiny-divisor tile cliffs.
    """
    if n <= 64:                                   # too small to split
        t = _round_up(n, 8)
        return t, t
    steps = max(2, -(-n // max_tile))
    if steps % 2:
        steps += 1
    t = _round_up(-(-n // steps), 8)
    return t, steps * t


# ----------------------------------------------------------------------------
# Pallas kernel 1: fused  out = gelu?( x @ W + b [+ spectral_residual] )
# Used for fc0 and for every (W + K)(u) layer (1x1 conv + residual + GELU).
# x/W/spec stream in bf16; accumulation, bias, residual add and GELU in f32.
# ----------------------------------------------------------------------------
def _make_matmul_kernel(apply_gelu: bool, has_spec: bool):
    def kernel(*refs):
        if has_spec:
            x_ref, w_ref, b_ref, s_ref, o_ref = refs
        else:
            x_ref, w_ref, b_ref, o_ref = refs
        acc = jnp.dot(x_ref[...].astype(w_ref.dtype), w_ref[...],
                      preferred_element_type=jnp.float32)
        acc = acc + b_ref[...]
        if has_spec:
            acc = acc + s_ref[...].astype(jnp.float32)   # bf16 residual stream
        if apply_gelu:
            acc = _gelu_exact(acc)
        o_ref[...] = acc.astype(o_ref.dtype)
    return kernel


def pointwise_op(x2d, W, b, spec=None, apply_gelu=False,
                 out_dtype=jnp.bfloat16, max_tile=4096):
    """x2d: [N, Cin], W: [Cin, Cout] bf16, b: [Cout] f32, spec: opt [N, Cout] bf16."""
    N, Cin = x2d.shape
    Cout = W.shape[1]
    t, Np = _choose_tile_rows(N, max_tile)
    if Np != N:
        x2d = jnp.pad(x2d, ((0, Np - N), (0, 0)))
        if spec is not None:
            spec = jnp.pad(spec, ((0, Np - N), (0, 0)))
    b2 = b.reshape(1, Cout).astype(jnp.float32)

    per_step = (_nbytes((t, Cin), x2d.dtype) + _nbytes((Cin, Cout), W.dtype)
                + _nbytes((1, Cout), jnp.float32)
                + _nbytes((t, Cout), out_dtype))
    in_specs = [
        pl.BlockSpec((t, Cin), lambda i: (i, 0)),
        pl.BlockSpec((Cin, Cout), lambda i: (0, 0)),
        pl.BlockSpec((1, Cout), lambda i: (0, 0)),
    ]
    args = [x2d, W, b2]
    if spec is not None:
        in_specs.append(pl.BlockSpec((t, Cout), lambda i: (i, 0)))
        args.append(spec)
        per_step += _nbytes((t, Cout), spec.dtype)

    out = pl.pallas_call(
        _make_matmul_kernel(apply_gelu, spec is not None),
        out_shape=jax.ShapeDtypeStruct((Np, Cout), out_dtype),
        grid=(Np // t,),
        in_specs=in_specs,
        out_specs=pl.BlockSpec((t, Cout), lambda i: (i, 0)),
        compiler_params=pltpu.CompilerParams(
            dimension_semantics=("parallel",),
            vmem_limit_bytes=_vmem_limit(per_step)),
    )(*args)
    return out[:N] if Np != N else out


# ----------------------------------------------------------------------------
# Pallas kernel 2: fused projection head  out = gelu(x @ W1 + b1) @ W2 + b2
# fc1+fc2 fused (the (N,128) fc1 activation never touches HBM); only the real
# output channels are stored (no (N,128) f32 write + XLA slice).
# ----------------------------------------------------------------------------
def _make_fc_head_kernel(num_out: int):
    def kernel(x_ref, w1_ref, b1_ref, w2_ref, b2_ref, o_ref):
        h = jnp.dot(x_ref[...].astype(w1_ref.dtype), w1_ref[...],
                    preferred_element_type=jnp.float32)
        h = _gelu_exact(h + b1_ref[...])
        o = jnp.dot(h.astype(w2_ref.dtype), w2_ref[...],
                    preferred_element_type=jnp.float32)
        o = o + b2_ref[...]
        # fc2 weight stays lane-padded for the MXU; only the real channels
        # leave VMEM.
        o_ref[...] = o[:, :num_out].astype(o_ref.dtype)
    return kernel


def fc_head(x2d, w1, b1, w2, b2, num_out, max_tile=4096):
    N, C1 = x2d.shape
    C2 = w1.shape[1]
    C2b = w2.shape[1]          # lane-padded fc2 width (>= num_out)
    t, Np = _choose_tile_rows(N, max_tile)
    if Np != N:
        x2d = jnp.pad(x2d, ((0, Np - N), (0, 0)))

    per_step = (_nbytes((t, C1), x2d.dtype) + _nbytes((C1, C2), w1.dtype)
                + _nbytes((C2, C2b), w2.dtype)
                + _nbytes((1, C2), jnp.float32) + _nbytes((1, C2b), jnp.float32)
                + _nbytes((t, num_out), jnp.float32))
    out = pl.pallas_call(
        _make_fc_head_kernel(num_out),
        out_shape=jax.ShapeDtypeStruct((Np, num_out), jnp.float32),
        grid=(Np // t,),
        in_specs=[
            pl.BlockSpec((t, C1), lambda i: (i, 0)),
            pl.BlockSpec((C1, C2), lambda i: (0, 0)),
            pl.BlockSpec((1, C2), lambda i: (0, 0)),
            pl.BlockSpec((C2, C2b), lambda i: (0, 0)),
            pl.BlockSpec((1, C2b), lambda i: (0, 0)),
        ],
        out_specs=pl.BlockSpec((t, num_out), lambda i: (i, 0)),
        compiler_params=pltpu.CompilerParams(
            dimension_semantics=("parallel",),
            vmem_limit_bytes=_vmem_limit(per_step)),
    )(x2d, w1, b1.reshape(1, C2).astype(jnp.float32),
      w2, b2.reshape(1, C2b).astype(jnp.float32))
    return out[:N] if Np != N else out


# ----------------------------------------------------------------------------
# Pallas kernel 3: complex channel mixing over retained Fourier modes
#   out[b, o, m] = sum_i x[b, i, m] * w[i, o, m]   (complex)
# Modes padded to Mp=128 lanes, Cout padded to a multiple of 8 sublanes so
# stores are whole (8,128) tiles.  The batch axis is processed in at most two
# grid steps (launch overhead amortized, both v7x TCs busy).
# ----------------------------------------------------------------------------
def _spectral_mul_kernel(xr_ref, xi_ref, wr_ref, wi_ref, or_ref, oi_ref):
    bblk, cin, _ = xr_ref.shape
    coutp, mp = wr_ref.shape[1], wr_ref.shape[2]
    for b in range(bblk):                 # static; Bblk is small
        accr = jnp.zeros((coutp, mp), jnp.float32)
        acci = jnp.zeros((coutp, mp), jnp.float32)
        for i in range(cin):              # static unroll; Cin == width (small)
            xr_i = xr_ref[b, i:i + 1, :]  # (1, Mp) row read straight from VMEM
            xi_i = xi_ref[b, i:i + 1, :]
            wr_i = wr_ref[i]              # (Coutp, Mp)
            wi_i = wi_ref[i]
            accr = accr + xr_i * wr_i - xi_i * wi_i
            acci = acci + xr_i * wi_i + xi_i * wr_i
        or_ref[b] = accr
        oi_ref[b] = acci


def spectral_mul(xr, xi, wr, wi):
    B, Cin, Mp = xr.shape
    Coutp = wr.shape[1]
    n_steps = 2 if B >= 2 else 1          # >= 2 steps -> both v7x TCs get work
    Bblk = -(-B // n_steps)
    Bp = n_steps * Bblk
    if Bp != B:
        pad = ((0, Bp - B), (0, 0), (0, 0))
        xr = jnp.pad(xr, pad)
        xi = jnp.pad(xi, pad)
    x_spec = pl.BlockSpec((Bblk, Cin, Mp), lambda b: (b, 0, 0))
    w_spec = pl.BlockSpec((Cin, Coutp, Mp), lambda b: (0, 0, 0))
    o_spec = pl.BlockSpec((Bblk, Coutp, Mp), lambda b: (b, 0, 0))
    o_r, o_i = pl.pallas_call(
        _spectral_mul_kernel,
        out_shape=(jax.ShapeDtypeStruct((Bp, Coutp, Mp), jnp.float32),
                   jax.ShapeDtypeStruct((Bp, Coutp, Mp), jnp.float32)),
        grid=(n_steps,),
        in_specs=[x_spec, x_spec, w_spec, w_spec],
        out_specs=(o_spec, o_spec),
        compiler_params=pltpu.CompilerParams(
            dimension_semantics=("parallel",)),
    )(xr, xi, wr, wi)
    return o_r[:B], o_i[:B]


# ----------------------------------------------------------------------------
# SpectralConv2d_fast forward, channels-last (NHWC) end to end.
# FFT glue in JAX; channel mixing in Pallas.
# ----------------------------------------------------------------------------
def spectral_conv2d_nhwc(h, wr, wi, m1, m2, width, cp):
    # TODO(synk): rfft2/irfft2 have no Pallas TPU primitive; kept in plain JAX.
    B, Hp, Wp, _ = h.shape
    Mp = wr.shape[2]
    M = 2 * m1 * m2
    Wf = Wp // 2 + 1

    hw = h[..., :width].astype(jnp.float32)
    x_ft = jnp.fft.rfft2(hw, axes=(1, 2))                   # (B, Hp, Wf, width) c64
    low = x_ft[:, :m1, :m2, :]
    high = x_ft[:, Hp - m1:, :m2, :]
    xin = jnp.concatenate([low, high], axis=1)              # (B, 2*m1, m2, width)
    xin = jnp.transpose(xin, (0, 3, 1, 2)).reshape(B, width, M)    # tiny tensor
    xr = jnp.pad(jnp.real(xin), ((0, 0), (0, 0), (0, Mp - M)))
    xi = jnp.pad(jnp.imag(xin), ((0, 0), (0, 0), (0, Mp - M)))

    o_r, o_i = spectral_mul(xr, xi, wr, wi)                 # (B, Coutp, Mp) f32
    o = (o_r[:, :width, :M] + 1j * o_i[:, :width, :M]).astype(jnp.complex64)
    o = jnp.transpose(o.reshape(B, width, 2 * m1, m2), (0, 2, 3, 1))

    # Inverse FFT only over the real `width` channels; the 128-lane channel
    # padding (exact zeros) is applied AFTER the irfft -> ~6x cheaper.
    out_ft = jnp.zeros((B, Hp, Wf, width), dtype=jnp.complex64)
    out_ft = out_ft.at[:, :m1, :m2, :].set(o[:, :m1])
    out_ft = out_ft.at[:, Hp - m1:, :m2, :].set(o[:, m1:])
    spec = jnp.fft.irfft2(out_ft, s=(Hp, Wp), axes=(1, 2))  # (B,Hp,Wp,width) f32
    # stream the residual to the fused layer kernel in bf16, lane-padded to Cp
    return jnp.pad(spec.astype(jnp.bfloat16),
                   ((0, 0), (0, 0), (0, 0), (0, cp - width)))


# ----------------------------------------------------------------------------
# FNO2d forward (channels-last everywhere, channels padded to 128 lanes)
# ----------------------------------------------------------------------------
def fno2d_forward(params, x, grid, *, modes1, modes2, width, num_channels,
                  padding=2):
    B, H, W_, _ = x.shape
    Cp = params["w0_w"].shape[0]                               # padded width (128)

    h = jnp.concatenate([x, grid], axis=-1).reshape(B * H * W_, -1)
    h = pointwise_op(h, params["fc0_w"], params["fc0_b"])      # (N, Cp) bf16
    h = h.reshape(B, H, W_, Cp)
    h = jnp.pad(h, ((0, 0), (0, padding), (0, padding), (0, 0)))   # NHWC pad
    Hp, Wp = H + padding, W_ + padding
    Nl = B * Hp * Wp

    for l in range(4):
        spec = spectral_conv2d_nhwc(h, params[f"conv{l}_wr"],
                                    params[f"conv{l}_wi"], modes1, modes2,
                                    width, Cp)                  # (B,Hp,Wp,Cp) bf16
        h = pointwise_op(h.reshape(Nl, Cp),
                         params[f"w{l}_w"], params[f"w{l}_b"],
                         spec=spec.reshape(Nl, Cp),
                         apply_gelu=(l < 3))                    # (Nl, Cp) bf16
        h = h.reshape(B, Hp, Wp, Cp)

    h = h[:, :H, :W_, :]                                        # remove pad
    out = fc_head(h.reshape(B * H * W_, Cp),
                  params["fc1_w"], params["fc1_b"],
                  params["fc2_w"], params["fc2_b"],
                  num_channels)                                 # (N, nc) f32
    out = out.reshape(B, H, W_, num_channels)
    return out[:, :, :, None, :]                                # unsqueeze(-2)


# ----------------------------------------------------------------------------
# Deterministic synthetic parameters (shapes per FNO2d.__init__), stored
# pre-padded: pointwise weights bf16 [Cin_pad, Cout_pad], biases f32,
# spectral weights f32 [Cin, Cout_pad8, Mp] (modes padded to 128 lanes).
# Padded entries are exact zeros (see zero-padding invariant at top of file).
# ----------------------------------------------------------------------------
def init_params(key, num_channels, initial_step, m1, m2, width):
    keys = jax.random.split(key, 32)
    it = iter(range(32))

    def nk():
        return keys[next(it)]

    Cp = max(_LANE, _round_up(width, _LANE))
    C2p = max(_LANE, _round_up(num_channels, _LANE))
    Coutp = _round_up(width, 8)
    M = 2 * m1 * m2
    Mp = max(_LANE, _round_up(M, _LANE))

    def linear(cin, cout, cin_pad=None, cout_pad=None):
        cin_pad = cin_pad or cin
        cout_pad = cout_pad or cout
        bound = 1.0 / (cin ** 0.5)
        w = jax.random.uniform(nk(), (cin, cout), jnp.float32, -bound, bound)
        b = jax.random.uniform(nk(), (cout,), jnp.float32, -bound, bound)
        wp = jnp.zeros((cin_pad, cout_pad), jnp.float32).at[:cin, :cout].set(w)
        bp = jnp.zeros((cout_pad,), jnp.float32).at[:cout].set(b)
        return wp.astype(jnp.bfloat16), bp

    p = {}
    cin0 = initial_step * num_channels + 2
    p["fc0_w"], p["fc0_b"] = linear(cin0, width, cout_pad=Cp)
    scale = 1.0 / (width * width)
    for l in range(4):
        # weights1 / weights2 of SpectralConv2d concatenated along the mode1
        # axis -> (Cin, Cout, 2*m1, m2); real/imag split, modes flattened onto
        # the lane axis (pad to Mp), Cout padded to a multiple of 8 sublanes.
        wr = scale * jax.random.uniform(nk(), (width, width, 2 * m1, m2),
                                        jnp.float32)
        wi = scale * jax.random.uniform(nk(), (width, width, 2 * m1, m2),
                                        jnp.float32)
        p[f"conv{l}_wr"] = jnp.pad(wr.reshape(width, width, M),
                                   ((0, 0), (0, Coutp - width), (0, Mp - M)))
        p[f"conv{l}_wi"] = jnp.pad(wi.reshape(width, width, M),
                                   ((0, 0), (0, Coutp - width), (0, Mp - M)))
        # 1x1 conv == pointwise linear, padded to lane-dense [Cp, Cp]
        p[f"w{l}_w"], p[f"w{l}_b"] = linear(width, width,
                                            cin_pad=Cp, cout_pad=Cp)
    p["fc1_w"], p["fc1_b"] = linear(width, 128, cin_pad=Cp)
    p["fc2_w"], p["fc2_b"] = linear(128, num_channels, cout_pad=C2p)
    return p


if __name__ == "__main__":
    B, S = 2, 16
    num_channels, initial_step = 1, 10
    modes1 = modes2 = 6      # must satisfy 2*m1 <= S+pad and m2 <= (S+pad)//2+1
    width = 20

    root = jax.random.PRNGKey(0)
    kp, kx = jax.random.split(root)
    params = init_params(kp, num_channels, initial_step, modes1, modes2, width)

    # input: previous timesteps (B, x, y, initial_step*num_channels) + grid (B, x, y, 2)
    x = jax.random.normal(kx, (B, S, S, initial_step * num_channels),
                          dtype=jnp.float32)
    gx = jnp.linspace(0.0, 1.0, S, dtype=jnp.float32)
    gy = jnp.linspace(0.0, 1.0, S, dtype=jnp.float32)
    gxx, gyy = jnp.meshgrid(gx, gy, indexing="ij")
    grid = jnp.broadcast_to(jnp.stack([gxx, gyy], axis=-1)[None], (B, S, S, 2))

    fwd = jax.jit(functools.partial(fno2d_forward, modes1=modes1, modes2=modes2,
                                    width=width, num_channels=num_channels))
    out = jax.block_until_ready(fwd(params, x, grid))
    assert out.shape == (B, S, S, 1, num_channels), out.shape
    assert bool(jnp.all(jnp.isfinite(out)))
    print("KERNEL_OK")
</pallas_src>

<mosaic_0001>
module attributes {stable_mosaic.version = 11 : i64} {
  func.func @kernel(%arg0: i32, %arg1: memref<256x12xf32, #tpu.memory_space<vmem>>, %arg2: memref<12x128xbf16, #tpu.memory_space<vmem>>, %arg3: memref<1x128xf32, #tpu.memory_space<vmem>>, %arg4: memref<256x128xbf16, #tpu.memory_space<vmem>>) attributes {dimension_semantics = [#tpu.dimension_semantics<parallel>], iteration_bounds = array<i64: 2>, scalar_prefetch = 0 : i64, scratch_operands = 0 : i64, tpu.core_type = #tpu.core_type<tc>, window_params = [{transform_indices = @transform_0, window_bounds = array<i64: 256, 12>}, {pipeline_mode = #tpu.pipeline_mode<synchronous>, transform_indices = @transform_1, window_bounds = array<i64: 12, 128>}, {pipeline_mode = #tpu.pipeline_mode<synchronous>, transform_indices = @transform_2, window_bounds = array<i64: 1, 128>}, {transform_indices = @transform_3, window_bounds = array<i64: 256, 128>}]} {
    %c0 = arith.constant 0 : index
    %c0_0 = arith.constant 0 : index
    %0 = vector.load %arg1[%c0, %c0_0] : memref<256x12xf32, #tpu.memory_space<vmem>>, vector<256x12xf32>
    %1 = arith.truncf %0 : vector<256x12xf32> to vector<256x12xbf16>
    %c0_1 = arith.constant 0 : index
    %c0_2 = arith.constant 0 : index
    %2 = vector.load %arg2[%c0_1, %c0_2] : memref<12x128xbf16, #tpu.memory_space<vmem>>, vector<12x128xbf16>
    %cst = arith.constant dense<0.000000e+00> : vector<256x128xf32>
    %3 = tpu.matmul %1, %2, %cst {dimension_numbers = #tpu.dot_dimension_numbers<[1], [0], [0], [1], [0, 0, 1, 1], [], []>} : vector<256x12xbf16>, vector<12x128xbf16>, vector<256x128xf32> -> vector<256x128xf32>
    %c0_3 = arith.constant 0 : index
    %c0_4 = arith.constant 0 : index
    %4 = vector.load %arg3[%c0_3, %c0_4] : memref<1x128xf32, #tpu.memory_space<vmem>>, vector<1x128xf32>
    %5 = vector.broadcast %4 : vector<1x128xf32> to vector<256x128xf32>
    %6 = arith.addf %3, %5 : vector<256x128xf32>
    %7 = arith.truncf %6 : vector<256x128xf32> to vector<256x128xbf16>
    %c0_5 = arith.constant 0 : index
    %c0_6 = arith.constant 0 : index
    %8 = vector.load %arg4[%c0_5, %c0_6] : memref<256x128xbf16, #tpu.memory_space<vmem>>, vector<256x128xbf16>
    tpu.vector_store %arg4[%c0_5, %c0_6], %7 {strides = array<i32>} : memref<256x128xbf16, #tpu.memory_space<vmem>>, vector<256x128xbf16>,
    return
  }
  func.func @transform_0(%arg0: i32) -> (i32, i32) {
    %c0_i32 = arith.constant 0 : i32
    %c0_i32_0 = arith.constant 0 : i32
    return %arg0, %c0_i32 : i32, i32
  }
  func.func @transform_1(%arg0: i32) -> (i32, i32) {
    %c0_i32 = arith.constant 0 : i32
    %c0_i32_0 = arith.constant 0 : i32
    %c0_i32_1 = arith.constant 0 : i32
    return %c0_i32, %c0_i32_0 : i32, i32
  }
  func.func @transform_2(%arg0: i32) -> (i32, i32) {
    %c0_i32 = arith.constant 0 : i32
    %c0_i32_0 = arith.constant 0 : i32
    %c0_i32_1 = arith.constant 0 : i32
    return %c0_i32, %c0_i32_0 : i32, i32
  }
  func.func @transform_3(%arg0: i32) -> (i32, i32) {
    %c0_i32 = arith.constant 0 : i32
    %c0_i32_0 = arith.constant 0 : i32
    return %arg0, %c0_i32 : i32, i32
  }
}

module attributes {stable_mosaic.version = 11 : i64} {
  func.func @_spectral_mul_kernel(%arg0: i32, %arg1: memref<1x20x128xf32, #tpu.memory_space<vmem>>, %arg2: memref<1x20x128xf32, #tpu.memory_space<vmem>>, %arg3: memref<20x24x128xf32, #tpu.memory_space<vmem>>, %arg4: memref<20x24x128xf32, #tpu.memory_space<vmem>>, %arg5: memref<1x24x128xf32, #tpu.memory_space<vmem>>, %arg6: memref<1x24x128xf32, #tpu.memory_space<vmem>>) attributes {dimension_semantics = [#tpu.dimension_semantics<parallel>], iteration_bounds = array<i64: 2>, scalar_prefetch = 0 : i64, scratch_operands = 0 : i64, tpu.core_type = #tpu.core_type<tc>, window_params = [{transform_indices = @transform_0, window_bounds = array<i64: 1, 20, 128>}, {transform_indices = @transform_1, window_bounds = array<i64: 1, 20, 128>}, {pipeline_mode = #tpu.pipeline_mode<synchronous>, transform_indices = @transform_2, window_bounds = array<i64: 20, 24, 128>}, {pipeline_mode = #tpu.pipeline_mode<synchronous>, transform_indices = @transform_3, window_bounds = array<i64: 20, 24, 128>}, {transform_indices = @transform_4, window_bounds = array<i64: 1, 24, 128>}, {transform_indices = @transform_5, window_bounds = array<i64: 1, 24, 128>}]} {
    %cst = arith.constant 0.000000e+00 : f32
    %0 = vector.broadcast %cst : f32 to vector<24x128xf32>
    %cst_0 = arith.constant 0.000000e+00 : f32
    %1 = vector.broadcast %cst_0 : f32 to vector<24x128xf32>
    %c0 = arith.constant 0 : index
    %c0_1 = arith.constant 0 : index
    %c0_2 = arith.constant 0 : index
    %2 = vector.load %arg1[%c0, %c0_1, %c0_2] : memref<1x20x128xf32, #tpu.memory_space<vmem>>, vector<1x1x128xf32>
    %3 = vector.shape_cast %2 : vector<1x1x128xf32> to vector<1x128xf32>
    %c0_3 = arith.constant 0 : index
    %c0_4 = arith.constant 0 : index
    %c0_5 = arith.constant 0 : index
    %4 = vector.load %arg2[%c0_3, %c0_4, %c0_5] : memref<1x20x128xf32, #tpu.memory_space<vmem>>, vector<1x1x128xf32>
    %5 = vector.shape_cast %4 : vector<1x1x128xf32> to vector<1x128xf32>
    %c0_6 = arith.constant 0 : index
    %c0_7 = arith.constant 0 : index
    %c0_8 = arith.constant 0 : index
    %6 = vector.load %arg3[%c0_6, %c0_7, %c0_8] : memref<20x24x128xf32, #tpu.memory_space<vmem>>, vector<1x24x128xf32>
    %7 = vector.shape_cast %6 : vector<1x24x128xf32> to vector<24x128xf32>
    %c0_9 = arith.constant 0 : index
    %c0_10 = arith.constant 0 : index
    %c0_11 = arith.constant 0 : index
    %8 = vector.load %arg4[%c0_9, %c0_10, %c0_11] : memref<20x24x128xf32, #tpu.memory_space<vmem>>, vector<1x24x128xf32>
    %9 = vector.shape_cast %8 : vector<1x24x128xf32> to vector<24x128xf32>
    %10 = vector.broadcast %3 : vector<1x128xf32> to vector<24x128xf32>
    %11 = arith.mulf %10, %7 : vector<24x128xf32>
    %12 = arith.addf %0, %11 : vector<24x128xf32>
    %13 = vector.broadcast %5 : vector<1x128xf32> to vector<24x128xf32>
    %14 = arith.mulf %13, %9 : vector<24x128xf32>
    %15 = arith.subf %12, %14 : vector<24x128xf32>
    %16 = vector.broadcast %3 : vector<1x128xf32> to vector<24x128xf32>
    %17 = arith.mulf %16, %9 : vector<24x128xf32>
    %18 = arith.addf %1, %17 : vector<24x128xf32>
    %19 = vector.broadcast %5 : vector<1x128xf32> to vector<24x128xf32>
    %20 = arith.mulf %19, %7 : vector<24x128xf32>
    %21 = arith.addf %18, %20 : vector<24x128xf32>
    %c0_12 = arith.constant 0 : index
    %c1 = arith.constant 1 : index
    %c0_13 = arith.constant 0 : index
    %22 = vector.load %arg1[%c0_12, %c1, %c0_13] : memref<1x20x128xf32, #tpu.memory_space<vmem>>, vector<1x1x128xf32>
    %23 = vector.shape_cast %22 : vector<1x1x128xf32> to vector<1x128xf32>
    %c0_14 = arith.constant 0 : index
    %c1_15 = arith.constant 1 : index
    %c0_16 = arith.constant 0 : index
    %24 = vector.load %arg2[%c0_14, %c1_15, %c0_16] : memref<1x20x128xf32, #tpu.memory_space<vmem>>, vector<1x1x128xf32>
    %25 = vector.shape_cast %24 : vector<1x1x128xf32> to vector<1x128xf32>
    %c1_17 = arith.constant 1 : index
    %c0_18 = arith.constant 0 : index
    %c0_19 = arith.constant 0 : index
    %26 = vector.load %arg3[%c1_17, %c0_18, %c0_19] : memref<20x24x128xf32, #tpu.memory_space<vmem>>, vector<1x24x128xf32>
    %27 = vector.shape_cast %26 : vector<1x24x128xf32> to vector<24x128xf32>
    %c1_20 = arith.constant 1 : index
    %c0_21 = arith.constant 0 : index
    %c0_22 = arith.constant 0 : index
    %28 = vector.load %arg4[%c1_20, %c0_21, %c0_22] : memref<20x24x128xf32, #tpu.memory_space<vmem>>, vector<1x24x128xf32>
    %29 = vector.shape_cast %28 : vector<1x24x128xf32> to vector<24x128xf32>
    %30 = vector.broadcast %23 : vector<1x128xf32> to vector<24x128xf32>
    %31 = arith.mulf %30, %27 : vector<24x128xf32>
    %32 = arith.addf %15, %31 : vector<24x128xf32>
    %33 = vector.broadcast %25 : vector<1x128xf32> to vector<24x128xf32>
    %34 = arith.mulf %33, %29 : vector<24x128xf32>
    %35 = arith.subf %32, %34 : vector<24x128xf32>
    %36 = vector.broadcast %23 : vector<1x128xf32> to vector<24x128xf32>
    %37 = arith.mulf %36, %29 : vector<24x128xf32>
    %38 = arith.addf %21, %37 : vector<24x128xf32>
    %39 = vector.broadcast %25 : vector<1x128xf32> to vector<24x128xf32>
    %40 = arith.mulf %39, %27 : vector<24x128xf32>
    %41 = arith.addf %38, %40 : vector<24x128xf32>
    %c0_23 = arith.constant 0 : index
    %c2 = arith.constant 2 : index
    %c0_24 = arith.constant 0 : index
    %42 = vector.load %arg1[%c0_23, %c2, %c0_24] : memref<1x20x128xf32, #tpu.memory_space<vmem>>, vector<1x1x128xf32>
    %43 = vector.shape_cast %42 : vector<1x1x128xf32> to vector<1x128xf32>
    %c0_25 = arith.constant 0 : index
    %c2_26 = arith.constant 2 : index
    %c0_27 = arith.constant 0 : index
    %44 = vector.load %arg2[%c0_25, %c2_26, %c0_27] : memref<1x20x128xf32, #tpu.memory_space<vmem>>, vector<1x1x128xf32>
    %45 = vector.shape_cast %44 : vector<1x1x128xf32> to vector<1x128xf32>
    %c2_28 = arith.constant 2 : index
    %c0_29 = arith.constant 0 : index
    %c0_30 = arith.constant 0 : index
    %46 = vector.load %arg3[%c2_28, %c0_29, %c0_30] : memref<20x24x128xf32, #tpu.memory_space<vmem>>, vector<1x24x128xf32>
    %47 = vector.shape_cast %46 : vector<1x24x128xf32> to vector<24x128xf32>
    %c2_31 = arith.constant 2 : index
    %c0_32 = arith.constant 0 : index
    %c0_33 = arith.constant 0 : index
    %48 = vector.load %arg4[%c2_31, %c0_32, %c0_33] : memref<20x24x128xf32, #tpu.memory_space<vmem>>, vector<1x24x128xf32>
    %49 = vector.shape_cast %48 : vector<1x24x128xf32> to vector<24x128xf32>
    %50 = vector.broadcast %43 : vector<1x128xf32> to vector<24x128xf32>
    %51 = arith.mulf %50, %47 : vector<24x128xf32>
    %52 = arith.addf %35, %51 : vector<24x128xf32>
    %53 = vector.broadcast %45 : vector<1x128xf32> to vector<24x128xf32>
    %54 = arith.mulf %53, %49 : vector<24x128xf32>
    %55 = arith.subf %52, %54 : vector<24x128xf32>
    %56 = vector.broadcast %43 : vector<1x128xf32> to vector<24x128xf32>
    %57 = arith.mulf %56, %49 : vector<24x128xf32>
    %58 = arith.addf %41, %57 : vector<24x128xf32>
    %59 = vector.broadcast %45 : vector<1x128xf32> to vector<24x128xf32>
    %60 = arith.mulf %59, %47 : vector<24x128xf32>
    %61 = arith.addf %58, %60 : vector<24x128xf32>
    %c0_34 = arith.constant 0 : index
    %c3 = arith.constant 3 : index
    %c0_35 = arith.constant 0 : index
    %62 = vector.load %arg1[%c0_34, %c3, %c0_35] : memref<1x20x128xf32, #tpu.memory_space<vmem>>, vector<1x1x128xf32>
    %63 = vector.shape_cast %62 : vector<1x1x128xf32> to vector<1x128xf32>
    %c0_36 = arith.constant 0 : index
    %c3_37 = arith.constant 3 : index
    %c0_38 = arith.constant 0 : index
    %64 = vector.load %arg2[%c0_36, %c3_37, %c0_38] : memref<1x20x128xf32, #tpu.memory_space<vmem>>, vector<1x1x128xf32>
    %65 = vector.shape_cast %64 : vector<1x1x128xf32> to vector<1x128xf32>
    %c3_39 = arith.constant 3 : index
    %c0_40 = arith.constant 0 : index
    %c0_41 = arith.constant 0 : index
    %66 = vector.load %arg3[%c3_39, %c0_40, %c0_41] : memref<20x24x128xf32, #tpu.memory_space<vmem>>, vector<1x24x128xf32>
    %67 = vector.shape_cast %66 : vector<1x24x128xf32> to vector<24x128xf32>
    %c3_42 = arith.constant 3 : index
    %c0_43 = arith.constant 0 : index
    %c0_44 = arith.constant 0 : index
    %68 = vector.load %arg4[%c3_42, %c0_43, %c0_44] : memref<20x24x128xf32, #tpu.memory_space<vmem>>, vector<1x24x128xf32>
    %69 = vector.shape_cast %68 : vector<1x24x128xf32> to vector<24x128xf32>
    %70 = vector.broadcast %63 : vector<1x128xf32> to vector<24x128xf32>
    %71 = arith.mulf %70, %67 : vector<24x128xf32>
    %72 = arith.addf %55, %71 : vector<24x128xf32>
    %73 = vector.broadcast %65 : vector<1x128xf32> to vector<24x128xf32>
    %74 = arith.mulf %73, %69 : vector<24x128xf32>
    %75 = arith.subf %72, %74 : vector<24x128xf32>
    %76 = vector.broadcast %63 : vector<1x128xf32> to vector<24x128xf32>
    %77 = arith.mulf %76, %69 : vector<24x128xf32>
    %78 = arith.addf %61, %77 : vector<24x128xf32>
    %79 = vector.broadcast %65 : vector<1x128xf32> to vector<24x128xf32>
    %80 = arith.mulf %79, %67 : vector<24x128xf32>
    %81 = arith.addf %78, %80 : vector<24x128xf32>
    %c0_45 = arith.constant 0 : index
    %c4 = arith.constant 4 : index
    %c0_46 = arith.constant 0 : index
    %82 = vector.load %arg1[%c0_45, %c4, %c0_46] : memref<1x20x128xf32, #tpu.memory_space<vmem>>, vector<1x1x128xf32>
    %83 = vector.shape_cast %82 : vector<1x1x128xf32> to vector<1x128xf32>
    %c0_47 = arith.constant 0 : index
    %c4_48 = arith.constant 4 : index
    %c0_49 = arith.constant 0 : index
    %84 = vector.load %arg2[%c0_47, %c4_48, %c0_49] : memref<1x20x128xf32, #tpu.memory_space<vmem>>, vector<1x1x128xf32>
    %85 = vector.shape_cast %84 : vector<1x1x128xf32> to vector<1x128xf32>
    %c4_50 = arith.constant 4 : index
    %c0_51 = arith.constant 0 : index
    %c0_52 = arith.constant 0 : index
    %86 = vector.load %arg3[%c4_50, %c0_51, %c0_52] : memref<20x24x128xf32, #tpu.memory_space<vmem>>, vector<1x24x128xf32>
    %87 = vector.shape_cast %86 : vector<1x24x128xf32> to vector<24x128xf32>
    %c4_53 = arith.constant 4 : index
    %c0_54 = arith.constant 0 : index
    %c0_55 = arith.constant 0 : index
    %88 = vector.load %arg4[%c4_53, %c0_54, %c0_55] : memref<20x24x128xf32, #tpu.memory_space<vmem>>, vector<1x24x128xf32>
    %89 = vector.shape_cast %88 : vector<1x24x128xf32> to vector<24x128xf32>
    %90 = vector.broadcast %83 : vector<1x128xf32> to vector<24x128xf32>
    %91 = arith.mulf %90, %87 : vector<24x128xf32>
    %92 = arith.addf %75, %91 : vector<24x128xf32>
    %93 = vector.broadcast %85 : vector<1x128xf32> to vector<24x128xf32>
    %94 = arith.mulf %93, %89 : vector<24x128xf32>
    %95 = arith.subf %92, %94 : vector<24x128xf32>
    %96 = vector.broadcast %83 : vector<1x128xf32> to vector<24x128xf32>
    %97 = arith.mulf %96, %89 : vector<24x128xf32>
    %98 = arith.addf %81, %97 : vector<24x128xf32>
    %99 = vector.broadcast %85 : vector<1x128xf32> to vector<24x128xf32>
    %100 = arith.mulf %99, %87 : vector<24x128xf32>
    %101 = arith.addf %98, %100 : vector<24x128xf32>
    %c0_56 = arith.constant 0 : index
    %c5 = arith.constant 5 : index
    %c0_57 = arith.constant 0 : index
    %102 = vector.load %arg1[%c0_56, %c5, %c0_57] : memref<1x20x128xf32, #tpu.memory_space<vmem>>, vector<1x1x128xf32>
    %103 = vector.shape_cast %102 : vector<1x1x128xf32> to vector<1x128xf32>
    %c0_58 = arith.constant 0 : index
    %c5_59 = arith.constant 5 : index
    %c0_60 = arith.constant 0 : index
    %104 = vector.load %arg2[%c0_58, %c5_59, %c0_60] : memref<1x20x128xf32, #tpu.memory_space<vmem>>, vector<1x1x128xf32>
    %105 = vector.shape_cast %104 : vector<1x1x128xf32> to vector<1x128xf32>
    %c5_61 = arith.constant 5 : index
    %c0_62 = arith.constant 0 : index
    %c0_63 = arith.constant 0 : index
    %106 = vector.load %arg3[%c5_61, %c0_62, %c0_63] : memref<20x24x128xf32, #tpu.memory_space<vmem>>, vector<1x24x128xf32>
    %107 = vector.shape_cast %106 : vector<1x24x128xf32> to vector<24x128xf32>
    %c5_64 = arith.constant 5 : index
    %c0_65 = arith.constant 0 : index
    %c0_66 = arith.constant 0 : index
    %108 = vector.load %arg4[%c5_64, %c0_65, %c0_66] : memref<20x24x128xf32, #tpu.memory_space<vmem>>, vector<1x24x128xf32>
    %109 = vector.shape_cast %108 : vector<1x24x128xf32> to vector<24x128xf32>
    %110 = vector.broadcast %103 : vector<1x128xf32> to vector<24x128xf32>
    %111 = arith.mulf %110, %107 : vector<24x128xf32>
    %112 = arith.addf %95, %111 : vector<24x128xf32>
    %113 = vector.broadcast %105 : vector<1x128xf32> to vector<24x128xf32>
    %114 = arith.mulf %113, %109 : vector<24x128xf32>
    %115 = arith.subf %112, %114 : vector<24x128xf32>
    %116 = vector.broadcast %103 : vector<1x128xf32> to vector<24x128xf32>
    %117 = arith.mulf %116, %109 : vector<24x128xf32>
    %118 = arith.addf %101, %117 : vector<24x128xf32>
    %119 = vector.broadcast %105 : vector<1x128xf32> to vector<24x128xf32>
    %120 = arith.mulf %119, %107 : vector<24x128xf32>
    %121 = arith.addf %118, %120 : vector<24x128xf32>
    %c0_67 = arith.constant 0 : index
    %c6 = arith.constant 6 : index
    %c0_68 = arith.constant 0 : index
    %122 = vector.load %arg1[%c0_67, %c6, %c0_68] : memref<1x20x128xf32, #tpu.memory_space<vmem>>, vector<1x1x128xf32>
    %123 = vector.shape_cast %122 : vector<1x1x128xf32> to vector<1x128xf32>
    %c0_69 = arith.constant 0 : index
    %c6_70 = arith.constant 6 : index
    %c0_71 = arith.constant 0 : index
    %124 = vector.load %arg2[%c0_69, %c6_70, %c0_71] : memref<1x20x128xf32, #tpu.memory_space<vmem>>, vector<1x1x128xf32>
    %125 = vector.shape_cast %124 : vector<1x1x128xf32> to vector<1x128xf32>
    %c6_72 = arith.constant 6 : index
    %c0_73 = arith.constant 0 : index
    %c0_74 = arith.constant 0 : index
    %126 = vector.load %arg3[%c6_72, %c0_73, %c0_74] : memref<20x24x128xf32, #tpu.memory_space<vmem>>, vector<1x24x128xf32>
    %127 = vector.shape_cast %126 : vector<1x24x128xf32> to vector<24x128xf32>
    %c6_75 = arith.constant 6 : index
    %c0_76 = arith.constant 0 : index
    %c0_77 = arith.constant 0 : index
    %128 = vector.load %arg4[%c6_75, %c0_76, %c0_77] : memref<20x24x128xf32, #tpu.memory_space<vmem>>, vector<1x24x128xf32>
    %129 = vector.shape_cast %128 : vector<1x24x128xf32> to vector<24x128xf32>
    %130 = vector.broadcast %123 : vector<1x128xf32> to vector<24x128xf32>
    %131 = arith.mulf %130, %127 : vector<24x128xf32>
    %132 = arith.addf %115, %131 : vector<24x128xf32>
    %133 = vector.broadcast %125 : vector<1x128xf32> to vector<24x128xf32>
    %134 = arith.mulf %133, %129 : vector<24x128xf32>
    %135 = arith.subf %132, %134 : vector<24x128xf32>
    %136 = vector.broadcast %123 : vector<1x128xf32> to vector<24x128xf32>
    %137 = arith.mulf %136, %129 : vector<24x128xf32>
    %138 = arith.addf %121, %137 : vector<24x128xf32>
    %139 = vector.broadcast %125 : vector<1x128xf32> to vector<24x128xf32>
    %140 = arith.mulf %139, %127 : vector<24x128xf32>
    %141 = arith.addf %138, %140 : vector<24x128xf32>
    %c0_78 = arith.constant 0 : index
    %c7 = arith.constant 7 : index
    %c0_79 = arith.constant 0 : index
    %142 = vector.load %arg1[%c0_78, %c7, %c0_79] : memref<1x20x128xf32, #tpu.memory_space<vmem>>, vector<1x1x128xf32>
    %143 = vector.shape_cast %142 : vector<1x1x128xf32> to vector<1x128xf32>
    %c0_80 = arith.constant 0 : index
    %c7_81 = arith.constant 7 : index
    %c0_82 = arith.constant 0 : index
    %144 = vector.load %arg2[%c0_80, %c7_81, %c0_82] : memref<1x20x128xf32, #tpu.memory_space<vmem>>, vector<1x1x128xf32>
    %145 = vector.shape_cast %144 : vector<1x1x128xf32> to vector<1x128xf32>
    %c7_83 = arith.constant 7 : index
    %c0_84 = arith.constant 0 : index
    %c0_85 = arith.constant 0 : index
    %146 = vector.load %arg3[%c7_83, %c0_84, %c0_85] : memref<20x24x128xf32, #tpu.memory_space<vmem>>, vector<1x24x128xf32>
    %147 = vector.shape_cast %146 : vector<1x24x128xf32> to vector<24x128xf32>
    %c7_86 = arith.constant 7 : index
    %c0_87 = arith.constant 0 : index
    %c0_88 = arith.constant 0 : index
    %148 = vector.load %arg4[%c7_86, %c0_87, %c0_88] : memref<20x24x128xf32, #tpu.memory_space<vmem>>, vector<1x24x128xf32>
    %149 = vector.shape_cast %148 : vector<1x24x128xf32> to vector<24x128xf32>
    %150 = vector.broadcast %143 : vector<1x128xf32> to vector<24x128xf32>
    %151 = arith.mulf %150, %147 : vector<24x128xf32>
    %152 = arith.addf %135, %151 : vector<24x128xf32>
    %153 = vector.broadcast %145 : vector<1x128xf32> to vector<24x128xf32>
    %154 = arith.mulf %153, %149 : vector<24x128xf32>
    %155 = arith.subf %152, %154 : vector<24x128xf32>
    %156 = vector.broadcast %143 : vector<1x128xf32> to vector<24x128xf32>
    %157 = arith.mulf %156, %149 : vector<24x128xf32>
    %158 = arith.addf %141, %157 : vector<24x128xf32>
    %159 = vector.broadcast %145 : vector<1x128xf32> to vector<24x128xf32>
    %160 = arith.mulf %159, %147 : vector<24x128xf32>
    %161 = arith.addf %158, %160 : vector<24x128xf32>
    %c0_89 = arith.constant 0 : index
    %c8 = arith.constant 8 : index
    %c0_90 = arith.constant 0 : index
    %162 = vector.load %arg1[%c0_89, %c8, %c0_90] : memref<1x20x128xf32, #tpu.memory_space<vmem>>, vector<1x1x128xf32>
    %163 = vector.shape_cast %162 : vector<1x1x128xf32> to vector<1x128xf32>
    %c0_91 = arith.constant 0 : index
    %c8_92 = arith.constant 8 : index
    %c0_93 = arith.constant 0 : index
    %164 = vector.load %arg2[%c0_91, %c8_92, %c0_93] : memref<1x20x128xf32, #tpu.memory_space<vmem>>, vector<1x1x128xf32>
    %165 = vector.shape_cast %164 : vector<1x1x128xf32> to vector<1x128xf32>
    %c8_94 = arith.constant 8 : index
    %c0_95 = arith.constant 0 : index
    %c0_96 = arith.constant 0 : index
    %166 = vector.load %arg3[%c8_94, %c0_95, %c0_96] : memref<20x24x128xf32, #tpu.memory_space<vmem>>, vector<1x24x128xf32>
    %167 = vector.shape_cast %166 : vector<1x24x128xf32> to vector<24x128xf32>
    %c8_97 = arith.constant 8 : index
    %c0_98 = arith.constant 0 : index
    %c0_99 = arith.constant 0 : index
    %168 = vector.load %arg4[%c8_97, %c0_98, %c0_99] : memref<20x24x128xf32, #tpu.memory_space<vmem>>, vector<1x24x128xf32>
    %169 = vector.shape_cast %168 : vector<1x24x128xf32> to vector<24x128xf32>
    %170 = vector.broadcast %163 : vector<1x128xf32> to vector<24x128xf32>
    %171 = arith.mulf %170, %167 : vector<24x128xf32>
    %172 = arith.addf %155, %171 : vector<24x128xf32>
    %173 = vector.broadcast %165 : vector<1x128xf32> to vector<24x128xf32>
    %174 = arith.mulf %173, %169 : vector<24x128xf32>
    %175 = arith.subf %172, %174 : vector<24x128xf32>
    %176 = vector.broadcast %163 : vector<1x128xf32> to vector<24x128xf32>
    %177 = arith.mulf %176, %169 : vector<24x128xf32>
    %178 = arith.addf %161, %177 : vector<24x128xf32>
    %179 = vector.broadcast %165 : vector<1x128xf32> to vector<24x128xf32>
    %180 = arith.mulf %179, %167 : vector<24x128xf32>
    %181 = arith.addf %178, %180 : vector<24x128xf32>
    %c0_100 = arith.constant 0 : index
    %c9 = arith.constant 9 : index
    %c0_101 = arith.constant 0 : index
    %182 = vector.load %arg1[%c0_100, %c9, %c0_101] : memref<1x20x128xf32, #tpu.memory_space<vmem>>, vector<1x1x128xf32>
    %183 = vector.shape_cast %182 : vector<1x1x128xf32> to vector<1x128xf32>
    %c0_102 = arith.constant 0 : index
    %c9_103 = arith.constant 9 : index
    %c0_104 = arith.constant 0 : index
    %184 = vector.load %arg2[%c0_102, %c9_103, %c0_104] : memref<1x20x128xf32, #tpu.memory_space<vmem>>, vector<1x1x128xf32>
    %185 = vector.shape_cast %184 : vector<1x1x128xf32> to vector<1x128xf32>
    %c9_105 = arith.constant 9 : index
    %c0_106 = arith.constant 0 : index
    %c0_107 = arith.constant 0 : index
    %186 = vector.load %arg3[%c9_105, %c0_106, %c0_107] : memref<20x24x128xf32, #tpu.memory_space<vmem>>, vector<1x24x128xf32>
    %187 = vector.shape_cast %186 : vector<1x24x128xf32> to vector<24x128xf32>
    %c9_108 = arith.constant 9 : index
    %c0_109 = arith.constant 0 : index
    %c0_110 = arith.constant 0 : index
    %188 = vector.load %arg4[%c9_108, %c0_109, %c0_110] : memref<20x24x128xf32, #tpu.memory_space<vmem>>, vector<1x24x128xf32>
    %189 = vector.shape_cast %188 : vector<1x24x128xf32> to vector<24x128xf32>
    %190 = vector.broadcast %183 : vector<1x128xf32> to vector<24x128xf32>
    %191 = arith.mulf %190, %187 : vector<24x128xf32>
    %192 = arith.addf %175, %191 : vector<24x128xf32>
    %193 = vector.broadcast %185 : vector<1x128xf32> to vector<24x128xf32>
    %194 = arith.mulf %193, %189 : vector<24x128xf32>
    %195 = arith.subf %192, %194 : vector<24x128xf32>
    %196 = vector.broadcast %183 : vector<1x128xf32> to vector<24x128xf32>
    %197 = arith.mulf %196, %189 : vector<24x128xf32>
    %198 = arith.addf %181, %197 : vector<24x128xf32>
    %199 = vector.broadcast %185 : vector<1x128xf32> to vector<24x128xf32>
    %200 = arith.mulf %199, %187 : vector<24x128xf32>
    %201 = arith.addf %198, %200 : vector<24x128xf32>
    %c0_111 = arith.constant 0 : index
    %c10 = arith.constant 10 : index
    %c0_112 = arith.constant 0 : index
    %202 = vector.load %arg1[%c0_111, %c10, %c0_112] : memref<1x20x128xf32, #tpu.memory_space<vmem>>, vector<1x1x128xf32>
    %203 = vector.shape_cast %202 : vector<1x1x128xf32> to vector<1x128xf32>
    %c0_113 = arith.constant 0 : index
    %c10_114 = arith.constant 10 : index
    %c0_115 = arith.constant 0 : index
    %204 = vector.load %arg2[%c0_113, %c10_114, %c0_115] : memref<1x20x128xf32, #tpu.memory_space<vmem>>, vector<1x1x128xf32>
    %205 = vector.shape_cast %204 : vector<1x1x128xf32> to vector<1x128xf32>
    %c10_116 = arith.constant 10 : index
    %c0_117 = arith.constant 0 : index
    %c0_118 = arith.constant 0 : index
    %206 = vector.load %arg3[%c10_116, %c0_117, %c0_118] : memref<20x24x128xf32, #tpu.memory_space<vmem>>, vector<1x24x128xf32>
    %207 = vector.shape_cast %206 : vector<1x24x128xf32> to vector<24x128xf32>
    %c10_119 = arith.constant 10 : index
    %c0_120 = arith.constant 0 : index
    %c0_121 = arith.constant 0 : index
    %208 = vector.load %arg4[%c10_119, %c0_120, %c0_121] : memref<20x24x128xf32, #tpu.memory_space<vmem>>, vector<1x24x128xf32>
    %209 = vector.shape_cast %208 : vector<1x24x128xf32> to vector<24x128xf32>
    %210 = vector.broadcast %203 : vector<1x128xf32> to vector<24x128xf32>
    %211 = arith.mulf %210, %207 : vector<24x128xf32>
    %212 = arith.addf %195, %211 : vector<24x128xf32>
    %213 = vector.broadcast %205 : vector<1x128xf32> to vector<24x128xf32>
    %214 = arith.mulf %213, %209 : vector<24x128xf32>
    %215 = arith.subf %212, %214 : vector<24x128xf32>
    %216 = vector.broadcast %203 : vector<1x128xf32> to vector<24x128xf32>
    %217 = arith.mulf %216, %209 : vector<24x128xf32>
    %218 = arith.addf %201, %217 : vector<24x128xf32>
    %219 = vector.broadcast %205 : vector<1x128xf32> to vector<24x128xf32>
    %220 = arith.mulf %219, %207 : vector<24x128xf32>
    %221 = arith.addf %218, %220 : vector<24x128xf32>
    %c0_122 = arith.constant 0 : index
    %c11 = arith.constant 11 : index
    %c0_123 = arith.constant 0 : index
    %222 = vector.load %arg1[%c0_122, %c11, %c0_123] : memref<1x20x128xf32, #tpu.memory_space<vmem>>, vector<1x1x128xf32>
    %223 = vector.shape_cast %222 : vector<1x1x128xf32> to vector<1x128xf32>
    %c0_124 = arith.constant 0 : index
    %c11_125 = arith.constant 11 : index
    %c0_126 = arith.constant 0 : index
    %224 = vector.load %arg2[%c0_124, %c11_125, %c0_126] : memref<1x20x128xf32, #tpu.memory_space<vmem>>, vector<1x1x128xf32>
    %225 = vector.shape_cast %224 : vector<1x1x128xf32> to vector<1x128xf32>
    %c11_127 = arith.constant 11 : index
    %c0_128 = arith.constant 0 : index
    %c0_129 = arith.constant 0 : index
    %226 = vector.load %arg3[%c11_127, %c0_128, %c0_129] : memref<20x24x128xf32, #tpu.memory_space<vmem>>, vector<1x24x128xf32>
    %227 = vector.shape_cast %226 : vector<1x24x128xf32> to vector<24x128xf32>
    %c11_130 = arith.constant 11 : index
    %c0_131 = arith.constant 0 : index
    %c0_132 = arith.constant 0 : index
    %228 = vector.load %arg4[%c11_130, %c0_131, %c0_132] : memref<20x24x128xf32, #tpu.memory_space<vmem>>, vector<1x24x128xf32>
    %229 = vector.shape_cast %228 : vector<1x24x128xf32> to vector<24x128xf32>
    %230 = vector.broadcast %223 : vector<1x128xf32> to vector<24x128xf32>
    %231 = arith.mulf %230, %227 : vector<24x128xf32>
    %232 = arith.addf %215, %231 : vector<24x128xf32>
    %233 = vector.broadcast %225 : vector<1x128xf32> to vector<24x128xf32>
    %234 = arith.mulf %233, %229 : vector<24x128xf32>
    %235 = arith.subf %232, %234 : vector<24x128xf32>
    %236 = vector.broadcast %223 : vector<1x128xf32> to vector<24x128xf32>
    %237 = arith.mulf %236, %229 : vector<24x128xf32>
    %238 = arith.addf %221, %237 : vector<24x128xf32>
    %239 = vector.broadcast %225 : vector<1x128xf32> to vector<24x128xf32>
    %240 = arith.mulf %239, %227 : vector<24x128xf32>
    %241 = arith.addf %238, %240 : vector<24x128xf32>
    %c0_133 = arith.constant 0 : index
    %c12 = arith.constant 12 : index
    %c0_134 = arith.constant 0 : index
    %242 = vector.load %arg1[%c0_133, %c12, %c0_134] : memref<1x20x128xf32, #tpu.memory_space<vmem>>, vector<1x1x128xf32>
    %243 = vector.shape_cast %242 : vector<1x1x128xf32> to vector<1x128xf32>
    %c0_135 = arith.constant 0 : index
    %c12_136 = arith.constant 12 : index
    %c0_137 = arith.constant 0 : index
    %244 = vector.load %arg2[%c0_135, %c12_136, %c0_137] : memref<1x20x128xf32, #tpu.memory_space<vmem>>, vector<1x1x128xf32>
    %245 = vector.shape_cast %244 : vector<1x1x128xf32> to vector<1x128xf32>
    %c12_138 = arith.constant 12 : index
    %c0_139 = arith.constant 0 : index
    %c0_140 = arith.constant 0 : index
    %246 = vector.load %arg3[%c12_138, %c0_139, %c0_140] : memref<20x24x128xf32, #tpu.memory_space<vmem>>, vector<1x24x128xf32>
    %247 = vector.shape_cast %246 : vector<1x24x128xf32> to vector<24x128xf32>
    %c12_141 = arith.constant 12 : index
    %c0_142 = arith.constant 0 : index
    %c0_143 = arith.constant 0 : index
    %248 = vector.load %arg4[%c12_141, %c0_142, %c0_143] : memref<20x24x128xf32, #tpu.memory_space<vmem>>, vector<1x24x128xf32>
    %249 = vector.shape_cast %248 : vector<1x24x128xf32> to vector<24x128xf32>
    %250 = vector.broadcast %243 : vector<1x128xf32> to vector<24x128xf32>
    %251 = arith.mulf %250, %247 : vector<24x128xf32>
    %252 = arith.addf %235, %251 : vector<24x128xf32>
    %253 = vector.broadcast %245 : vector<1x128xf32> to vector<24x128xf32>
    %254 = arith.mulf %253, %249 : vector<24x128xf32>
    %255 = arith.subf %252, %254 : vector<24x128xf32>
    %256 = vector.broadcast %243 : vector<1x128xf32> to vector<24x128xf32>
    %257 = arith.mulf %256, %249 : vector<24x128xf32>
    %258 = arith.addf %241, %257 : vector<24x128xf32>
    %259 = vector.broadcast %245 : vector<1x128xf32> to vector<24x128xf32>
    %260 = arith.mulf %259, %247 : vector<24x128xf32>
    %261 = arith.addf %258, %260 : vector<24x128xf32>
    %c0_144 = arith.constant 0 : index
    %c13 = arith.constant 13 : index
    %c0_145 = arith.constant 0 : index
    %262 = vector.load %arg1[%c0_144, %c13, %c0_145] : memref<1x20x128xf32, #tpu.memory_space<vmem>>, vector<1x1x128xf32>
    %263 = vector.shape_cast %262 : vector<1x1x128xf32> to vector<1x128xf32>
    %c0_146 = arith.constant 0 : index
    %c13_147 = arith.constant 13 : index
    %c0_148 = arith.constant 0 : index
    %264 = vector.load %arg2[%c0_146, %c13_147, %c0_148] : memref<1x20x128xf32, #tpu.memory_space<vmem>>, vector<1x1x128xf32>
    %265 = vector.shape_cast %264 : vector<1x1x128xf32> to vector<1x128xf32>
    %c13_149 = arith.constant 13 : index
    %c0_150 = arith.constant 0 : index
    %c0_151 = arith.constant 0 : index
    %266 = vector.load %arg3[%c13_149, %c0_150, %c0_151] : memref<20x24x128xf32, #tpu.memory_space<vmem>>, vector<1x24x128xf32>
    %267 = vector.shape_cast %266 : vector<1x24x128xf32> to vector<24x128xf32>
    %c13_152 = arith.constant 13 : index
    %c0_153 = arith.constant 0 : index
    %c0_154 = arith.constant 0 : index
    %268 = vector.load %arg4[%c13_152, %c0_153, %c0_154] : memref<20x24x128xf32, #tpu.memory_space<vmem>>, vector<1x24x128xf32>
    %269 = vector.shape_cast %268 : vector<1x24x128xf32> to vector<24x128xf32>
    %270 = vector.broadcast %263 : vector<1x128xf32> to vector<24x128xf32>
    %271 = arith.mulf %270, %267 : vector<24x128xf32>
    %272 = arith.addf %255, %271 : vector<24x128xf32>
    %273 = vector.broadcast %265 : vector<1x128xf32> to vector<24x128xf32>
    %274 = arith.mulf %273, %269 : vector<24x128xf32>
    %275 = arith.subf %272, %274 : vector<24x128xf32>
    %276 = vector.broadcast %263 : vector<1x128xf32> to vector<24x128xf32>
    %277 = arith.mulf %276, %269 : vector<24x128xf32>
    %278 = arith.addf %261, %277 : vector<24x128xf32>
    %279 = vector.broadcast %265 : vector<1x128xf32> to vector<24x128xf32>
    %280 = arith.mulf %279, %267 : vector<24x128xf32>
    %281 = arith.addf %278, %280 : vector<24x128xf32>
    %c0_155 = arith.constant 0 : index
    %c14 = arith.constant 14 : index
    %c0_156 = arith.constant 0 : index
    %282 = vector.load %arg1[%c0_155, %c14, %c0_156] : memref<1x20x128xf32, #tpu.memory_space<vmem>>, vector<1x1x128xf32>
    %283 = vector.shape_cast %282 : vector<1x1x128xf32> to vector<1x128xf32>
    %c0_157 = arith.constant 0 : index
    %c14_158 = arith.constant 14 : index
    %c0_159 = arith.constant 0 : index
    %284 = vector.load %arg2[%c0_157, %c14_158, %c0_159] : memref<1x20x128xf32, #tpu.memory_space<vmem>>, vector<1x1x128xf32>
    %285 = vector.shape_cast %284 : vector<1x1x128xf32> to vector<1x128xf32>
    %c14_160 = arith.constant 14 : index
    %c0_161 = arith.constant 0 : index
    %c0_162 = arith.constant 0 : index
    %286 = vector.load %arg3[%c14_160, %c0_161, %c0_162] : memref<20x24x128xf32, #tpu.memory_space<vmem>>, vector<1x24x128xf32>
    %287 = vector.shape_cast %286 : vector<1x24x128xf32> to vector<24x128xf32>
    %c14_163 = arith.constant 14 : index
    %c0_164 = arith.constant 0 : index
    %c0_165 = arith.constant 0 : index
    %288 = vector.load %arg4[%c14_163, %c0_164, %c0_165] : memref<20x24x128xf32, #tpu.memory_space<vmem>>, vector<1x24x128xf32>
    %289 = vector.shape_cast %288 : vector<1x24x128xf32> to vector<24x128xf32>
    %290 = vector.broadcast %283 : vector<1x128xf32> to vector<24x128xf32>
    %291 = arith.mulf %290, %287 : vector<24x128xf32>
    %292 = arith.addf %275, %291 : vector<24x128xf32>
    %293 = vector.broadcast %285 : vector<1x128xf32> to vector<24x128xf32>
    %294 = arith.mulf %293, %289 : vector<24x128xf32>
    %295 = arith.subf %292, %294 : vector<24x128xf32>
    %296 = vector.broadcast %283 : vector<1x128xf32> to vector<24x128xf32>
    %297 = arith.mulf %296, %289 : vector<24x128xf32>
    %298 = arith.addf %281, %297 : vector<24x128xf32>
    %299 = vector.broadcast %285 : vector<1x128xf32> to vector<24x128xf32>
    %300 = arith.mulf %299, %287 : vector<24x128xf32>
    %301 = arith.addf %298, %300 : vector<24x128xf32>
    %c0_166 = arith.constant 0 : index
    %c15 = arith.constant 15 : index
    %c0_167 = arith.constant 0 : index
    %302 = vector.load %arg1[%c0_166, %c15, %c0_167] : memref<1x20x128xf32, #tpu.memory_space<vmem>>, vector<1x1x128xf32>
    %303 = vector.shape_cast %302 : vector<1x1x128xf32> to vector<1x128xf32>
    %c0_168 = arith.constant 0 : index
    %c15_169 = arith.constant 15 : index
    %c0_170 = arith.constant 0 : index
    %304 = vector.load %arg2[%c0_168, %c15_169, %c0_170] : memref<1x20x128xf32, #tpu.memory_space<vmem>>, vector<1x1x128xf32>
    %305 = vector.shape_cast %304 : vector<1x1x128xf32> to vector<1x128xf32>
    %c15_171 = arith.constant 15 : index
    %c0_172 = arith.constant 0 : index
    %c0_173 = arith.constant 0 : index
    %306 = vector.load %arg3[%c15_171, %c0_172, %c0_173] : memref<20x24x128xf32, #tpu.memory_space<vmem>>, vector<1x24x128xf32>
    %307 = vector.shape_cast %306 : vector<1x24x128xf32> to vector<24x128xf32>
    %c15_174 = arith.constant 15 : index
    %c0_175 = arith.constant 0 : index
    %c0_176 = arith.constant 0 : index
    %308 = vector.load %arg4[%c15_174, %c0_175, %c0_176] : memref<20x24x128xf32, #tpu.memory_space<vmem>>, vector<1x24x128xf32>
    %309 = vector.shape_cast %308 : vector<1x24x128xf32> to vector<24x128xf32>
    %310 = vector.broadcast %303 : vector<1x128xf32> to vector<24x128xf32>
    %311 = arith.mulf %310, %307 : vector<24x128xf32>
    %312 = arith.addf %295, %311 : vector<24x128xf32>
    %313 = vector.broadcast %305 : vector<1x128xf32> to vector<24x128xf32>
    %314 = arith.mulf %313, %309 : vector<24x128xf32>
    %315 = arith.subf %312, %314 : vector<24x128xf32>
    %316 = vector.broadcast %303 : vector<1x128xf32> to vector<24x128xf32>
    %317 = arith.mulf %316, %309 : vector<24x128xf32>
    %318 = arith.addf %301, %317 : vector<24x128xf32>
    %319 = vector.broadcast %305 : vector<1x128xf32> to vector<24x128xf32>
    %320 = arith.mulf %319, %307 : vector<24x128xf32>
    %321 = arith.addf %318, %320 : vector<24x128xf32>
    %c0_177 = arith.constant 0 : index
    %c16 = arith.constant 16 : index
    %c0_178 = arith.constant 0 : index
    %322 = vector.load %arg1[%c0_177, %c16, %c0_178] : memref<1x20x128xf32, #tpu.memory_space<vmem>>, vector<1x1x128xf32>
    %323 = vector.shape_cast %322 : vector<1x1x128xf32> to vector<1x128xf32>
    %c0_179 = arith.constant 0 : index
    %c16_180 = arith.constant 16 : index
    %c0_181 = arith.constant 0 : index
    %324 = vector.load %arg2[%c0_179, %c16_180, %c0_181] : memref<1x20x128xf32, #tpu.memory_space<vmem>>, vector<1x1x128xf32>
    %325 = vector.shape_cast %324 : vector<1x1x128xf32> to vector<1x128xf32>
    %c16_182 = arith.constant 16 : index
    %c0_183 = arith.constant 0 : index
    %c0_184 = arith.constant 0 : index
    %326 = vector.load %arg3[%c16_182, %c0_183, %c0_184] : memref<20x24x128xf32, #tpu.memory_space<vmem>>, vector<1x24x128xf32>
    %327 = vector.shape_cast %326 : vector<1x24x128xf32> to vector<24x128xf32>
    %c16_185 = arith.constant 16 : index
    %c0_186 = arith.constant 0 : index
    %c0_187 = arith.constant 0 : index
    %328 = vector.load %arg4[%c16_185, %c0_186, %c0_187] : memref<20x24x128xf32, #tpu.memory_space<vmem>>, vector<1x24x128xf32>
    %329 = vector.shape_cast %328 : vector<1x24x128xf32> to vector<24x128xf32>
    %330 = vector.broadcast %323 : vector<1x128xf32> to vector<24x128xf32>
    %331 = arith.mulf %330, %327 : vector<24x128xf32>
    %332 = arith.addf %315, %331 : vector<24x128xf32>
    %333 = vector.broadcast %325 : vector<1x128xf32> to vector<24x128xf32>
    %334 = arith.mulf %333, %329 : vector<24x128xf32>
    %335 = arith.subf %332, %334 : vector<24x128xf32>
    %336 = vector.broadcast %323 : vector<1x128xf32> to vector<24x128xf32>
    %337 = arith.mulf %336, %329 : vector<24x128xf32>
    %338 = arith.addf %321, %337 : vector<24x128xf32>
    %339 = vector.broadcast %325 : vector<1x128xf32> to vector<24x128xf32>
    %340 = arith.mulf %339, %327 : vector<24x128xf32>
    %341 = arith.addf %338, %340 : vector<24x128xf32>
    %c0_188 = arith.constant 0 : index
    %c17 = arith.constant 17 : index
    %c0_189 = arith.constant 0 : index
    %342 = vector.load %arg1[%c0_188, %c17, %c0_189] : memref<1x20x128xf32, #tpu.memory_space<vmem>>, vector<1x1x128xf32>
    %343 = vector.shape_cast %342 : vector<1x1x128xf32> to vector<1x128xf32>
    %c0_190 = arith.constant 0 : index
    %c17_191 = arith.constant 17 : index
    %c0_192 = arith.constant 0 : index
    %344 = vector.load %arg2[%c0_190, %c17_191, %c0_192] : memref<1x20x128xf32, #tpu.memory_space<vmem>>, vector<1x1x128xf32>
    %345 = vector.shape_cast %344 : vector<1x1x128xf32> to vector<1x128xf32>
    %c17_193 = arith.constant 17 : index
    %c0_194 = arith.constant 0 : index
    %c0_195 = arith.constant 0 : index
    %346 = vector.load %arg3[%c17_193, %c0_194, %c0_195] : memref<20x24x128xf32, #tpu.memory_space<vmem>>, vector<1x24x128xf32>
    %347 = vector.shape_cast %346 : vector<1x24x128xf32> to vector<24x128xf32>
    %c17_196 = arith.constant 17 : index
    %c0_197 = arith.constant 0 : index
    %c0_198 = arith.constant 0 : index
    %348 = vector.load %arg4[%c17_196, %c0_197, %c0_198] : memref<20x24x128xf32, #tpu.memory_space<vmem>>, vector<1x24x128xf32>
    %349 = vector.shape_cast %348 : vector<1x24x128xf32> to vector<24x128xf32>
    %350 = vector.broadcast %343 : vector<1x128xf32> to vector<24x128xf32>
    %351 = arith.mulf %350, %347 : vector<24x128xf32>
    %352 = arith.addf %335, %351 : vector<24x128xf32>
    %353 = vector.broadcast %345 : vector<1x128xf32> to vector<24x128xf32>
    %354 = arith.mulf %353, %349 : vector<24x128xf32>
    %355 = arith.subf %352, %354 : vector<24x128xf32>
    %356 = vector.broadcast %343 : vector<1x128xf32> to vector<24x128xf32>
    %357 = arith.mulf %356, %349 : vector<24x128xf32>
    %358 = arith.addf %341, %357 : vector<24x128xf32>
    %359 = vector.broadcast %345 : vector<1x128xf32> to vector<24x128xf32>
    %360 = arith.mulf %359, %347 : vector<24x128xf32>
    %361 = arith.addf %358, %360 : vector<24x128xf32>
    %c0_199 = arith.constant 0 : index
    %c18 = arith.constant 18 : index
    %c0_200 = arith.constant 0 : index
    %362 = vector.load %arg1[%c0_199, %c18, %c0_200] : memref<1x20x128xf32, #tpu.memory_space<vmem>>, vector<1x1x128xf32>
    %363 = vector.shape_cast %362 : vector<1x1x128xf32> to vector<1x128xf32>
    %c0_201 = arith.constant 0 : index
    %c18_202 = arith.constant 18 : index
    %c0_203 = arith.constant 0 : index
    %364 = vector.load %arg2[%c0_201, %c18_202, %c0_203] : memref<1x20x128xf32, #tpu.memory_space<vmem>>, vector<1x1x128xf32>
    %365 = vector.shape_cast %364 : vector<1x1x128xf32> to vector<1x128xf32>
    %c18_204 = arith.constant 18 : index
    %c0_205 = arith.constant 0 : index
    %c0_206 = arith.constant 0 : index
    %366 = vector.load %arg3[%c18_204, %c0_205, %c0_206] : memref<20x24x128xf32, #tpu.memory_space<vmem>>, vector<1x24x128xf32>
    %367 = vector.shape_cast %366 : vector<1x24x128xf32> to vector<24x128xf32>
    %c18_207 = arith.constant 18 : index
    %c0_208 = arith.constant 0 : index
    %c0_209 = arith.constant 0 : index
    %368 = vector.load %arg4[%c18_207, %c0_208, %c0_209] : memref<20x24x128xf32, #tpu.memory_space<vmem>>, vector<1x24x128xf32>
    %369 = vector.shape_cast %368 : vector<1x24x128xf32> to vector<24x128xf32>
    %370 = vector.broadcast %363 : vector<1x128xf32> to vector<24x128xf32>
    %371 = arith.mulf %370, %367 : vector<24x128xf32>
    %372 = arith.addf %355, %371 : vector<24x128xf32>
    %373 = vector.broadcast %365 : vector<1x128xf32> to vector<24x128xf32>
    %374 = arith.mulf %373, %369 : vector<24x128xf32>
    %375 = arith.subf %372, %374 : vector<24x128xf32>
    %376 = vector.broadcast %363 : vector<1x128xf32> to vector<24x128xf32>
    %377 = arith.mulf %376, %369 : vector<24x128xf32>
    %378 = arith.addf %361, %377 : vector<24x128xf32>
    %379 = vector.broadcast %365 : vector<1x128xf32> to vector<24x128xf32>
    %380 = arith.mulf %379, %367 : vector<24x128xf32>
    %381 = arith.addf %378, %380 : vector<24x128xf32>
    %c0_210 = arith.constant 0 : index
    %c19 = arith.constant 19 : index
    %c0_211 = arith.constant 0 : index
    %382 = vector.load %arg1[%c0_210, %c19, %c0_211] : memref<1x20x128xf32, #tpu.memory_space<vmem>>, vector<1x1x128xf32>
    %383 = vector.shape_cast %382 : vector<1x1x128xf32> to vector<1x128xf32>
    %c0_212 = arith.constant 0 : index
    %c19_213 = arith.constant 19 : index
    %c0_214 = arith.constant 0 : index
    %384 = vector.load %arg2[%c0_212, %c19_213, %c0_214] : memref<1x20x128xf32, #tpu.memory_space<vmem>>, vector<1x1x128xf32>
    %385 = vector.shape_cast %384 : vector<1x1x128xf32> to vector<1x128xf32>
    %c19_215 = arith.constant 19 : index
    %c0_216 = arith.constant 0 : index
    %c0_217 = arith.constant 0 : index
    %386 = vector.load %arg3[%c19_215, %c0_216, %c0_217] : memref<20x24x128xf32, #tpu.memory_space<vmem>>, vector<1x24x128xf32>
    %387 = vector.shape_cast %386 : vector<1x24x128xf32> to vector<24x128xf32>
    %c19_218 = arith.constant 19 : index
    %c0_219 = arith.constant 0 : index
    %c0_220 = arith.constant 0 : index
    %388 = vector.load %arg4[%c19_218, %c0_219, %c0_220] : memref<20x24x128xf32, #tpu.memory_space<vmem>>, vector<1x24x128xf32>
    %389 = vector.shape_cast %388 : vector<1x24x128xf32> to vector<24x128xf32>
    %390 = vector.broadcast %383 : vector<1x128xf32> to vector<24x128xf32>
    %391 = arith.mulf %390, %387 : vector<24x128xf32>
    %392 = arith.addf %375, %391 : vector<24x128xf32>
    %393 = vector.broadcast %385 : vector<1x128xf32> to vector<24x128xf32>
    %394 = arith.mulf %393, %389 : vector<24x128xf32>
    %395 = arith.subf %392, %394 : vector<24x128xf32>
    %396 = vector.broadcast %383 : vector<1x128xf32> to vector<24x128xf32>
    %397 = arith.mulf %396, %389 : vector<24x128xf32>
    %398 = arith.addf %381, %397 : vector<24x128xf32>
    %399 = vector.broadcast %385 : vector<1x128xf32> to vector<24x128xf32>
    %400 = arith.mulf %399, %387 : vector<24x128xf32>
    %401 = arith.addf %398, %400 : vector<24x128xf32>
    %c0_221 = arith.constant 0 : index
    %c0_222 = arith.constant 0 : index
    %c0_223 = arith.constant 0 : index
    %402 = vector.load %arg5[%c0_221, %c0_222, %c0_223] : memref<1x24x128xf32, #tpu.memory_space<vmem>>, vector<1x24x128xf32>
    %403 = vector.shape_cast %402 : vector<1x24x128xf32> to vector<24x128xf32>
    %404 = vector.shape_cast %395 : vector<24x128xf32> to vector<1x24x128xf32>
    tpu.vector_store %arg5[%c0_221, %c0_222, %c0_223], %404 {strides = array<i32>} : memref<1x24x128xf32, #tpu.memory_space<vmem>>, vector<1x24x128xf32>,
    %c0_224 = arith.constant 0 : index
    %c0_225 = arith.constant 0 : index
    %c0_226 = arith.constant 0 : index
    %405 = vector.load %arg6[%c0_224, %c0_225, %c0_226] : memref<1x24x128xf32, #tpu.memory_space<vmem>>, vector<1x24x128xf32>
    %406 = vector.shape_cast %405 : vector<1x24x128xf32> to vector<24x128xf32>
    %407 = vector.shape_cast %401 : vector<24x128xf32> to vector<1x24x128xf32>
    tpu.vector_store %arg6[%c0_224, %c0_225, %c0_226], %407 {strides = array<i32>} : memref<1x24x128xf32, #tpu.memory_space<vmem>>, vector<1x24x128xf32>,
    return
  }
  func.func @transform_0(%arg0: i32) -> (i32, i32, i32) {
    %c0_i32 = arith.constant 0 : i32
    %c0_i32_0 = arith.constant 0 : i32
    %c0_i32_1 = arith.constant 0 : i32
    return %arg0, %c0_i32, %c0_i32_0 : i32, i32, i32
  }
  func.func @transform_1(%arg0: i32) -> (i32, i32, i32) {
    %c0_i32 = arith.constant 0 : i32
    %c0_i32_0 = arith.constant 0 : i32
    %c0_i32_1 = arith.constant 0 : i32
    return %arg0, %c0_i32, %c0_i32_0 : i32, i32, i32
  }
  func.func @transform_2(%arg0: i32) -> (i32, i32, i32) {
    %c0_i32 = arith.constant 0 : i32
    %c0_i32_0 = arith.constant 0 : i32
    %c0_i32_1 = arith.constant 0 : i32
    %c0_i32_2 = arith.constant 0 : i32
    return %c0_i32, %c0_i32_0, %c0_i32_1 : i32, i32, i32
  }
  func.func @transform_3(%arg0: i32) -> (i32, i32, i32) {
    %c0_i32 = arith.constant 0 : i32
    %c0_i32_0 = arith.constant 0 : i32
    %c0_i32_1 = arith.constant 0 : i32
    %c0_i32_2 = arith.constant 0 : i32
    return %c0_i32, %c0_i32_0, %c0_i32_1 : i32, i32, i32
  }
  func.func @transform_4(%arg0: i32) -> (i32, i32, i32) {
    %c0_i32 = arith.constant 0 : i32
    %c0_i32_0 = arith.constant 0 : i32
    %c0_i32_1 = arith.constant 0 : i32
    return %arg0, %c0_i32, %c0_i32_0 : i32, i32, i32
  }
  func.func @transform_5(%arg0: i32) -> (i32, i32, i32) {
    %c0_i32 = arith.constant 0 : i32
    %c0_i32_0 = arith.constant 0 : i32
    %c0_i32_1 = arith.constant 0 : i32
    return %arg0, %c0_i32, %c0_i32_0 : i32, i32, i32
  }
}

module attributes {stable_mosaic.version = 11 : i64} {
  func.func @kernel(%arg0: i32, %arg1: memref<328x128xbf16, #tpu.memory_space<vmem>>, %arg2: memref<128x128xbf16, #tpu.memory_space<vmem>>, %arg3: memref<1x128xf32, #tpu.memory_space<vmem>>, %arg4: memref<328x128xbf16, #tpu.memory_space<vmem>>, %arg5: memref<328x128xbf16, #tpu.memory_space<vmem>>) attributes {dimension_semantics = [#tpu.dimension_semantics<parallel>], iteration_bounds = array<i64: 2>, scalar_prefetch = 0 : i64, scratch_operands = 0 : i64, tpu.core_type = #tpu.core_type<tc>, window_params = [{transform_indices = @transform_0, window_bounds = array<i64: 328, 128>}, {pipeline_mode = #tpu.pipeline_mode<synchronous>, transform_indices = @transform_1, window_bounds = array<i64: 128, 128>}, {pipeline_mode = #tpu.pipeline_mode<synchronous>, transform_indices = @transform_2, window_bounds = array<i64: 1, 128>}, {transform_indices = @transform_3, window_bounds = array<i64: 328, 128>}, {transform_indices = @transform_4, window_bounds = array<i64: 328, 128>}]} {
    %c0 = arith.constant 0 : index
    %c0_0 = arith.constant 0 : index
    %0 = vector.load %arg1[%c0, %c0_0] : memref<328x128xbf16, #tpu.memory_space<vmem>>, vector<328x128xbf16>
    %c0_1 = arith.constant 0 : index
    %c0_2 = arith.constant 0 : index
    %1 = vector.load %arg2[%c0_1, %c0_2] : memref<128x128xbf16, #tpu.memory_space<vmem>>, vector<128x128xbf16>
    %cst = arith.constant dense<0.000000e+00> : vector<328x128xf32>
    %2 = tpu.matmul %0, %1, %cst {dimension_numbers = #tpu.dot_dimension_numbers<[1], [0], [0], [1], [0, 0, 1, 1], [], []>} : vector<328x128xbf16>, vector<128x128xbf16>, vector<328x128xf32> -> vector<328x128xf32>
    %c0_3 = arith.constant 0 : index
    %c0_4 = arith.constant 0 : index
    %3 = vector.load %arg3[%c0_3, %c0_4] : memref<1x128xf32, #tpu.memory_space<vmem>>, vector<1x128xf32>
    %4 = vector.broadcast %3 : vector<1x128xf32> to vector<328x128xf32>
    %5 = arith.addf %2, %4 : vector<328x128xf32>
    %c0_5 = arith.constant 0 : index
    %c0_6 = arith.constant 0 : index
    %6 = vector.load %arg4[%c0_5, %c0_6] : memref<328x128xbf16, #tpu.memory_space<vmem>>, vector<328x128xbf16>
    %7 = arith.extf %6 : vector<328x128xbf16> to vector<328x128xf32>
    %8 = arith.addf %5, %7 : vector<328x128xf32>
    %cst_7 = arith.constant 5.000000e-01 : f32
    %9 = vector.broadcast %cst_7 : f32 to vector<328x128xf32>
    %10 = arith.mulf %9, %8 : vector<328x128xf32>
    %cst_8 = arith.constant 0.707106769 : f32
    %11 = vector.broadcast %cst_8 : f32 to vector<328x128xf32>
    %12 = arith.mulf %8, %11 : vector<328x128xf32>
    %13 = math.erf %12 : vector<328x128xf32>
    %cst_9 = arith.constant 1.000000e+00 : f32
    %14 = vector.broadcast %cst_9 : f32 to vector<328x128xf32>
    %15 = arith.addf %14, %13 : vector<328x128xf32>
    %16 = arith.mulf %10, %15 : vector<328x128xf32>
    %17 = arith.truncf %16 : vector<328x128xf32> to vector<328x128xbf16>
    %c0_10 = arith.constant 0 : index
    %c0_11 = arith.constant 0 : index
    %18 = vector.load %arg5[%c0_10, %c0_11] : memref<328x128xbf16, #tpu.memory_space<vmem>>, vector<328x128xbf16>
    tpu.vector_store %arg5[%c0_10, %c0_11], %17 {strides = array<i32>} : memref<328x128xbf16, #tpu.memory_space<vmem>>, vector<328x128xbf16>,
    return
  }
  func.func @transform_0(%arg0: i32) -> (i32, i32) {
    %c0_i32 = arith.constant 0 : i32
    %c0_i32_0 = arith.constant 0 : i32
    return %arg0, %c0_i32 : i32, i32
  }
  func.func @transform_1(%arg0: i32) -> (i32, i32) {
    %c0_i32 = arith.constant 0 : i32
    %c0_i32_0 = arith.constant 0 : i32
    %c0_i32_1 = arith.constant 0 : i32
    return %c0_i32, %c0_i32_0 : i32, i32
  }
  func.func @transform_2(%arg0: i32) -> (i32, i32) {
    %c0_i32 = arith.constant 0 : i32
    %c0_i32_0 = arith.constant 0 : i32
    %c0_i32_1 = arith.constant 0 : i32
    return %c0_i32, %c0_i32_0 : i32, i32
  }
  func.func @transform_3(%arg0: i32) -> (i32, i32) {
    %c0_i32 = arith.constant 0 : i32
    %c0_i32_0 = arith.constant 0 : i32
    return %arg0, %c0_i32 : i32, i32
  }
  func.func @transform_4(%arg0: i32) -> (i32, i32) {
    %c0_i32 = arith.constant 0 : i32
    %c0_i32_0 = arith.constant 0 : i32
    return %arg0, %c0_i32 : i32, i32
  }
}

module attributes {stable_mosaic.version = 11 : i64} {
  func.func @kernel(%arg0: i32, %arg1: memref<328x128xbf16, #tpu.memory_space<vmem>>, %arg2: memref<128x128xbf16, #tpu.memory_space<vmem>>, %arg3: memref<1x128xf32, #tpu.memory_space<vmem>>, %arg4: memref<328x128xbf16, #tpu.memory_space<vmem>>, %arg5: memref<328x128xbf16, #tpu.memory_space<vmem>>) attributes {dimension_semantics = [#tpu.dimension_semantics<parallel>], iteration_bounds = array<i64: 2>, scalar_prefetch = 0 : i64, scratch_operands = 0 : i64, tpu.core_type = #tpu.core_type<tc>, window_params = [{transform_indices = @transform_0, window_bounds = array<i64: 328, 128>}, {pipeline_mode = #tpu.pipeline_mode<synchronous>, transform_indices = @transform_1, window_bounds = array<i64: 128, 128>}, {pipeline_mode = #tpu.pipeline_mode<synchronous>, transform_indices = @transform_2, window_bounds = array<i64: 1, 128>}, {transform_indices = @transform_3, window_bounds = array<i64: 328, 128>}, {transform_indices = @transform_4, window_bounds = array<i64: 328, 128>}]} {
    %c0 = arith.constant 0 : index
    %c0_0 = arith.constant 0 : index
    %0 = vector.load %arg1[%c0, %c0_0] : memref<328x128xbf16, #tpu.memory_space<vmem>>, vector<328x128xbf16>
    %c0_1 = arith.constant 0 : index
    %c0_2 = arith.constant 0 : index
    %1 = vector.load %arg2[%c0_1, %c0_2] : memref<128x128xbf16, #tpu.memory_space<vmem>>, vector<128x128xbf16>
    %cst = arith.constant dense<0.000000e+00> : vector<328x128xf32>
    %2 = tpu.matmul %0, %1, %cst {dimension_numbers = #tpu.dot_dimension_numbers<[1], [0], [0], [1], [0, 0, 1, 1], [], []>} : vector<328x128xbf16>, vector<128x128xbf16>, vector<328x128xf32> -> vector<328x128xf32>
    %c0_3 = arith.constant 0 : index
    %c0_4 = arith.constant 0 : index
    %3 = vector.load %arg3[%c0_3, %c0_4] : memref<1x128xf32, #tpu.memory_space<vmem>>, vector<1x128xf32>
    %4 = vector.broadcast %3 : vector<1x128xf32> to vector<328x128xf32>
    %5 = arith.addf %2, %4 : vector<328x128xf32>
    %c0_5 = arith.constant 0 : index
    %c0_6 = arith.constant 0 : index
    %6 = vector.load %arg4[%c0_5, %c0_6] : memref<328x128xbf16, #tpu.memory_space<vmem>>, vector<328x128xbf16>
    %7 = arith.extf %6 : vector<328x128xbf16> to vector<328x128xf32>
    %8 = arith.addf %5, %7 : vector<328x128xf32>
    %9 = arith.truncf %8 : vector<328x128xf32> to vector<328x128xbf16>
    %c0_7 = arith.constant 0 : index
    %c0_8 = arith.constant 0 : index
    %10 = vector.load %arg5[%c0_7, %c0_8] : memref<328x128xbf16, #tpu.memory_space<vmem>>, vector<328x128xbf16>
    tpu.vector_store %arg5[%c0_7, %c0_8], %9 {strides = array<i32>} : memref<328x128xbf16, #tpu.memory_space<vmem>>, vector<328x128xbf16>,
    return
  }
  func.func @transform_0(%arg0: i32) -> (i32, i32) {
    %c0_i32 = arith.constant 0 : i32
    %c0_i32_0 = arith.constant 0 : i32
    return %arg0, %c0_i32 : i32, i32
  }
  func.func @transform_1(%arg0: i32) -> (i32, i32) {
    %c0_i32 = arith.constant 0 : i32
    %c0_i32_0 = arith.constant 0 : i32
    %c0_i32_1 = arith.constant 0 : i32
    return %c0_i32, %c0_i32_0 : i32, i32
  }
  func.func @transform_2(%arg0: i32) -> (i32, i32) {
    %c0_i32 = arith.constant 0 : i32
    %c0_i32_0 = arith.constant 0 : i32
    %c0_i32_1 = arith.constant 0 : i32
    return %c0_i32, %c0_i32_0 : i32, i32
  }
  func.func @transform_3(%arg0: i32) -> (i32, i32) {
    %c0_i32 = arith.constant 0 : i32
    %c0_i32_0 = arith.constant 0 : i32
    return %arg0, %c0_i32 : i32, i32
  }
  func.func @transform_4(%arg0: i32) -> (i32, i32) {
    %c0_i32 = arith.constant 0 : i32
    %c0_i32_0 = arith.constant 0 : i32
    return %arg0, %c0_i32 : i32, i32
  }
}

module attributes {stable_mosaic.version = 11 : i64} {
  func.func @kernel(%arg0: i32, %arg1: memref<256x128xbf16, #tpu.memory_space<vmem>>, %arg2: memref<128x128xbf16, #tpu.memory_space<vmem>>, %arg3: memref<1x128xf32, #tpu.memory_space<vmem>>, %arg4: memref<128x128xbf16, #tpu.memory_space<vmem>>, %arg5: memref<1x128xf32, #tpu.memory_space<vmem>>, %arg6: memref<256x1xf32, #tpu.memory_space<vmem>>) attributes {dimension_semantics = [#tpu.dimension_semantics<parallel>], iteration_bounds = array<i64: 2>, scalar_prefetch = 0 : i64, scratch_operands = 0 : i64, tpu.core_type = #tpu.core_type<tc>, window_params = [{transform_indices = @transform_0, window_bounds = array<i64: 256, 128>}, {pipeline_mode = #tpu.pipeline_mode<synchronous>, transform_indices = @transform_1, window_bounds = array<i64: 128, 128>}, {pipeline_mode = #tpu.pipeline_mode<synchronous>, transform_indices = @transform_2, window_bounds = array<i64: 1, 128>}, {pipeline_mode = #tpu.pipeline_mode<synchronous>, transform_indices = @transform_3, window_bounds = array<i64: 128, 128>}, {pipeline_mode = #tpu.pipeline_mode<synchronous>, transform_indices = @transform_4, window_bounds = array<i64: 1, 128>}, {transform_indices = @transform_5, window_bounds = array<i64: 256, 1>}]} {
    %c0 = arith.constant 0 : index
    %c0_0 = arith.constant 0 : index
    %0 = vector.load %arg1[%c0, %c0_0] : memref<256x128xbf16, #tpu.memory_space<vmem>>, vector<256x128xbf16>
    %c0_1 = arith.constant 0 : index
    %c0_2 = arith.constant 0 : index
    %1 = vector.load %arg2[%c0_1, %c0_2] : memref<128x128xbf16, #tpu.memory_space<vmem>>, vector<128x128xbf16>
    %cst = arith.constant dense<0.000000e+00> : vector<256x128xf32>
    %2 = tpu.matmul %0, %1, %cst {dimension_numbers = #tpu.dot_dimension_numbers<[1], [0], [0], [1], [0, 0, 1, 1], [], []>} : vector<256x128xbf16>, vector<128x128xbf16>, vector<256x128xf32> -> vector<256x128xf32>
    %c0_3 = arith.constant 0 : index
    %c0_4 = arith.constant 0 : index
    %3 = vector.load %arg3[%c0_3, %c0_4] : memref<1x128xf32, #tpu.memory_space<vmem>>, vector<1x128xf32>
    %4 = vector.broadcast %3 : vector<1x128xf32> to vector<256x128xf32>
    %5 = arith.addf %2, %4 : vector<256x128xf32>
    %cst_5 = arith.constant 5.000000e-01 : f32
    %6 = vector.broadcast %cst_5 : f32 to vector<256x128xf32>
    %7 = arith.mulf %6, %5 : vector<256x128xf32>
    %cst_6 = arith.constant 0.707106769 : f32
    %8 = vector.broadcast %cst_6 : f32 to vector<256x128xf32>
    %9 = arith.mulf %5, %8 : vector<256x128xf32>
    %10 = math.erf %9 : vector<256x128xf32>
    %cst_7 = arith.constant 1.000000e+00 : f32
    %11 = vector.broadcast %cst_7 : f32 to vector<256x128xf32>
    %12 = arith.addf %11, %10 : vector<256x128xf32>
    %13 = arith.mulf %7, %12 : vector<256x128xf32>
    %14 = arith.truncf %13 : vector<256x128xf32> to vector<256x128xbf16>
    %c0_8 = arith.constant 0 : index
    %c0_9 = arith.constant 0 : index
    %15 = vector.load %arg4[%c0_8, %c0_9] : memref<128x128xbf16, #tpu.memory_space<vmem>>, vector<128x128xbf16>
    %cst_10 = arith.constant dense<0.000000e+00> : vector<256x128xf32>
    %16 = tpu.matmul %14, %15, %cst_10 {dimension_numbers = #tpu.dot_dimension_numbers<[1], [0], [0], [1], [0, 0, 1, 1], [], []>} : vector<256x128xbf16>, vector<128x128xbf16>, vector<256x128xf32> -> vector<256x128xf32>
    %c0_11 = arith.constant 0 : index
    %c0_12 = arith.constant 0 : index
    %17 = vector.load %arg5[%c0_11, %c0_12] : memref<1x128xf32, #tpu.memory_space<vmem>>, vector<1x128xf32>
    %18 = vector.broadcast %17 : vector<1x128xf32> to vector<256x128xf32>
    %19 = arith.addf %16, %18 : vector<256x128xf32>
    %20 = vector.extract_strided_slice %19 {offsets = [0, 0], sizes = [256, 1], strides = [1, 1]} : vector<256x128xf32> to vector<256x1xf32>
    %c0_13 = arith.constant 0 : index
    %c0_14 = arith.constant 0 : index
    %21 = vector.load %arg6[%c0_13, %c0_14] : memref<256x1xf32, #tpu.memory_space<vmem>>, vector<256x1xf32>
    tpu.vector_store %arg6[%c0_13, %c0_14], %20 {strides = array<i32>} : memref<256x1xf32, #tpu.memory_space<vmem>>, vector<256x1xf32>,
    return
  }
  func.func @transform_0(%arg0: i32) -> (i32, i32) {
    %c0_i32 = arith.constant 0 : i32
    %c0_i32_0 = arith.constant 0 : i32
    return %arg0, %c0_i32 : i32, i32
  }
  func.func @transform_1(%arg0: i32) -> (i32, i32) {
    %c0_i32 = arith.constant 0 : i32
    %c0_i32_0 = arith.constant 0 : i32
    %c0_i32_1 = arith.constant 0 : i32
    return %c0_i32, %c0_i32_0 : i32, i32
  }
  func.func @transform_2(%arg0: i32) -> (i32, i32) {
    %c0_i32 = arith.constant 0 : i32
    %c0_i32_0 = arith.constant 0 : i32
    %c0_i32_1 = arith.constant 0 : i32
    return %c0_i32, %c0_i32_0 : i32, i32
  }
  func.func @transform_3(%arg0: i32) -> (i32, i32) {
    %c0_i32 = arith.constant 0 : i32
    %c0_i32_0 = arith.constant 0 : i32
    %c0_i32_1 = arith.constant 0 : i32
    return %c0_i32, %c0_i32_0 : i32, i32
  }
  func.func @transform_4(%arg0: i32) -> (i32, i32) {
    %c0_i32 = arith.constant 0 : i32
    %c0_i32_0 = arith.constant 0 : i32
    %c0_i32_1 = arith.constant 0 : i32
    return %c0_i32, %c0_i32_0 : i32, i32
  }
  func.func @transform_5(%arg0: i32) -> (i32, i32) {
    %c0_i32 = arith.constant 0 : i32
    %c0_i32_0 = arith.constant 0 : i32
    return %arg0, %c0_i32 : i32, i32
  }
}

</mosaic_0001>

<bundles_post_ra>
// kernel: fno2d_forward.10
= control target key start
LH: loop header
LB: loop body
LE: loop exit
PB: predicated region body
PF: predicated region fallthrough
CT: control target
= control target key end

     0   :  { %8 = vsyncpa [#allocation3], 0  ;;  %s1295_s0 = inlined_call_operand.vmem [shape: f32[512,12], index: 0, kind: input, shape index: {}]   ;;  %s1296_s1 = inlined_call_operand.hbm [shape: bf16[12,128], index: 1, kind: input, shape index: {}]   ;;  %s1297_s2 = inlined_call_operand.hbm [shape: f32[1,128], index: 2, kind: input, shape index: {}]   ;;  %s1298_s3 = inlined_call_operand.vmem [shape: bf16[512,128], index: 3, kind: output, shape index: {}]  }
   0x1   :  { %9 = vsyncpa [#allocation5], 0  ;;  %s1092_s12 = smov 0  }
   0x2 LB: > { %s717_s13 = sadd.s32 4294967295, %s1066_s12   ;;  %p719_p0 = scmp.ge.s32.totalorder %s1066_s12, 1  ;;  %s1066_s12 = sphi %s1092_s12, %s15_s12  }
   0x3   : > { %p114_p1 = scmp.lt.s32.totalorder %s1066_s12, 3  ;;  %s1068_s14 = smov [#allocation2]  }
   0x4   : > { %s126_s15 = sshll.u32 %s1068_s14, 4  ;;  %p1106_p3 = scmp.eq.s32.totalorder %s717_s13, 0  ;;  %s127_s15 = int_to_ptr.vmem [resolvable:$true] %s126_s15 }
   0x5   : > { %p1100_p2 = pnand %p719_p0, %p114_p1  ;;  %s1069_s18 = smov [#allocation4]  }
   0x6   : > { %s1303_s17 = scalar_select %p1106_p3, 1, 0 }
   0x7   : > { %s1302_s16 = scalar_select %p1100_p2, 1, 0 }
   0x8   : > { %p972_p4 = pneg %p1100_p2  ;;  %s140_s19 = sshll.u32 %s1069_s18, 4  ;;  %s1118_s19 = int_to_ptr.vmem [resolvable:$true] %s140_s19 }
   0x9   : > { %s996_s23 = scalar_lea.hbm %s1296_s1, 128 }
   0xa   : > { %p1114_p5 = pnand %p1106_p3, %p972_p4  ;;  %p997_p6 = scmp.ne.s32.totalorder %s1296_s1, %s996_s23 }
   0xb   : > { %p1003_p10 = scmp.lt.u32.totalorder %s996_s23, %s1296_s1 }
   0xc   : > { %p998_p7 = pneg %p1114_p5 }
   0xe   : > { %p999_p8 = pnand %p998_p7, %p997_p6 }
  0x10   : > { %p1000_p9 = pneg %p999_p8 }
  0x12   : > { %p1005_p11 = pnand %p1003_p10, %p1000_p9 }
  0x14   : > { %1008 = shalt.err (!%p1005_p11)
}
  0x15   : > { %s1009_s28 = scalar_lea.vmem %s127_s15, 128  ;;  %p1017_p1 = scmp.lt.s32.totalorder %s127_s15, %s127_s15 }
  0x16   : > { %p1010_p12 = scmp.ne.s32.totalorder %s127_s15, %s1009_s28  ;;  %p1018_p4 = scmp.lt.s32.totalorder %s1009_s28, %s1009_s28 }
  0x18   : > { %p1012_p13 = pnand %p1010_p12, %p998_p7  ;;  %p1019_p3 = por %p1018_p4, %p1017_p1 }
  0x1a   : > { %p1013_p0 = pneg %p1012_p13 }
  0x1c   : > { %p1020_p2 = pnand %p1019_p3, %p1013_p0 }
  0x1e   : > { %1023 = shalt.err (!%p1020_p2)
}
  0x1f   : > { %s1070_s29 = smov 64   ;;  %s1071_s30 = smov 4  }
  0x20   : > { %975 = dma.hbm_to_vmem [thread:$0]  (!%p1114_p5), %s1296_s1, 128, %s127_s15, [#allocation3], %s1070_s29, %s1070_s29, %s1071_s30  }
  0x21   : > { %s1024_s8 = scalar_lea.hbm %s1297_s2, 16 }
  0x22   : > { %p1025_p6 = scmp.ne.s32.totalorder %s1297_s2, %s1024_s8  ;;  %p1031_p8 = scmp.lt.u32.totalorder %s1024_s8, %s1297_s2 }
  0x24   : > { %p1027_p2 = pnand %p1025_p6, %p998_p7 }
  0x26   : > { %p1028_p3 = pneg %p1027_p2 }
  0x28   : > { %p1033_p9 = pnand %p1031_p8, %p1028_p3 }
  0x2a   : > { %1036 = shalt.err (!%p1033_p9)
}
  0x2b   : > { %s1037_s15 = scalar_lea.vmem %s1118_s19, 16  ;;  %s1044_s18 = scalar_lea.vmem %s1118_s19, 32 }
  0x2c   : > { %p1038_p10 = scmp.ne.s32.totalorder %s1118_s19, %s1037_s15  ;;  %p1045_p13 = scmp.lt.s32.totalorder %s1118_s19, %s1118_s19 }
  0x2d   : > { %p1046_p0 = scmp.lt.s32.totalorder %s1044_s18, %s1037_s15 }
  0x2e   : > { %p1040_p11 = pnand %p1038_p10, %p998_p7 }
  0x2f   : > { %p1047_p1 = por %p1046_p0, %p1045_p13 }
  0x30   : > { %p1041_p12 = pneg %p1040_p11 }
  0x32   : > { %p1048_p4 = pnand %p1047_p1, %p1041_p12 }
  0x34   : > { %1051 = shalt.err (!%p1048_p4)
}
  0x35   : > { %978 = dma.hbm_to_vmem [thread:$0]  (!%p1114_p5), %s1297_s2, 16, %s1118_s19, [#allocation5]  }
  0x36   : > { %p1305_p6 = scmp.ne.s32.totalorder %s1302_s16, 0 }
  0x37   : > { %p1306_p7 = scmp.ne.s32.totalorder (!%p1305_p6), %s1303_s17, 0 }
  0x38   : > { %162 = sbr.rel (%p1305_p6) target bundleno = 321 (0x141), region = 32 }
  0x3f   : > { %1057 = dma.done.wait (%p1306_p7), [#allocation3], 128  }
  0x40   : > { %1059 = vsyncadd (%p1306_p7), [#allocation3], 4294967168 }
  0x41   : > { %1061 = dma.done.wait (%p1306_p7), [#allocation5], 16  }
  0x42   : > { %1063 = vsyncadd (%p1306_p7), [#allocation5], 4294967280  ;;  %s726_s20 = sshll.u32 %s717_s13, 5  ;;  %vm314_vm0 = vcmask 1045504   ;;  %v995_v0 = vld [vmem:[#allocation2] sm:$0x3f]  }
  0x43   : > { %p191_p2 = scmp.lt.s32.totalorder %s726_s20, 63  ;;  %vm265_vm1 = vcmask 97280   ;;  %962 = vmatprep.subr.msk.bf16.mxu0 %vm314_vm0, %v995_v0  ;;  %963 = vmatprep.subr.msk.bf16.mxu1 %vm314_vm0, %v995_v0  ;;  %v316_v4 = vsel %vm314_vm0, %v995_v0, 0  ;;  %v1236_v51 = vld [vmem:[#allocation4] ss:$0 sm:$0xff] }
  0x44   : > { %927 = vmatpush3.bf16.msra.mxu0 %v316_v4  ;;  %961 = vmatpush3.bf16.msra.mxu1 %v316_v4 }
  0x45   : > { %s1308_s20 = smov (!%p191_p2, %s726_s20), 63 }
  0x46   : > { %s727_s16 = sshll.u32 %s1308_s20, 3  ;;  %s729_s13 = sshll.u32 %s1308_s20, 2 }
  0x47   : > { %s1186_s24 = scalar_lea.vmem %s1295_s0, %s727_s16  ;;  %s1248_s26 = scalar_lea.vmem %s1298_s3, %s729_s13 }
  0x48   : > { %v203_v1 = vld [vmem:[%s1186_s24] sm:$0xff]  ;;  %v204_v2 = vld [vmem:[%s1186_s24 + $0x8] sm:$0xff]  ;;  %v205_v7 = vld [vmem:[%s1186_s24 + $0x10] sm:$0xff] }
  0x49   : > { %v219_v3 = vld [vmem:[%s1186_s24 + $0x80] sm:$0xff]  ;;  %v235_v5 = vpack.c.bf16 %v204_v2, %v203_v1  ;;  %v220_v6 = vld [vmem:[%s1186_s24 + $0x88] sm:$0xff]  ;;  %v206_v8 = vld [vmem:[%s1186_s24 + $0x18] sm:$0xff] }
  0x4a   : > { %v243_v9 = vpack.c.bf16 %v220_v6, %v219_v3  ;;  %v236_v10 = vpack.c.bf16 %v206_v8, %v205_v7  ;;  %v221_v11 = vld [vmem:[%s1186_s24 + $0x90] sm:$0xff]  ;;  %v222_v12 = vld [vmem:[%s1186_s24 + $0x98] sm:$0xff]  ;;  %v207_v13 = vld [vmem:[%s1186_s24 + $0x20] sm:$0xff] }
  0x4b   : > { %928 = vmatprep.mubr.msk.bf16.mxu0 %vm265_vm1, %v235_v5  ;;  %v244_v14 = vpack.c.bf16 %v222_v12, %v221_v11  ;;  %v208_v15 = vld [vmem:[%s1186_s24 + $0x28] sm:$0xff]  ;;  %v223_v16 = vld [vmem:[%s1186_s24 + $0xa0] sm:$0xff]  ;;  %v209_v20 = vld [vmem:[%s1186_s24 + $0x30] sm:$0xff] }
  0x4c   : > { %v224_v17 = vld [vmem:[%s1186_s24 + $0xa8] sm:$0xff]  ;;  %944 = vmatprep.mubr.msk.bf16.mxu1 %vm265_vm1, %v243_v9  ;;  %v237_v18 = vpack.c.bf16 %v208_v15, %v207_v13  ;;  %929 = vmatmul.mubr.msk.bf16.vlgmr.msra.gmra.mrb[0].mxu0 %vm265_vm1, %v236_v10  ;;  %v210_v21 = vld [vmem:[%s1186_s24 + $0x38] sm:$0xff]  ;;  %v225_v22 = vld [vmem:[%s1186_s24 + $0xb0] sm:$0xff] }
  0x4d   : > { %v245_v19 = vpack.c.bf16 %v224_v17, %v223_v16  ;;  %945 = vmatmul.mubr.msk.bf16.vlgmr.msra.gmra.mrb[0].mxu1 %vm265_vm1, %v244_v14  ;;  %v226_v23 = vld [vmem:[%s1186_s24 + $0xb8] sm:$0xff]  ;;  %v211_v24 = vld [vmem:[%s1186_s24 + $0x40] sm:$0xff]  ;;  %v212_v25 = vld [vmem:[%s1186_s24 + $0x48] sm:$0xff]  ;;  %v238_v28 = vpack.c.bf16 %v210_v21, %v209_v20 }
  0x4e   : > { %932 = vmatprep.mubr.msk.bf16.mxu0 %vm265_vm1, %v237_v18  ;;  %v227_v26 = vld [vmem:[%s1186_s24 + $0xc0] sm:$0xff]  ;;  %v228_v27 = vld [vmem:[%s1186_s24 + $0xc8] sm:$0xff]  ;;  %v246_v29 = vpack.c.bf16 %v226_v23, %v225_v22  ;;  %v239_v30 = vpack.c.bf16 %v212_v25, %v211_v24  ;;  %v213_v32 = vld [vmem:[%s1186_s24 + $0x50] sm:$0xff] }
  0x4f   : > { %948 = vmatprep.mubr.msk.bf16.mxu1 %vm265_vm1, %v245_v19  ;;  %v247_v31 = vpack.c.bf16 %v228_v27, %v227_v26  ;;  %v214_v33 = vld [vmem:[%s1186_s24 + $0x58] sm:$0xff]  ;;  %v229_v34 = vld [vmem:[%s1186_s24 + $0xd0] sm:$0xff]  ;;  %v215_v36 = vld [vmem:[%s1186_s24 + $0x60] sm:$0xff] }
  0x50   : > { %v230_v35 = vld [vmem:[%s1186_s24 + $0xd8] sm:$0xff]  ;;  %v216_v37 = vld [vmem:[%s1186_s24 + $0x68] sm:$0xff]  ;;  %v231_v38 = vld [vmem:[%s1186_s24 + $0xe0] sm:$0xff]  ;;  %v240_v40 = vpack.c.bf16 %v214_v33, %v213_v32 }
  0x51   : > { %v232_v39 = vld [vmem:[%s1186_s24 + $0xe8] sm:$0xff]  ;;  %v248_v41 = vpack.c.bf16 %v230_v35, %v229_v34  ;;  %v241_v42 = vpack.c.bf16 %v216_v37, %v215_v36  ;;  %v217_v44 = vld [vmem:[%s1186_s24 + $0x70] sm:$0xff]  ;;  %v218_v45 = vld [vmem:[%s1186_s24 + $0x78] sm:$0xff] }
  0x52   : > { %v249_v43 = vpack.c.bf16 %v232_v39, %v231_v38  ;;  %v233_v46 = vld [vmem:[%s1186_s24 + $0xf0] sm:$0xff]  ;;  %v234_v47 = vld [vmem:[%s1186_s24 + $0xf8] sm:$0xff]  ;;  %v242_v48 = vpack.c.bf16 %v218_v45, %v217_v44 }
  0x53   : > { %v250_v49 = vpack.c.bf16 %v234_v47, %v233_v46 }
  0x54   : > { %933 = vmatmul.mubr.msk.bf16.gmra.mrb[4].mxu0 %vm265_vm1, %v238_v28 }
  0x55   : > { %949 = vmatmul.mubr.msk.bf16.gmra.mrb[4].mxu1 %vm265_vm1, %v246_v29  ;;  %936 = vmatprep.mubr.msk.bf16.mxu0 %vm265_vm1, %v239_v30 }
  0x56   : > { %952 = vmatprep.mubr.msk.bf16.mxu1 %vm265_vm1, %v247_v31 }
  0x5c   : > { %937 = vmatmul.mubr.msk.bf16.gmra.mrb[8].mxu0 %vm265_vm1, %v240_v40 }
  0x5d   : > { %953 = vmatmul.mubr.msk.bf16.gmra.mrb[8].mxu1 %vm265_vm1, %v248_v41  ;;  %940 = vmatprep.mubr.msk.bf16.mxu0 %vm265_vm1, %v241_v42 }
  0x5e   : > { %956 = vmatprep.mubr.msk.bf16.mxu1 %vm265_vm1, %v249_v43 }
  0x64   : > { %941 = vmatmul.mubr.msk.bf16.gmra.mrb[12].mxu0 %vm265_vm1, %v242_v48 }
  0x65   : > { %957 = vmatmul.mubr.msk.bf16.gmra.mrb[12].mxu1 %vm265_vm1, %v250_v49 }
 0x11f   : > { %v930_v50 = vpop.f32.mrb[0].mxu0 }
 0x120   : > { %v946_v52 = vpop.f32.mrb[0].mxu1  ;;  %v352_v53 = vpop.f32.mrb[1].mxu0  ;;  %v361_v57 = vadd.f32 %v930_v50, %v1236_v51 }
 0x121   : > { %v416_v54 = vpop.f32.mrb[1].mxu1  ;;  %v931_v55 = vpop.f32.mrb[2].mxu0  ;;  %v425_v58 = vadd.f32 %v946_v52, %v1236_v51  ;;  %v353_v63 = vadd.f32 %v1236_v51, %v352_v53 }
 0x122   : > { %v947_v56 = vpop.f32.mrb[2].mxu1  ;;  %v364_v59 = vadd.f32 %v931_v55, %v1236_v51  ;;  %v355_v61 = vpop.f32.mrb[3].mxu0  ;;  %v417_v0 = vadd.f32 %v1236_v51, %v416_v54 }
 0x123   : > { %v428_v60 = vadd.f32 %v947_v56, %v1236_v51  ;;  %v419_v62 = vpop.f32.mrb[3].mxu1  ;;  %v356_v1 = vadd.f32 %v1236_v51, %v355_v61 }
 0x124   : > { %v420_v2 = vadd.f32 %v1236_v51, %v419_v62  ;;  %v822_v3 = vpack.c.bf16 %v364_v59, %v361_v57 }
 0x125   : > { %v862_v4 = vpack.c.bf16 %v428_v60, %v425_v58  ;;  %v817_v5 = vpack.c.bf16 %v356_v1, %v353_v63 }
 0x126   : > { %v857_v6 = vpack.c.bf16 %v420_v2, %v417_v0  ;;  %894 = vst [vmem:[%s1248_s26 + $0x8] sm:$0xff] %v822_v3  }
 0x127   : > { %902 = vst [vmem:[%s1248_s26 + $0x48] sm:$0xff] %v862_v4   ;;  %818 = vst [vmem:[%s1248_s26] sm:$0xff] %v817_v5   ;;  %v934_v7 = vpop.f32.mrb[4].mxu0 }
 0x128   : > { %901 = vst [vmem:[%s1248_s26 + $0x40] sm:$0xff] %v857_v6   ;;  %v950_v8 = vpop.f32.mrb[4].mxu1  ;;  %v368_v9 = vpop.f32.mrb[5].mxu0  ;;  %v377_v13 = vadd.f32 %v934_v7, %v1236_v51 }
 0x129   : > { %v432_v10 = vpop.f32.mrb[5].mxu1  ;;  %v935_v11 = vpop.f32.mrb[6].mxu0  ;;  %v441_v14 = vadd.f32 %v950_v8, %v1236_v51  ;;  %v369_v19 = vadd.f32 %v1236_v51, %v368_v9 }
 0x12a   : > { %v951_v12 = vpop.f32.mrb[6].mxu1  ;;  %v380_v15 = vadd.f32 %v935_v11, %v1236_v51  ;;  %v371_v17 = vpop.f32.mrb[7].mxu0  ;;  %v433_v20 = vadd.f32 %v1236_v51, %v432_v10 }
 0x12b   : > { %v444_v16 = vadd.f32 %v951_v12, %v1236_v51  ;;  %v435_v18 = vpop.f32.mrb[7].mxu1  ;;  %v372_v21 = vadd.f32 %v1236_v51, %v371_v17 }
 0x12c   : > { %v436_v22 = vadd.f32 %v1236_v51, %v435_v18  ;;  %v832_v23 = vpack.c.bf16 %v380_v15, %v377_v13 }
 0x12d   : > { %v872_v24 = vpack.c.bf16 %v444_v16, %v441_v14  ;;  %v827_v25 = vpack.c.bf16 %v372_v21, %v369_v19 }
 0x12e   : > { %v867_v26 = vpack.c.bf16 %v436_v22, %v433_v20  ;;  %896 = vst [vmem:[%s1248_s26 + $0x18] sm:$0xff] %v832_v23  }
 0x12f   : > { %904 = vst [vmem:[%s1248_s26 + $0x58] sm:$0xff] %v872_v24   ;;  %895 = vst [vmem:[%s1248_s26 + $0x10] sm:$0xff] %v827_v25   ;;  %v938_v27 = vpop.f32.mrb[8].mxu0 }
 0x130   : > { %903 = vst [vmem:[%s1248_s26 + $0x50] sm:$0xff] %v867_v26   ;;  %v954_v28 = vpop.f32.mrb[8].mxu1  ;;  %v384_v29 = vpop.f32.mrb[9].mxu0  ;;  %v393_v33 = vadd.f32 %v938_v27, %v1236_v51 }
 0x131   : > { %v448_v30 = vpop.f32.mrb[9].mxu1  ;;  %v939_v31 = vpop.f32.mrb[10].mxu0  ;;  %v457_v34 = vadd.f32 %v954_v28, %v1236_v51  ;;  %v385_v39 = vadd.f32 %v1236_v51, %v384_v29 }
 0x132   : > { %v955_v32 = vpop.f32.mrb[10].mxu1  ;;  %v396_v35 = vadd.f32 %v939_v31, %v1236_v51  ;;  %v387_v37 = vpop.f32.mrb[11].mxu0  ;;  %v449_v40 = vadd.f32 %v1236_v51, %v448_v30 }
 0x133   : > { %v460_v36 = vadd.f32 %v955_v32, %v1236_v51  ;;  %v451_v38 = vpop.f32.mrb[11].mxu1  ;;  %v388_v41 = vadd.f32 %v1236_v51, %v387_v37 }
 0x134   : > { %v452_v42 = vadd.f32 %v1236_v51, %v451_v38  ;;  %v842_v43 = vpack.c.bf16 %v396_v35, %v393_v33 }
 0x135   : > { %v882_v44 = vpack.c.bf16 %v460_v36, %v457_v34  ;;  %v837_v45 = vpack.c.bf16 %v388_v41, %v385_v39 }
 0x136   : > { %v877_v46 = vpack.c.bf16 %v452_v42, %v449_v40  ;;  %898 = vst [vmem:[%s1248_s26 + $0x28] sm:$0xff] %v842_v43  }
 0x137   : > { %906 = vst [vmem:[%s1248_s26 + $0x68] sm:$0xff] %v882_v44   ;;  %897 = vst [vmem:[%s1248_s26 + $0x20] sm:$0xff] %v837_v45   ;;  %v942_v47 = vpop.f32.mrb[12].mxu0 }
 0x138   : > { %905 = vst [vmem:[%s1248_s26 + $0x60] sm:$0xff] %v877_v46   ;;  %v958_v48 = vpop.f32.mrb[12].mxu1  ;;  %v400_v49 = vpop.f32.mrb[13].mxu0  ;;  %v409_v54 = vadd.f32 %v942_v47, %v1236_v51 }
 0x139   : > { %v464_v50 = vpop.f32.mrb[13].mxu1  ;;  %v943_v52 = vpop.f32.mrb[14].mxu0  ;;  %v473_v55 = vadd.f32 %v958_v48, %v1236_v51  ;;  %v401_v60 = vadd.f32 %v1236_v51, %v400_v49 }
 0x13a   : > { %v959_v53 = vpop.f32.mrb[14].mxu1  ;;  %v412_v56 = vadd.f32 %v943_v52, %v1236_v51  ;;  %v403_v58 = vpop.f32.mrb[15].mxu0  ;;  %v465_v61 = vadd.f32 %v1236_v51, %v464_v50 }
 0x13b   : > { %v476_v57 = vadd.f32 %v959_v53, %v1236_v51  ;;  %v467_v59 = vpop.f32.mrb[15].mxu1  ;;  %v404_v62 = vadd.f32 %v1236_v51, %v403_v58 }
 0x13c   : > { %v468_v63 = vadd.f32 %v1236_v51, %v467_v59  ;;  %v852_v0 = vpack.c.bf16 %v412_v56, %v409_v54 }
 0x13d   : > { %v892_v1 = vpack.c.bf16 %v476_v57, %v473_v55  ;;  %v847_v2 = vpack.c.bf16 %v404_v62, %v401_v60 }
 0x13e   : > { %v887_v3 = vpack.c.bf16 %v468_v63, %v465_v61  ;;  %900 = vst [vmem:[%s1248_s26 + $0x38] sm:$0xff] %v852_v0  }
 0x13f   : > { %908 = vst [vmem:[%s1248_s26 + $0x78] sm:$0xff] %v892_v1   ;;  %899 = vst [vmem:[%s1248_s26 + $0x30] sm:$0xff] %v847_v2  }
 0x140   : > { %907 = vst [vmem:[%s1248_s26 + $0x70] sm:$0xff] %v887_v3  }
 0x141 PF: > { %s15_s12 = sadd.s32 1, %s1066_s12  }
 0x142   : > { %p12_p5 = scmp.ge.s32.totalorder %s15_s12, 4  }
 0x144   :  { %14 = sbr.rel (!%p12_p5) target bundleno = 2 (0x2), region = 71 }
 0x14b   :  { %661 = vsyncpa [#allocation3], 1 }
 0x14c   :  { %663 = vsyncpa [#allocation3 + $0x1], 1 }
 0x14d   :  { %664 = vsyncpa [#allocation5], 1 }

// kernel: fno2d_forward.11
= control target key start
LH: loop header
LB: loop body
LE: loop exit
PB: predicated region body
PF: predicated region fallthrough
CT: control target
= control target key end

     0   :  { %s1414_s18 = smov 0   ;;  %s1847_s0 = inlined_call_operand.vmem [shape: f32[2,20,128], index: 0, kind: input, shape index: {}]   ;;  %s1848_s1 = inlined_call_operand.vmem [shape: f32[2,20,128], index: 1, kind: input, shape index: {}]   ;;  %s1849_s2 = inlined_call_operand.vmem [shape: f32[20,24,128], index: 2, kind: input, shape index: {}]   ;;  %s1850_s3 = inlined_call_operand.vmem [shape: f32[20,24,128], index: 3, kind: input, shape index: {}]   ;;  %s1851_s4 = inlined_call_operand.vmem [shape: f32[2,24,128], index: 4, kind: output, shape index: {0}]   ;;  %s1852_s5 = inlined_call_operand.vmem [shape: f32[2,24,128], index: 5, kind: output, shape index: {1}]  }
   0x1 LB: > { %s1202_s19 = sadd.s32 4294967295, %s1382_s18   ;;  %p1206_p0 = scmp.ge.s32.totalorder %s1382_s18, 1  ;;  %s1382_s18 = sphi %s1414_s18, %s16_s18  }
   0x2   : > { %p200_p1 = scmp.lt.s32.totalorder %s1382_s18, 3 }
   0x4   : > { %p201_p2 = pnand %p1206_p0, %p200_p1 }
   0x5   : > { %p238_p3 = scmp.lt.s32.totalorder (!%p201_p2), %s1202_s19, 1  ;;  %v260_v0 = vld [vmem:[%s1849_s2] sm:$0xff] (!%p201_p2)  ;;  %v261_v1 = vld [vmem:[%s1849_s2 + $0x8] sm:$0xff] (!%p201_p2)  ;;  %v262_v2 = vld [vmem:[%s1849_s2 + $0x10] sm:$0xff] (!%p201_p2) }
   0x6   : > { %204 = sbr.rel (%p201_p2) target bundleno = 140 (0x8c), region = 36  ;;  %v263_v3 = vld [vmem:[%s1850_s3] sm:$0xff] (!%p201_p2)  ;;  %v264_v4 = vld [vmem:[%s1850_s3 + $0x8] sm:$0xff] (!%p201_p2)  ;;  %v265_v5 = vld [vmem:[%s1850_s3 + $0x10] sm:$0xff] (!%p201_p2) }
   0x7   : > { %v1213_v13 = vld [vmem:[%s1849_s2 + $0x18] sm:$0xff] (!%p201_p2)  ;;  %v1214_v18 = vld [vmem:[%s1849_s2 + $0x20] sm:$0xff] (!%p201_p2)  ;;  %v1215_v19 = vld [vmem:[%s1849_s2 + $0x28] sm:$0xff] (!%p201_p2) }
   0x8   : > { %v1216_v28 = vld [vmem:[%s1850_s3 + $0x18] sm:$0xff] (!%p201_p2)  ;;  %v1217_v32 = vld [vmem:[%s1850_s3 + $0x20] sm:$0xff] (!%p201_p2)  ;;  %v1218_v33 = vld [vmem:[%s1850_s3 + $0x28] sm:$0xff] (!%p201_p2) }
   0x9   : > { %v1221_v45 = vld [vmem:[%s1849_s2 + $0x30] sm:$0xff] (!%p201_p2)  ;;  %v1222_v51 = vld [vmem:[%s1849_s2 + $0x38] sm:$0xff] (!%p201_p2)  ;;  %v1223_v52 = vld [vmem:[%s1849_s2 + $0x40] sm:$0xff] (!%p201_p2) }
   0xa   : > { %v1224_v60 = vld [vmem:[%s1850_s3 + $0x30] sm:$0xff] (!%p201_p2)  ;;  %v1225_v63 = vld [vmem:[%s1850_s3 + $0x38] sm:$0xff] (!%p201_p2) }
   0xd   : > { %s1854_s19 = smov (!%p238_p3, %s1202_s19), 1 }
   0xe   : > { %s1422_s20 = smul.u32 24, %s1854_s19 }
  0x10   : > { %s1440_s6 = scalar_lea.vmem %s1847_s0, %s1422_s20  ;;  %s1446_s9 = scalar_lea.vmem %s1848_s1, %s1422_s20 }
  0x11   : > { %v1211_v6 = vld [vmem:[%s1440_s6] ss:$0 sm:$0xff]  ;;  %v1219_v12 = vld [vmem:[%s1440_s6 + $0x1] ss:$0 sm:$0xff]  ;;  %v1227_v44 = vld [vmem:[%s1440_s6 + $0x2] ss:$0 sm:$0xff]  ;;  %s252_s11 = scalar_lea.vmem %s1851_s4, %s1422_s20  ;;  %s257_s14 = scalar_lea.vmem %s1852_s5, %s1422_s20 }
  0x12   : > { %v1212_v7 = vld [vmem:[%s1446_s9] ss:$0 sm:$0xff]  ;;  %v270_v8 = vmul.f32 %v1211_v6, %v260_v0  ;;  %v271_v9 = vmul.f32 %v1211_v6, %v261_v1  ;;  %v272_v10 = vmul.f32 %v1211_v6, %v262_v2  ;;  %v286_v16 = vmul.f32 %v1211_v6, %v263_v3  ;;  %v1220_v24 = vld [vmem:[%s1446_s9 + $0x1] ss:$0 sm:$0xff]  ;;  %v1228_v50 = vld [vmem:[%s1446_s9 + $0x2] ss:$0 sm:$0xff] }
  0x13   : > { %v280_v11 = vmul.f32 %v1212_v7, %v263_v3  ;;  %v281_v14 = vmul.f32 %v1212_v7, %v264_v4  ;;  %v282_v15 = vmul.f32 %v1212_v7, %v265_v5  ;;  %v287_v17 = vmul.f32 %v1211_v6, %v264_v4 }
  0x14   : > { %v288_v21 = vmul.f32 %v1211_v6, %v265_v5  ;;  %v292_v22 = vmul.f32 %v1212_v7, %v260_v0  ;;  %v293_v23 = vmul.f32 %v1212_v7, %v261_v1  ;;  %v294_v27 = vmul.f32 %v1212_v7, %v262_v2  ;;  %v1226_v0 = vld [vmem:[%s1850_s3 + $0x40] sm:$0xff] }
  0x15   : > { %v283_v20 = vsub.f32 %v270_v8, %v280_v11  ;;  %v284_v25 = vsub.f32 %v271_v9, %v281_v14  ;;  %v285_v26 = vsub.f32 %v272_v10, %v282_v15  ;;  %v312_v29 = vmul.f32 %v1219_v12, %v1213_v13 }
  0x16   : > { %v295_v30 = vadd.f32 %v292_v22, %v286_v16  ;;  %v296_v31 = vadd.f32 %v293_v23, %v287_v17  ;;  %v313_v34 = vmul.f32 %v1219_v12, %v1214_v18  ;;  %v314_v35 = vmul.f32 %v1219_v12, %v1215_v19 }
  0x17   : > { %v297_v36 = vadd.f32 %v294_v27, %v288_v21  ;;  %v315_v37 = vadd.f32 %v312_v29, %v283_v20  ;;  %v322_v38 = vmul.f32 %v1220_v24, %v1216_v28  ;;  %v323_v39 = vmul.f32 %v1220_v24, %v1217_v32  ;;  %v1231_v20 = vld [vmem:[%s1849_s2 + $0x58] sm:$0xff] }
  0x18   : > { %v316_v40 = vadd.f32 %v313_v34, %v284_v25  ;;  %v317_v41 = vadd.f32 %v314_v35, %v285_v26  ;;  %v324_v42 = vmul.f32 %v1220_v24, %v1218_v33  ;;  %v328_v43 = vmul.f32 %v1219_v12, %v1216_v28  ;;  %v1232_v28 = vld [vmem:[%s1850_s3 + $0x48] sm:$0xff] }
  0x19   : > { %v325_v46 = vsub.f32 %v315_v37, %v322_v38  ;;  %v329_v47 = vmul.f32 %v1219_v12, %v1217_v32  ;;  %v330_v48 = vmul.f32 %v1219_v12, %v1218_v33  ;;  %v334_v49 = vmul.f32 %v1220_v24, %v1213_v13  ;;  %v1235_v12 = vld [vmem:[%s1440_s6 + $0x3] ss:$0 sm:$0xff]  ;;  %v1229_v13 = vld [vmem:[%s1849_s2 + $0x48] sm:$0xff]  ;;  %v1234_v32 = vld [vmem:[%s1850_s3 + $0x58] sm:$0xff] }
  0x1a   : > { %v326_v53 = vsub.f32 %v316_v40, %v323_v39  ;;  %v327_v54 = vsub.f32 %v317_v41, %v324_v42  ;;  %v331_v55 = vadd.f32 %v328_v43, %v295_v30  ;;  %v335_v56 = vmul.f32 %v1220_v24, %v1214_v18  ;;  %v1236_v18 = vld [vmem:[%s1446_s9 + $0x3] ss:$0 sm:$0xff] }
  0x1b   : > { %v332_v57 = vadd.f32 %v329_v47, %v296_v31  ;;  %v333_v58 = vadd.f32 %v330_v48, %v297_v36  ;;  %v336_v59 = vmul.f32 %v1220_v24, %v1215_v19  ;;  %v354_v61 = vmul.f32 %v1227_v44, %v1221_v45  ;;  %v1230_v19 = vld [vmem:[%s1849_s2 + $0x50] sm:$0xff] }
  0x1c   : > { %v337_v62 = vadd.f32 %v334_v49, %v331_v55  ;;  %v355_v1 = vmul.f32 %v1227_v44, %v1222_v51  ;;  %v356_v2 = vmul.f32 %v1227_v44, %v1223_v52  ;;  %v364_v3 = vmul.f32 %v1228_v50, %v1224_v60  ;;  %v1233_v31 = vld [vmem:[%s1850_s3 + $0x50] sm:$0xff] }
  0x1d   : > { %v338_v4 = vadd.f32 %v335_v56, %v332_v57  ;;  %v339_v5 = vadd.f32 %v336_v59, %v333_v58  ;;  %v357_v6 = vadd.f32 %v354_v61, %v325_v46  ;;  %v365_v7 = vmul.f32 %v1228_v50, %v1225_v63 }
  0x1e   : > { %v358_v8 = vadd.f32 %v355_v1, %v326_v53  ;;  %v359_v9 = vadd.f32 %v356_v2, %v327_v54  ;;  %v366_v10 = vmul.f32 %v1228_v50, %v1226_v0  ;;  %v370_v11 = vmul.f32 %v1227_v44, %v1224_v60  ;;  %v1240_v60 = vld [vmem:[%s1850_s3 + $0x60] sm:$0xff] }
  0x1f   : > { %v367_v14 = vsub.f32 %v357_v6, %v364_v3  ;;  %v371_v15 = vmul.f32 %v1227_v44, %v1225_v63  ;;  %v372_v16 = vmul.f32 %v1227_v44, %v1226_v0  ;;  %v376_v17 = vmul.f32 %v1228_v50, %v1221_v45  ;;  %v1243_v44 = vld [vmem:[%s1440_s6 + $0x4] ss:$0 sm:$0xff]  ;;  %v1241_v63 = vld [vmem:[%s1850_s3 + $0x68] sm:$0xff]  ;;  %v1242_v0 = vld [vmem:[%s1850_s3 + $0x70] sm:$0xff] }
  0x20   : > { %v368_v21 = vsub.f32 %v358_v8, %v365_v7  ;;  %v369_v22 = vsub.f32 %v359_v9, %v366_v10  ;;  %v373_v23 = vadd.f32 %v370_v11, %v337_v62  ;;  %v377_v24 = vmul.f32 %v1228_v50, %v1222_v51  ;;  %v1237_v45 = vld [vmem:[%s1849_s2 + $0x60] sm:$0xff]  ;;  %v1238_v51 = vld [vmem:[%s1849_s2 + $0x68] sm:$0xff] }
  0x21   : > { %v374_v25 = vadd.f32 %v371_v15, %v338_v4  ;;  %v375_v26 = vadd.f32 %v372_v16, %v339_v5  ;;  %v378_v27 = vmul.f32 %v1228_v50, %v1223_v52  ;;  %v396_v29 = vmul.f32 %v1235_v12, %v1229_v13  ;;  %v1244_v50 = vld [vmem:[%s1446_s9 + $0x4] ss:$0 sm:$0xff]  ;;  %v1239_v52 = vld [vmem:[%s1849_s2 + $0x70] sm:$0xff] }
  0x22   : > { %v379_v30 = vadd.f32 %v376_v17, %v373_v23  ;;  %v397_v33 = vmul.f32 %v1235_v12, %v1230_v19  ;;  %v398_v34 = vmul.f32 %v1235_v12, %v1231_v20  ;;  %v406_v35 = vmul.f32 %v1236_v18, %v1232_v28 }
  0x23   : > { %v380_v36 = vadd.f32 %v377_v24, %v374_v25  ;;  %v381_v37 = vadd.f32 %v378_v27, %v375_v26  ;;  %v399_v38 = vadd.f32 %v396_v29, %v367_v14  ;;  %v407_v39 = vmul.f32 %v1236_v18, %v1233_v31 }
  0x24   : > { %v400_v40 = vadd.f32 %v397_v33, %v368_v21  ;;  %v401_v41 = vadd.f32 %v398_v34, %v369_v22  ;;  %v408_v42 = vmul.f32 %v1236_v18, %v1234_v32  ;;  %v412_v43 = vmul.f32 %v1235_v12, %v1232_v28  ;;  %v1248_v28 = vld [vmem:[%s1850_s3 + $0x78] sm:$0xff] }
  0x25   : > { %v409_v46 = vsub.f32 %v399_v38, %v406_v35  ;;  %v413_v47 = vmul.f32 %v1235_v12, %v1233_v31  ;;  %v414_v48 = vmul.f32 %v1235_v12, %v1234_v32  ;;  %v418_v49 = vmul.f32 %v1236_v18, %v1229_v13  ;;  %v1251_v12 = vld [vmem:[%s1440_s6 + $0x5] ss:$0 sm:$0xff]  ;;  %v1245_v13 = vld [vmem:[%s1849_s2 + $0x78] sm:$0xff]  ;;  %v1250_v32 = vld [vmem:[%s1850_s3 + $0x88] sm:$0xff] }
  0x26   : > { %v410_v53 = vsub.f32 %v400_v40, %v407_v39  ;;  %v411_v54 = vsub.f32 %v401_v41, %v408_v42  ;;  %v415_v55 = vadd.f32 %v412_v43, %v379_v30  ;;  %v419_v56 = vmul.f32 %v1236_v18, %v1230_v19  ;;  %v1246_v19 = vld [vmem:[%s1849_s2 + $0x80] sm:$0xff] }
  0x27   : > { %v416_v57 = vadd.f32 %v413_v47, %v380_v36  ;;  %v417_v58 = vadd.f32 %v414_v48, %v381_v37  ;;  %v420_v59 = vmul.f32 %v1236_v18, %v1231_v20  ;;  %v438_v61 = vmul.f32 %v1243_v44, %v1237_v45  ;;  %v1252_v18 = vld [vmem:[%s1446_s9 + $0x5] ss:$0 sm:$0xff]  ;;  %v1247_v20 = vld [vmem:[%s1849_s2 + $0x88] sm:$0xff] }
  0x28   : > { %v421_v62 = vadd.f32 %v418_v49, %v415_v55  ;;  %v439_v1 = vmul.f32 %v1243_v44, %v1238_v51  ;;  %v440_v2 = vmul.f32 %v1243_v44, %v1239_v52  ;;  %v448_v3 = vmul.f32 %v1244_v50, %v1240_v60  ;;  %v1249_v31 = vld [vmem:[%s1850_s3 + $0x80] sm:$0xff] }
  0x29   : > { %v422_v4 = vadd.f32 %v419_v56, %v416_v57  ;;  %v423_v5 = vadd.f32 %v420_v59, %v417_v58  ;;  %v441_v6 = vadd.f32 %v438_v61, %v409_v46  ;;  %v449_v7 = vmul.f32 %v1244_v50, %v1241_v63 }
  0x2a   : > { %v442_v8 = vadd.f32 %v439_v1, %v410_v53  ;;  %v443_v9 = vadd.f32 %v440_v2, %v411_v54  ;;  %v450_v10 = vmul.f32 %v1244_v50, %v1242_v0  ;;  %v454_v11 = vmul.f32 %v1243_v44, %v1240_v60  ;;  %v1256_v60 = vld [vmem:[%s1850_s3 + $0x90] sm:$0xff] }
  0x2b   : > { %v451_v14 = vsub.f32 %v441_v6, %v448_v3  ;;  %v455_v15 = vmul.f32 %v1243_v44, %v1241_v63  ;;  %v456_v16 = vmul.f32 %v1243_v44, %v1242_v0  ;;  %v460_v17 = vmul.f32 %v1244_v50, %v1237_v45  ;;  %v1259_v44 = vld [vmem:[%s1440_s6 + $0x6] ss:$0 sm:$0xff]  ;;  %v1253_v45 = vld [vmem:[%s1849_s2 + $0x90] sm:$0xff]  ;;  %v1257_v63 = vld [vmem:[%s1850_s3 + $0x98] sm:$0xff] }
  0x2c   : > { %v452_v21 = vsub.f32 %v442_v8, %v449_v7  ;;  %v453_v22 = vsub.f32 %v443_v9, %v450_v10  ;;  %v457_v23 = vadd.f32 %v454_v11, %v421_v62  ;;  %v461_v24 = vmul.f32 %v1244_v50, %v1238_v51  ;;  %v1254_v51 = vld [vmem:[%s1849_s2 + $0x98] sm:$0xff]  ;;  %v1258_v0 = vld [vmem:[%s1850_s3 + $0xa0] sm:$0xff] }
  0x2d   : > { %v458_v25 = vadd.f32 %v455_v15, %v422_v4  ;;  %v459_v26 = vadd.f32 %v456_v16, %v423_v5  ;;  %v462_v27 = vmul.f32 %v1244_v50, %v1239_v52  ;;  %v480_v29 = vmul.f32 %v1251_v12, %v1245_v13  ;;  %v1260_v50 = vld [vmem:[%s1446_s9 + $0x6] ss:$0 sm:$0xff] }
  0x2e   : > { %v463_v30 = vadd.f32 %v460_v17, %v457_v23  ;;  %v481_v33 = vmul.f32 %v1251_v12, %v1246_v19  ;;  %v482_v34 = vmul.f32 %v1251_v12, %v1247_v20  ;;  %v490_v35 = vmul.f32 %v1252_v18, %v1248_v28  ;;  %v1255_v52 = vld [vmem:[%s1849_s2 + $0xa0] sm:$0xff] }
  0x2f   : > { %v464_v36 = vadd.f32 %v461_v24, %v458_v25  ;;  %v465_v37 = vadd.f32 %v462_v27, %v459_v26  ;;  %v483_v38 = vadd.f32 %v480_v29, %v451_v14  ;;  %v491_v39 = vmul.f32 %v1252_v18, %v1249_v31 }
  0x30   : > { %v484_v40 = vadd.f32 %v481_v33, %v452_v21  ;;  %v485_v41 = vadd.f32 %v482_v34, %v453_v22  ;;  %v492_v42 = vmul.f32 %v1252_v18, %v1250_v32  ;;  %v496_v43 = vmul.f32 %v1251_v12, %v1248_v28  ;;  %v1264_v28 = vld [vmem:[%s1850_s3 + $0xa8] sm:$0xff] }
  0x31   : > { %v493_v46 = vsub.f32 %v483_v38, %v490_v35  ;;  %v497_v47 = vmul.f32 %v1251_v12, %v1249_v31  ;;  %v498_v48 = vmul.f32 %v1251_v12, %v1250_v32  ;;  %v502_v49 = vmul.f32 %v1252_v18, %v1245_v13  ;;  %v1267_v12 = vld [vmem:[%s1440_s6 + $0x7] ss:$0 sm:$0xff]  ;;  %v1261_v13 = vld [vmem:[%s1849_s2 + $0xa8] sm:$0xff]  ;;  %v1265_v31 = vld [vmem:[%s1850_s3 + $0xb0] sm:$0xff] }
  0x32   : > { %v494_v53 = vsub.f32 %v484_v40, %v491_v39  ;;  %v495_v54 = vsub.f32 %v485_v41, %v492_v42  ;;  %v499_v55 = vadd.f32 %v496_v43, %v463_v30  ;;  %v503_v56 = vmul.f32 %v1252_v18, %v1246_v19  ;;  %v1262_v19 = vld [vmem:[%s1849_s2 + $0xb0] sm:$0xff]  ;;  %v1266_v32 = vld [vmem:[%s1850_s3 + $0xb8] sm:$0xff] }
  0x33   : > { %v500_v57 = vadd.f32 %v497_v47, %v464_v36  ;;  %v501_v58 = vadd.f32 %v498_v48, %v465_v37  ;;  %v504_v59 = vmul.f32 %v1252_v18, %v1247_v20  ;;  %v522_v61 = vmul.f32 %v1259_v44, %v1253_v45  ;;  %v1268_v18 = vld [vmem:[%s1446_s9 + $0x7] ss:$0 sm:$0xff]  ;;  %v1263_v20 = vld [vmem:[%s1849_s2 + $0xb8] sm:$0xff] }
  0x34   : > { %v505_v62 = vadd.f32 %v502_v49, %v499_v55  ;;  %v523_v1 = vmul.f32 %v1259_v44, %v1254_v51  ;;  %v524_v2 = vmul.f32 %v1259_v44, %v1255_v52  ;;  %v532_v3 = vmul.f32 %v1260_v50, %v1256_v60 }
  0x35   : > { %v506_v4 = vadd.f32 %v503_v56, %v500_v57  ;;  %v507_v5 = vadd.f32 %v504_v59, %v501_v58  ;;  %v525_v6 = vadd.f32 %v522_v61, %v493_v46  ;;  %v533_v7 = vmul.f32 %v1260_v50, %v1257_v63 }
  0x36   : > { %v526_v8 = vadd.f32 %v523_v1, %v494_v53  ;;  %v527_v9 = vadd.f32 %v524_v2, %v495_v54  ;;  %v534_v10 = vmul.f32 %v1260_v50, %v1258_v0  ;;  %v538_v11 = vmul.f32 %v1259_v44, %v1256_v60  ;;  %v1272_v60 = vld [vmem:[%s1850_s3 + $0xc0] sm:$0xff] }
  0x37   : > { %v535_v14 = vsub.f32 %v525_v6, %v532_v3  ;;  %v539_v15 = vmul.f32 %v1259_v44, %v1257_v63  ;;  %v540_v16 = vmul.f32 %v1259_v44, %v1258_v0  ;;  %v544_v17 = vmul.f32 %v1260_v50, %v1253_v45  ;;  %v1275_v44 = vld [vmem:[%s1440_s6 + $0x8] ss:$0 sm:$0xff]  ;;  %v1269_v45 = vld [vmem:[%s1849_s2 + $0xc0] sm:$0xff]  ;;  %v1274_v0 = vld [vmem:[%s1850_s3 + $0xd0] sm:$0xff] }
  0x38   : > { %v536_v21 = vsub.f32 %v526_v8, %v533_v7  ;;  %v537_v22 = vsub.f32 %v527_v9, %v534_v10  ;;  %v541_v23 = vadd.f32 %v538_v11, %v505_v62  ;;  %v545_v24 = vmul.f32 %v1260_v50, %v1254_v51  ;;  %v1270_v51 = vld [vmem:[%s1849_s2 + $0xc8] sm:$0xff] }
  0x39   : > { %v542_v25 = vadd.f32 %v539_v15, %v506_v4  ;;  %v543_v26 = vadd.f32 %v540_v16, %v507_v5  ;;  %v546_v27 = vmul.f32 %v1260_v50, %v1255_v52  ;;  %v564_v29 = vmul.f32 %v1267_v12, %v1261_v13  ;;  %v1276_v50 = vld [vmem:[%s1446_s9 + $0x8] ss:$0 sm:$0xff]  ;;  %v1271_v52 = vld [vmem:[%s1849_s2 + $0xd0] sm:$0xff] }
  0x3a   : > { %v547_v30 = vadd.f32 %v544_v17, %v541_v23  ;;  %v565_v33 = vmul.f32 %v1267_v12, %v1262_v19  ;;  %v566_v34 = vmul.f32 %v1267_v12, %v1263_v20  ;;  %v574_v35 = vmul.f32 %v1268_v18, %v1264_v28  ;;  %v1273_v63 = vld [vmem:[%s1850_s3 + $0xc8] sm:$0xff] }
  0x3b   : > { %v548_v36 = vadd.f32 %v545_v24, %v542_v25  ;;  %v549_v37 = vadd.f32 %v546_v27, %v543_v26  ;;  %v567_v38 = vadd.f32 %v564_v29, %v535_v14  ;;  %v575_v39 = vmul.f32 %v1268_v18, %v1265_v31 }
  0x3c   : > { %v568_v40 = vadd.f32 %v565_v33, %v536_v21  ;;  %v569_v41 = vadd.f32 %v566_v34, %v537_v22  ;;  %v576_v42 = vmul.f32 %v1268_v18, %v1266_v32  ;;  %v580_v43 = vmul.f32 %v1267_v12, %v1264_v28  ;;  %v1280_v28 = vld [vmem:[%s1850_s3 + $0xd8] sm:$0xff] }
  0x3d   : > { %v577_v46 = vsub.f32 %v567_v38, %v574_v35  ;;  %v581_v47 = vmul.f32 %v1267_v12, %v1265_v31  ;;  %v582_v48 = vmul.f32 %v1267_v12, %v1266_v32  ;;  %v586_v49 = vmul.f32 %v1268_v18, %v1261_v13  ;;  %v1283_v12 = vld [vmem:[%s1440_s6 + $0x9] ss:$0 sm:$0xff]  ;;  %v1277_v13 = vld [vmem:[%s1849_s2 + $0xd8] sm:$0xff]  ;;  %v1281_v31 = vld [vmem:[%s1850_s3 + $0xe0] sm:$0xff] }
  0x3e   : > { %v578_v53 = vsub.f32 %v568_v40, %v575_v39  ;;  %v579_v54 = vsub.f32 %v569_v41, %v576_v42  ;;  %v583_v55 = vadd.f32 %v580_v43, %v547_v30  ;;  %v587_v56 = vmul.f32 %v1268_v18, %v1262_v19  ;;  %v1278_v19 = vld [vmem:[%s1849_s2 + $0xe0] sm:$0xff]  ;;  %v1282_v32 = vld [vmem:[%s1850_s3 + $0xe8] sm:$0xff] }
  0x3f   : > { %v584_v57 = vadd.f32 %v581_v47, %v548_v36  ;;  %v585_v58 = vadd.f32 %v582_v48, %v549_v37  ;;  %v588_v59 = vmul.f32 %v1268_v18, %v1263_v20  ;;  %v606_v61 = vmul.f32 %v1275_v44, %v1269_v45  ;;  %v1284_v18 = vld [vmem:[%s1446_s9 + $0x9] ss:$0 sm:$0xff] }
  0x40   : > { %v589_v62 = vadd.f32 %v586_v49, %v583_v55  ;;  %v607_v1 = vmul.f32 %v1275_v44, %v1270_v51  ;;  %v608_v2 = vmul.f32 %v1275_v44, %v1271_v52  ;;  %v616_v3 = vmul.f32 %v1276_v50, %v1272_v60  ;;  %v1279_v20 = vld [vmem:[%s1849_s2 + $0xe8] sm:$0xff] }
  0x41   : > { %v590_v4 = vadd.f32 %v587_v56, %v584_v57  ;;  %v591_v5 = vadd.f32 %v588_v59, %v585_v58  ;;  %v609_v6 = vadd.f32 %v606_v61, %v577_v46  ;;  %v617_v7 = vmul.f32 %v1276_v50, %v1273_v63 }
  0x42   : > { %v610_v8 = vadd.f32 %v607_v1, %v578_v53  ;;  %v611_v9 = vadd.f32 %v608_v2, %v579_v54  ;;  %v618_v10 = vmul.f32 %v1276_v50, %v1274_v0  ;;  %v622_v11 = vmul.f32 %v1275_v44, %v1272_v60  ;;  %v1288_v60 = vld [vmem:[%s1850_s3 + $0xf0] sm:$0xff] }
  0x43   : > { %v619_v14 = vsub.f32 %v609_v6, %v616_v3  ;;  %v623_v15 = vmul.f32 %v1275_v44, %v1273_v63  ;;  %v624_v16 = vmul.f32 %v1275_v44, %v1274_v0  ;;  %v628_v17 = vmul.f32 %v1276_v50, %v1269_v45  ;;  %v1291_v44 = vld [vmem:[%s1440_s6 + $0xa] ss:$0 sm:$0xff]  ;;  %v1285_v45 = vld [vmem:[%s1849_s2 + $0xf0] sm:$0xff]  ;;  %v1289_v63 = vld [vmem:[%s1850_s3 + $0xf8] sm:$0xff] }
  0x44   : > { %v620_v21 = vsub.f32 %v610_v8, %v617_v7  ;;  %v621_v22 = vsub.f32 %v611_v9, %v618_v10  ;;  %v625_v23 = vadd.f32 %v622_v11, %v589_v62  ;;  %v629_v24 = vmul.f32 %v1276_v50, %v1270_v51  ;;  %v1286_v51 = vld [vmem:[%s1849_s2 + $0xf8] sm:$0xff]  ;;  %v1290_v0 = vld [vmem:[%s1850_s3 + $0x100] sm:$0xff] }
  0x45   : > { %v626_v25 = vadd.f32 %v623_v15, %v590_v4  ;;  %v627_v26 = vadd.f32 %v624_v16, %v591_v5  ;;  %v630_v27 = vmul.f32 %v1276_v50, %v1271_v52  ;;  %v648_v29 = vmul.f32 %v1283_v12, %v1277_v13  ;;  %v1292_v50 = vld [vmem:[%s1446_s9 + $0xa] ss:$0 sm:$0xff]  ;;  %v1287_v52 = vld [vmem:[%s1849_s2 + $0x100] sm:$0xff] }
  0x46   : > { %v631_v30 = vadd.f32 %v628_v17, %v625_v23  ;;  %v649_v33 = vmul.f32 %v1283_v12, %v1278_v19  ;;  %v650_v34 = vmul.f32 %v1283_v12, %v1279_v20  ;;  %v658_v35 = vmul.f32 %v1284_v18, %v1280_v28 }
  0x47   : > { %v632_v36 = vadd.f32 %v629_v24, %v626_v25  ;;  %v633_v37 = vadd.f32 %v630_v27, %v627_v26  ;;  %v651_v38 = vadd.f32 %v648_v29, %v619_v14  ;;  %v659_v39 = vmul.f32 %v1284_v18, %v1281_v31 }
  0x48   : > { %v652_v40 = vadd.f32 %v649_v33, %v620_v21  ;;  %v653_v41 = vadd.f32 %v650_v34, %v621_v22  ;;  %v660_v42 = vmul.f32 %v1284_v18, %v1282_v32  ;;  %v664_v43 = vmul.f32 %v1283_v12, %v1280_v28  ;;  %v1296_v28 = vld [vmem:[%s1850_s3 + $0x108] sm:$0xff] }
  0x49   : > { %v661_v46 = vsub.f32 %v651_v38, %v658_v35  ;;  %v665_v47 = vmul.f32 %v1283_v12, %v1281_v31  ;;  %v666_v48 = vmul.f32 %v1283_v12, %v1282_v32  ;;  %v670_v49 = vmul.f32 %v1284_v18, %v1277_v13  ;;  %v1299_v12 = vld [vmem:[%s1440_s6 + $0xb] ss:$0 sm:$0xff]  ;;  %v1297_v31 = vld [vmem:[%s1850_s3 + $0x110] sm:$0xff]  ;;  %v1298_v32 = vld [vmem:[%s1850_s3 + $0x118] sm:$0xff] }
  0x4a   : > { %v662_v53 = vsub.f32 %v652_v40, %v659_v39  ;;  %v663_v54 = vsub.f32 %v653_v41, %v660_v42  ;;  %v667_v55 = vadd.f32 %v664_v43, %v631_v30  ;;  %v671_v56 = vmul.f32 %v1284_v18, %v1278_v19  ;;  %v1293_v13 = vld [vmem:[%s1849_s2 + $0x108] sm:$0xff]  ;;  %v1294_v19 = vld [vmem:[%s1849_s2 + $0x110] sm:$0xff] }
  0x4b   : > { %v668_v57 = vadd.f32 %v665_v47, %v632_v36  ;;  %v669_v58 = vadd.f32 %v666_v48, %v633_v37  ;;  %v672_v59 = vmul.f32 %v1284_v18, %v1279_v20  ;;  %v690_v61 = vmul.f32 %v1291_v44, %v1285_v45  ;;  %v1300_v18 = vld [vmem:[%s1446_s9 + $0xb] ss:$0 sm:$0xff]  ;;  %v1295_v20 = vld [vmem:[%s1849_s2 + $0x118] sm:$0xff] }
  0x4c   : > { %v673_v62 = vadd.f32 %v670_v49, %v667_v55  ;;  %v691_v1 = vmul.f32 %v1291_v44, %v1286_v51  ;;  %v692_v2 = vmul.f32 %v1291_v44, %v1287_v52  ;;  %v700_v3 = vmul.f32 %v1292_v50, %v1288_v60 }
  0x4d   : > { %v674_v4 = vadd.f32 %v671_v56, %v668_v57  ;;  %v675_v5 = vadd.f32 %v672_v59, %v669_v58  ;;  %v693_v6 = vadd.f32 %v690_v61, %v661_v46  ;;  %v701_v7 = vmul.f32 %v1292_v50, %v1289_v63 }
  0x4e   : > { %v694_v8 = vadd.f32 %v691_v1, %v662_v53  ;;  %v695_v9 = vadd.f32 %v692_v2, %v663_v54  ;;  %v702_v10 = vmul.f32 %v1292_v50, %v1290_v0  ;;  %v706_v11 = vmul.f32 %v1291_v44, %v1288_v60  ;;  %v1304_v60 = vld [vmem:[%s1850_s3 + $0x120] sm:$0xff] }
  0x4f   : > { %v703_v14 = vsub.f32 %v693_v6, %v700_v3  ;;  %v707_v15 = vmul.f32 %v1291_v44, %v1289_v63  ;;  %v708_v16 = vmul.f32 %v1291_v44, %v1290_v0  ;;  %v712_v17 = vmul.f32 %v1292_v50, %v1285_v45  ;;  %v1307_v44 = vld [vmem:[%s1440_s6 + $0xc] ss:$0 sm:$0xff]  ;;  %v1301_v45 = vld [vmem:[%s1849_s2 + $0x120] sm:$0xff]  ;;  %v1306_v0 = vld [vmem:[%s1850_s3 + $0x130] sm:$0xff] }
  0x50   : > { %v704_v21 = vsub.f32 %v694_v8, %v701_v7  ;;  %v705_v22 = vsub.f32 %v695_v9, %v702_v10  ;;  %v709_v23 = vadd.f32 %v706_v11, %v673_v62  ;;  %v713_v24 = vmul.f32 %v1292_v50, %v1286_v51  ;;  %v1302_v51 = vld [vmem:[%s1849_s2 + $0x128] sm:$0xff] }
  0x51   : > { %v710_v25 = vadd.f32 %v707_v15, %v674_v4  ;;  %v711_v26 = vadd.f32 %v708_v16, %v675_v5  ;;  %v714_v27 = vmul.f32 %v1292_v50, %v1287_v52  ;;  %v732_v29 = vmul.f32 %v1299_v12, %v1293_v13  ;;  %v1308_v50 = vld [vmem:[%s1446_s9 + $0xc] ss:$0 sm:$0xff]  ;;  %v1303_v52 = vld [vmem:[%s1849_s2 + $0x130] sm:$0xff] }
  0x52   : > { %v715_v30 = vadd.f32 %v712_v17, %v709_v23  ;;  %v733_v33 = vmul.f32 %v1299_v12, %v1294_v19  ;;  %v734_v34 = vmul.f32 %v1299_v12, %v1295_v20  ;;  %v742_v35 = vmul.f32 %v1300_v18, %v1296_v28  ;;  %v1305_v63 = vld [vmem:[%s1850_s3 + $0x128] sm:$0xff] }
  0x53   : > { %v716_v36 = vadd.f32 %v713_v24, %v710_v25  ;;  %v717_v37 = vadd.f32 %v714_v27, %v711_v26  ;;  %v735_v38 = vadd.f32 %v732_v29, %v703_v14  ;;  %v743_v39 = vmul.f32 %v1300_v18, %v1297_v31 }
  0x54   : > { %v736_v40 = vadd.f32 %v733_v33, %v704_v21  ;;  %v737_v41 = vadd.f32 %v734_v34, %v705_v22  ;;  %v744_v42 = vmul.f32 %v1300_v18, %v1298_v32  ;;  %v748_v43 = vmul.f32 %v1299_v12, %v1296_v28  ;;  %v1312_v28 = vld [vmem:[%s1850_s3 + $0x138] sm:$0xff] }
  0x55   : > { %v745_v46 = vsub.f32 %v735_v38, %v742_v35  ;;  %v749_v47 = vmul.f32 %v1299_v12, %v1297_v31  ;;  %v750_v48 = vmul.f32 %v1299_v12, %v1298_v32  ;;  %v754_v49 = vmul.f32 %v1300_v18, %v1293_v13  ;;  %v1315_v12 = vld [vmem:[%s1440_s6 + $0xd] ss:$0 sm:$0xff]  ;;  %v1309_v13 = vld [vmem:[%s1849_s2 + $0x138] sm:$0xff]  ;;  %v1313_v31 = vld [vmem:[%s1850_s3 + $0x140] sm:$0xff] }
  0x56   : > { %v746_v53 = vsub.f32 %v736_v40, %v743_v39  ;;  %v747_v54 = vsub.f32 %v737_v41, %v744_v42  ;;  %v751_v55 = vadd.f32 %v748_v43, %v715_v30  ;;  %v755_v56 = vmul.f32 %v1300_v18, %v1294_v19  ;;  %v1310_v19 = vld [vmem:[%s1849_s2 + $0x140] sm:$0xff]  ;;  %v1314_v32 = vld [vmem:[%s1850_s3 + $0x148] sm:$0xff] }
  0x57   : > { %v752_v57 = vadd.f32 %v749_v47, %v716_v36  ;;  %v753_v58 = vadd.f32 %v750_v48, %v717_v37  ;;  %v756_v59 = vmul.f32 %v1300_v18, %v1295_v20  ;;  %v774_v61 = vmul.f32 %v1307_v44, %v1301_v45  ;;  %v1316_v18 = vld [vmem:[%s1446_s9 + $0xd] ss:$0 sm:$0xff] }
  0x58   : > { %v757_v62 = vadd.f32 %v754_v49, %v751_v55  ;;  %v775_v1 = vmul.f32 %v1307_v44, %v1302_v51  ;;  %v776_v2 = vmul.f32 %v1307_v44, %v1303_v52  ;;  %v784_v3 = vmul.f32 %v1308_v50, %v1304_v60  ;;  %v1311_v20 = vld [vmem:[%s1849_s2 + $0x148] sm:$0xff] }
  0x59   : > { %v758_v4 = vadd.f32 %v755_v56, %v752_v57  ;;  %v759_v5 = vadd.f32 %v756_v59, %v753_v58  ;;  %v777_v6 = vadd.f32 %v774_v61, %v745_v46  ;;  %v785_v7 = vmul.f32 %v1308_v50, %v1305_v63 }
  0x5a   : > { %v778_v8 = vadd.f32 %v775_v1, %v746_v53  ;;  %v779_v9 = vadd.f32 %v776_v2, %v747_v54  ;;  %v786_v10 = vmul.f32 %v1308_v50, %v1306_v0  ;;  %v790_v11 = vmul.f32 %v1307_v44, %v1304_v60  ;;  %v1320_v60 = vld [vmem:[%s1850_s3 + $0x150] sm:$0xff] }
  0x5b   : > { %v787_v14 = vsub.f32 %v777_v6, %v784_v3  ;;  %v791_v15 = vmul.f32 %v1307_v44, %v1305_v63  ;;  %v792_v16 = vmul.f32 %v1307_v44, %v1306_v0  ;;  %v796_v17 = vmul.f32 %v1308_v50, %v1301_v45  ;;  %v1323_v44 = vld [vmem:[%s1440_s6 + $0xe] ss:$0 sm:$0xff]  ;;  %v1317_v45 = vld [vmem:[%s1849_s2 + $0x150] sm:$0xff]  ;;  %v1321_v63 = vld [vmem:[%s1850_s3 + $0x158] sm:$0xff] }
  0x5c   : > { %v788_v21 = vsub.f32 %v778_v8, %v785_v7  ;;  %v789_v22 = vsub.f32 %v779_v9, %v786_v10  ;;  %v793_v23 = vadd.f32 %v790_v11, %v757_v62  ;;  %v797_v24 = vmul.f32 %v1308_v50, %v1302_v51  ;;  %v1318_v51 = vld [vmem:[%s1849_s2 + $0x158] sm:$0xff]  ;;  %v1322_v0 = vld [vmem:[%s1850_s3 + $0x160] sm:$0xff] }
  0x5d   : > { %v794_v25 = vadd.f32 %v791_v15, %v758_v4  ;;  %v795_v26 = vadd.f32 %v792_v16, %v759_v5  ;;  %v798_v27 = vmul.f32 %v1308_v50, %v1303_v52  ;;  %v816_v29 = vmul.f32 %v1315_v12, %v1309_v13  ;;  %v1324_v50 = vld [vmem:[%s1446_s9 + $0xe] ss:$0 sm:$0xff]  ;;  %v1319_v52 = vld [vmem:[%s1849_s2 + $0x160] sm:$0xff] }
  0x5e   : > { %v799_v30 = vadd.f32 %v796_v17, %v793_v23  ;;  %v817_v33 = vmul.f32 %v1315_v12, %v1310_v19  ;;  %v818_v34 = vmul.f32 %v1315_v12, %v1311_v20  ;;  %v826_v35 = vmul.f32 %v1316_v18, %v1312_v28 }
  0x5f   : > { %v800_v36 = vadd.f32 %v797_v24, %v794_v25  ;;  %v801_v37 = vadd.f32 %v798_v27, %v795_v26  ;;  %v819_v38 = vadd.f32 %v816_v29, %v787_v14  ;;  %v827_v39 = vmul.f32 %v1316_v18, %v1313_v31 }
  0x60   : > { %v820_v40 = vadd.f32 %v817_v33, %v788_v21  ;;  %v821_v41 = vadd.f32 %v818_v34, %v789_v22  ;;  %v828_v42 = vmul.f32 %v1316_v18, %v1314_v32  ;;  %v832_v43 = vmul.f32 %v1315_v12, %v1312_v28  ;;  %v1328_v28 = vld [vmem:[%s1850_s3 + $0x168] sm:$0xff] }
  0x61   : > { %v829_v46 = vsub.f32 %v819_v38, %v826_v35  ;;  %v833_v47 = vmul.f32 %v1315_v12, %v1313_v31  ;;  %v834_v48 = vmul.f32 %v1315_v12, %v1314_v32  ;;  %v838_v49 = vmul.f32 %v1316_v18, %v1309_v13  ;;  %v1331_v12 = vld [vmem:[%s1440_s6 + $0xf] ss:$0 sm:$0xff]  ;;  %v1329_v31 = vld [vmem:[%s1850_s3 + $0x170] sm:$0xff]  ;;  %v1330_v32 = vld [vmem:[%s1850_s3 + $0x178] sm:$0xff] }
  0x62   : > { %v830_v53 = vsub.f32 %v820_v40, %v827_v39  ;;  %v831_v54 = vsub.f32 %v821_v41, %v828_v42  ;;  %v835_v55 = vadd.f32 %v832_v43, %v799_v30  ;;  %v839_v56 = vmul.f32 %v1316_v18, %v1310_v19  ;;  %v1325_v13 = vld [vmem:[%s1849_s2 + $0x168] sm:$0xff]  ;;  %v1326_v19 = vld [vmem:[%s1849_s2 + $0x170] sm:$0xff] }
  0x63   : > { %v836_v57 = vadd.f32 %v833_v47, %v800_v36  ;;  %v837_v58 = vadd.f32 %v834_v48, %v801_v37  ;;  %v840_v59 = vmul.f32 %v1316_v18, %v1311_v20  ;;  %v858_v61 = vmul.f32 %v1323_v44, %v1317_v45  ;;  %v1332_v18 = vld [vmem:[%s1446_s9 + $0xf] ss:$0 sm:$0xff]  ;;  %v1327_v20 = vld [vmem:[%s1849_s2 + $0x178] sm:$0xff] }
  0x64   : > { %v841_v62 = vadd.f32 %v838_v49, %v835_v55  ;;  %v859_v1 = vmul.f32 %v1323_v44, %v1318_v51  ;;  %v860_v2 = vmul.f32 %v1323_v44, %v1319_v52  ;;  %v868_v3 = vmul.f32 %v1324_v50, %v1320_v60 }
  0x65   : > { %v842_v4 = vadd.f32 %v839_v56, %v836_v57  ;;  %v843_v5 = vadd.f32 %v840_v59, %v837_v58  ;;  %v861_v6 = vadd.f32 %v858_v61, %v829_v46  ;;  %v869_v7 = vmul.f32 %v1324_v50, %v1321_v63 }
  0x66   : > { %v862_v8 = vadd.f32 %v859_v1, %v830_v53  ;;  %v863_v9 = vadd.f32 %v860_v2, %v831_v54  ;;  %v870_v10 = vmul.f32 %v1324_v50, %v1322_v0  ;;  %v874_v11 = vmul.f32 %v1323_v44, %v1320_v60  ;;  %v1336_v60 = vld [vmem:[%s1850_s3 + $0x180] sm:$0xff] }
  0x67   : > { %v871_v14 = vsub.f32 %v861_v6, %v868_v3  ;;  %v875_v15 = vmul.f32 %v1323_v44, %v1321_v63  ;;  %v876_v16 = vmul.f32 %v1323_v44, %v1322_v0  ;;  %v880_v17 = vmul.f32 %v1324_v50, %v1317_v45  ;;  %v1339_v44 = vld [vmem:[%s1440_s6 + $0x10] ss:$0 sm:$0xff]  ;;  %v1333_v45 = vld [vmem:[%s1849_s2 + $0x180] sm:$0xff]  ;;  %v1337_v63 = vld [vmem:[%s1850_s3 + $0x188] sm:$0xff] }
  0x68   : > { %v872_v21 = vsub.f32 %v862_v8, %v869_v7  ;;  %v873_v22 = vsub.f32 %v863_v9, %v870_v10  ;;  %v877_v23 = vadd.f32 %v874_v11, %v841_v62  ;;  %v881_v24 = vmul.f32 %v1324_v50, %v1318_v51  ;;  %v1334_v51 = vld [vmem:[%s1849_s2 + $0x188] sm:$0xff]  ;;  %v1338_v0 = vld [vmem:[%s1850_s3 + $0x190] sm:$0xff] }
  0x69   : > { %v878_v25 = vadd.f32 %v875_v15, %v842_v4  ;;  %v879_v26 = vadd.f32 %v876_v16, %v843_v5  ;;  %v882_v27 = vmul.f32 %v1324_v50, %v1319_v52  ;;  %v900_v29 = vmul.f32 %v1331_v12, %v1325_v13  ;;  %v1340_v50 = vld [vmem:[%s1446_s9 + $0x10] ss:$0 sm:$0xff] }
  0x6a   : > { %v883_v30 = vadd.f32 %v880_v17, %v877_v23  ;;  %v901_v33 = vmul.f32 %v1331_v12, %v1326_v19  ;;  %v902_v34 = vmul.f32 %v1331_v12, %v1327_v20  ;;  %v910_v35 = vmul.f32 %v1332_v18, %v1328_v28  ;;  %v1335_v52 = vld [vmem:[%s1849_s2 + $0x190] sm:$0xff] }
  0x6b   : > { %v884_v36 = vadd.f32 %v881_v24, %v878_v25  ;;  %v885_v37 = vadd.f32 %v882_v27, %v879_v26  ;;  %v903_v38 = vadd.f32 %v900_v29, %v871_v14  ;;  %v911_v39 = vmul.f32 %v1332_v18, %v1329_v31 }
  0x6c   : > { %v904_v40 = vadd.f32 %v901_v33, %v872_v21  ;;  %v905_v41 = vadd.f32 %v902_v34, %v873_v22  ;;  %v912_v42 = vmul.f32 %v1332_v18, %v1330_v32  ;;  %v916_v43 = vmul.f32 %v1331_v12, %v1328_v28  ;;  %v1344_v28 = vld [vmem:[%s1850_s3 + $0x198] sm:$0xff] }
  0x6d   : > { %v913_v46 = vsub.f32 %v903_v38, %v910_v35  ;;  %v917_v47 = vmul.f32 %v1331_v12, %v1329_v31  ;;  %v918_v48 = vmul.f32 %v1331_v12, %v1330_v32  ;;  %v922_v49 = vmul.f32 %v1332_v18, %v1325_v13  ;;  %v1347_v12 = vld [vmem:[%s1440_s6 + $0x11] ss:$0 sm:$0xff]  ;;  %v1341_v13 = vld [vmem:[%s1849_s2 + $0x198] sm:$0xff]  ;;  %v1345_v31 = vld [vmem:[%s1850_s3 + $0x1a0] sm:$0xff] }
  0x6e   : > { %v914_v53 = vsub.f32 %v904_v40, %v911_v39  ;;  %v915_v54 = vsub.f32 %v905_v41, %v912_v42  ;;  %v919_v55 = vadd.f32 %v916_v43, %v883_v30  ;;  %v923_v56 = vmul.f32 %v1332_v18, %v1326_v19  ;;  %v1342_v19 = vld [vmem:[%s1849_s2 + $0x1a0] sm:$0xff]  ;;  %v1346_v32 = vld [vmem:[%s1850_s3 + $0x1a8] sm:$0xff] }
  0x6f   : > { %v920_v57 = vadd.f32 %v917_v47, %v884_v36  ;;  %v921_v58 = vadd.f32 %v918_v48, %v885_v37  ;;  %v924_v59 = vmul.f32 %v1332_v18, %v1327_v20  ;;  %v942_v61 = vmul.f32 %v1339_v44, %v1333_v45  ;;  %v1348_v18 = vld [vmem:[%s1446_s9 + $0x11] ss:$0 sm:$0xff]  ;;  %v1343_v20 = vld [vmem:[%s1849_s2 + $0x1a8] sm:$0xff] }
  0x70   : > { %v925_v62 = vadd.f32 %v922_v49, %v919_v55  ;;  %v943_v1 = vmul.f32 %v1339_v44, %v1334_v51  ;;  %v944_v2 = vmul.f32 %v1339_v44, %v1335_v52  ;;  %v952_v3 = vmul.f32 %v1340_v50, %v1336_v60 }
  0x71   : > { %v926_v4 = vadd.f32 %v923_v56, %v920_v57  ;;  %v927_v5 = vadd.f32 %v924_v59, %v921_v58  ;;  %v945_v6 = vadd.f32 %v942_v61, %v913_v46  ;;  %v953_v7 = vmul.f32 %v1340_v50, %v1337_v63 }
  0x72   : > { %v946_v8 = vadd.f32 %v943_v1, %v914_v53  ;;  %v947_v9 = vadd.f32 %v944_v2, %v915_v54  ;;  %v954_v10 = vmul.f32 %v1340_v50, %v1338_v0  ;;  %v958_v11 = vmul.f32 %v1339_v44, %v1336_v60  ;;  %v1352_v60 = vld [vmem:[%s1850_s3 + $0x1b0] sm:$0xff] }
  0x73   : > { %v955_v14 = vsub.f32 %v945_v6, %v952_v3  ;;  %v959_v15 = vmul.f32 %v1339_v44, %v1337_v63  ;;  %v960_v16 = vmul.f32 %v1339_v44, %v1338_v0  ;;  %v964_v17 = vmul.f32 %v1340_v50, %v1333_v45  ;;  %v1355_v44 = vld [vmem:[%s1440_s6 + $0x12] ss:$0 sm:$0xff]  ;;  %v1353_v63 = vld [vmem:[%s1850_s3 + $0x1b8] sm:$0xff]  ;;  %v1354_v0 = vld [vmem:[%s1850_s3 + $0x1c0] sm:$0xff] }
  0x74   : > { %v956_v21 = vsub.f32 %v946_v8, %v953_v7  ;;  %v957_v22 = vsub.f32 %v947_v9, %v954_v10  ;;  %v961_v23 = vadd.f32 %v958_v11, %v925_v62  ;;  %v965_v24 = vmul.f32 %v1340_v50, %v1334_v51  ;;  %v1349_v45 = vld [vmem:[%s1849_s2 + $0x1b0] sm:$0xff]  ;;  %v1350_v51 = vld [vmem:[%s1849_s2 + $0x1b8] sm:$0xff] }
  0x75   : > { %v962_v25 = vadd.f32 %v959_v15, %v926_v4  ;;  %v963_v26 = vadd.f32 %v960_v16, %v927_v5  ;;  %v966_v27 = vmul.f32 %v1340_v50, %v1335_v52  ;;  %v984_v29 = vmul.f32 %v1347_v12, %v1341_v13  ;;  %v1356_v50 = vld [vmem:[%s1446_s9 + $0x12] ss:$0 sm:$0xff]  ;;  %v1351_v52 = vld [vmem:[%s1849_s2 + $0x1c0] sm:$0xff] }
  0x76   : > { %v967_v30 = vadd.f32 %v964_v17, %v961_v23  ;;  %v985_v33 = vmul.f32 %v1347_v12, %v1342_v19  ;;  %v986_v34 = vmul.f32 %v1347_v12, %v1343_v20  ;;  %v994_v35 = vmul.f32 %v1348_v18, %v1344_v28 }
  0x77   : > { %v968_v36 = vadd.f32 %v965_v24, %v962_v25  ;;  %v969_v37 = vadd.f32 %v966_v27, %v963_v26  ;;  %v987_v38 = vadd.f32 %v984_v29, %v955_v14  ;;  %v995_v39 = vmul.f32 %v1348_v18, %v1345_v31 }
  0x78   : > { %v988_v40 = vadd.f32 %v985_v33, %v956_v21  ;;  %v989_v41 = vadd.f32 %v986_v34, %v957_v22  ;;  %v996_v42 = vmul.f32 %v1348_v18, %v1346_v32  ;;  %v1000_v43 = vmul.f32 %v1347_v12, %v1344_v28  ;;  %v1360_v28 = vld [vmem:[%s1850_s3 + $0x1c8] sm:$0xff] }
  0x79   : > { %v997_v46 = vsub.f32 %v987_v38, %v994_v35  ;;  %v1001_v47 = vmul.f32 %v1347_v12, %v1345_v31  ;;  %v1002_v48 = vmul.f32 %v1347_v12, %v1346_v32  ;;  %v1006_v49 = vmul.f32 %v1348_v18, %v1341_v13  ;;  %v1363_v12 = vld [vmem:[%s1440_s6 + $0x13] ss:$0 sm:$0xff]  ;;  %v1357_v13 = vld [vmem:[%s1849_s2 + $0x1c8] sm:$0xff]  ;;  %v1362_v32 = vld [vmem:[%s1850_s3 + $0x1d8] sm:$0xff] }
  0x7a   : > { %v998_v53 = vsub.f32 %v988_v40, %v995_v39  ;;  %v999_v54 = vsub.f32 %v989_v41, %v996_v42  ;;  %v1003_v55 = vadd.f32 %v1000_v43, %v967_v30  ;;  %v1007_v56 = vmul.f32 %v1348_v18, %v1342_v19  ;;  %v1358_v19 = vld [vmem:[%s1849_s2 + $0x1d0] sm:$0xff] }
  0x7b   : > { %v1004_v57 = vadd.f32 %v1001_v47, %v968_v36  ;;  %v1005_v58 = vadd.f32 %v1002_v48, %v969_v37  ;;  %v1008_v59 = vmul.f32 %v1348_v18, %v1343_v20  ;;  %v1026_v61 = vmul.f32 %v1355_v44, %v1349_v45  ;;  %v1364_v18 = vld [vmem:[%s1446_s9 + $0x13] ss:$0 sm:$0xff]  ;;  %v1359_v20 = vld [vmem:[%s1849_s2 + $0x1d8] sm:$0xff] }
  0x7c   : > { %v1009_v62 = vadd.f32 %v1006_v49, %v1003_v55  ;;  %v1027_v1 = vmul.f32 %v1355_v44, %v1350_v51  ;;  %v1028_v2 = vmul.f32 %v1355_v44, %v1351_v52  ;;  %v1036_v3 = vmul.f32 %v1356_v50, %v1352_v60  ;;  %v1361_v31 = vld [vmem:[%s1850_s3 + $0x1d0] sm:$0xff] }
  0x7d   : > { %v1010_v4 = vadd.f32 %v1007_v56, %v1004_v57  ;;  %v1011_v5 = vadd.f32 %v1008_v59, %v1005_v58  ;;  %v1029_v6 = vadd.f32 %v1026_v61, %v997_v46  ;;  %v1037_v7 = vmul.f32 %v1356_v50, %v1353_v63 }
  0x7e   : > { %v1030_v8 = vadd.f32 %v1027_v1, %v998_v53  ;;  %v1031_v9 = vadd.f32 %v1028_v2, %v999_v54  ;;  %v1038_v10 = vmul.f32 %v1356_v50, %v1354_v0  ;;  %v1042_v11 = vmul.f32 %v1355_v44, %v1352_v60 }
  0x7f   : > { %v1039_v14 = vsub.f32 %v1029_v6, %v1036_v3  ;;  %v1043_v15 = vmul.f32 %v1355_v44, %v1353_v63  ;;  %v1044_v16 = vmul.f32 %v1355_v44, %v1354_v0  ;;  %v1048_v17 = vmul.f32 %v1356_v50, %v1349_v45 }
  0x80   : > { %v1040_v21 = vsub.f32 %v1030_v8, %v1037_v7  ;;  %v1041_v22 = vsub.f32 %v1031_v9, %v1038_v10  ;;  %v1045_v23 = vadd.f32 %v1042_v11, %v1009_v62  ;;  %v1049_v24 = vmul.f32 %v1356_v50, %v1350_v51 }
  0x81   : > { %v1046_v25 = vadd.f32 %v1043_v15, %v1010_v4  ;;  %v1047_v26 = vadd.f32 %v1044_v16, %v1011_v5  ;;  %v1050_v27 = vmul.f32 %v1356_v50, %v1351_v52  ;;  %v1068_v29 = vmul.f32 %v1363_v12, %v1357_v13 }
  0x82   : > { %v1051_v30 = vadd.f32 %v1048_v17, %v1045_v23  ;;  %v1069_v33 = vmul.f32 %v1363_v12, %v1358_v19  ;;  %v1070_v34 = vmul.f32 %v1363_v12, %v1359_v20  ;;  %v1078_v35 = vmul.f32 %v1364_v18, %v1360_v28 }
  0x83   : > { %v1052_v36 = vadd.f32 %v1049_v24, %v1046_v25  ;;  %v1053_v37 = vadd.f32 %v1050_v27, %v1047_v26  ;;  %v1071_v38 = vadd.f32 %v1068_v29, %v1039_v14  ;;  %v1079_v39 = vmul.f32 %v1364_v18, %v1361_v31 }
  0x84   : > { %v1072_v40 = vadd.f32 %v1069_v33, %v1040_v21  ;;  %v1073_v41 = vadd.f32 %v1070_v34, %v1041_v22  ;;  %v1080_v42 = vmul.f32 %v1364_v18, %v1362_v32  ;;  %v1084_v43 = vmul.f32 %v1363_v12, %v1360_v28 }
  0x85   : > { %v1081_v44 = vsub.f32 %v1071_v38, %v1078_v35  ;;  %v1085_v45 = vmul.f32 %v1363_v12, %v1361_v31  ;;  %v1086_v46 = vmul.f32 %v1363_v12, %v1362_v32  ;;  %v1090_v47 = vmul.f32 %v1364_v18, %v1357_v13 }
  0x86   : > { %v1082_v48 = vsub.f32 %v1072_v40, %v1079_v39  ;;  %v1083_v49 = vsub.f32 %v1073_v41, %v1080_v42  ;;  %v1087_v50 = vadd.f32 %v1084_v43, %v1051_v30  ;;  %v1091_v51 = vmul.f32 %v1364_v18, %v1358_v19 }
  0x87   : > { %v1088_v52 = vadd.f32 %v1085_v45, %v1052_v36  ;;  %v1089_v53 = vadd.f32 %v1086_v46, %v1053_v37  ;;  %v1092_v54 = vmul.f32 %v1364_v18, %v1359_v20  ;;  %1096 = vst [vmem:[%s252_s11] sm:$0xff] %v1081_v44 }
  0x88   : > { %v1093_v55 = vadd.f32 %v1090_v47, %v1087_v50  ;;  %1097 = vst [vmem:[%s252_s11 + $0x8] sm:$0xff] %v1082_v48  ;;  %1098 = vst [vmem:[%s252_s11 + $0x10] sm:$0xff] %v1083_v49 }
  0x89   : > { %v1094_v56 = vadd.f32 %v1091_v51, %v1088_v52  ;;  %v1095_v57 = vadd.f32 %v1092_v54, %v1089_v53 }
  0x8a   : > { %1099 = vst [vmem:[%s257_s14] sm:$0xff] %v1093_v55 }
  0x8b   : > { %1100 = vst [vmem:[%s257_s14 + $0x8] sm:$0xff] %v1094_v56  ;;  %1101 = vst [vmem:[%s257_s14 + $0x10] sm:$0xff] %v1095_v57 }
  0x8c PF: > { %s16_s18 = sadd.s32 1, %s1382_s18  }
  0x8d   : > { %p13_p4 = scmp.ge.s32.totalorder %s16_s18, 4  }
  0x8f   :  { %15 = sbr.rel (!%p13_p4) target bundleno = 1 (0x1), region = 119 }

// kernel: reverse.8
= control target key start
LH: loop header
LB: loop body
LE: loop exit
PB: predicated region body
PF: predicated region fallthrough
CT: control target
= control target key end

     0   :  { %s584_s0 = inlined_call_operand.vmem [shape: f32[2,20,18,8], index: 0, kind: input, shape index: {}]   ;;  %s585_s1 = inlined_call_operand.vmem [shape: f32[2,20,18,8], index: 1, kind: output, shape index: {}]  }
   0x1   :  { %v192_v0 = vld [vmem:[%s584_s0 + $0xa8] sm:$0xff]  ;;  %v195_v2 = vld [vmem:[%s584_s0 + $0x90] sm:$0xff]  ;;  %v199_v4 = vld [vmem:[%s584_s0 + $0x78] sm:$0xff] }
   0x2   :  { %v193_v1 = vld [vmem:[%s584_s0 + $0x168] sm:$0xff]  ;;  %4 = vst [vmem:[%s585_s1] sm:$0xff] %v192_v0  ;;  %196 = vst [vmem:[%s585_s1 + $0x18] sm:$0xff] %v195_v2  ;;  %v197_v3 = vld [vmem:[%s584_s0 + $0x150] sm:$0xff] }
   0x3   :  { %194 = vst [vmem:[%s585_s1 + $0xc0] sm:$0xff] %v193_v1  ;;  %v201_v5 = vld [vmem:[%s584_s0 + $0x138] sm:$0xff]  ;;  %198 = vst [vmem:[%s585_s1 + $0xd8] sm:$0xff] %v197_v3  ;;  %v203_v6 = vld [vmem:[%s584_s0 + $0x60] sm:$0xff] }
   0x4   :  { %200 = vst [vmem:[%s585_s1 + $0x30] sm:$0xff] %v199_v4  ;;  %202 = vst [vmem:[%s585_s1 + $0xf0] sm:$0xff] %v201_v5  ;;  %v205_v7 = vld [vmem:[%s584_s0 + $0x120] sm:$0xff]  ;;  %v207_v8 = vld [vmem:[%s584_s0 + $0x48] sm:$0xff] }
   0x5   :  { %204 = vst [vmem:[%s585_s1 + $0x48] sm:$0xff] %v203_v6  ;;  %206 = vst [vmem:[%s585_s1 + $0x108] sm:$0xff] %v205_v7  ;;  %v209_v9 = vld [vmem:[%s584_s0 + $0x108] sm:$0xff]  ;;  %v211_v10 = vld [vmem:[%s584_s0 + $0x30] sm:$0xff] }
   0x6   :  { %208 = vst [vmem:[%s585_s1 + $0x60] sm:$0xff] %v207_v8  ;;  %v213_v11 = vld [vmem:[%s584_s0 + $0xf0] sm:$0xff]  ;;  %210 = vst [vmem:[%s585_s1 + $0x120] sm:$0xff] %v209_v9  ;;  %v215_v12 = vld [vmem:[%s584_s0 + $0x18] sm:$0xff] }
   0x7   :  { %212 = vst [vmem:[%s585_s1 + $0x78] sm:$0xff] %v211_v10  ;;  %214 = vst [vmem:[%s585_s1 + $0x138] sm:$0xff] %v213_v11  ;;  %v217_v13 = vld [vmem:[%s584_s0 + $0xd8] sm:$0xff]  ;;  %v57_v14 = vld [vmem:[%s584_s0] sm:$0xff] }
   0x8   :  { %216 = vst [vmem:[%s585_s1 + $0x90] sm:$0xff] %v215_v12  ;;  %218 = vst [vmem:[%s585_s1 + $0x150] sm:$0xff] %v217_v13  ;;  %v220_v15 = vld [vmem:[%s584_s0 + $0xc0] sm:$0xff]  ;;  %v222_v16 = vld [vmem:[%s584_s0 + $0xb0] sm:$0xff] }
   0x9   :  { %219 = vst [vmem:[%s585_s1 + $0xa8] sm:$0xff] %v57_v14  ;;  %v224_v17 = vld [vmem:[%s584_s0 + $0x170] sm:$0xff]  ;;  %221 = vst [vmem:[%s585_s1 + $0x168] sm:$0xff] %v220_v15  ;;  %v226_v18 = vld [vmem:[%s584_s0 + $0x98] sm:$0xff] }
   0xa   :  { %223 = vst [vmem:[%s585_s1 + $0x8] sm:$0xff] %v222_v16  ;;  %225 = vst [vmem:[%s585_s1 + $0xc8] sm:$0xff] %v224_v17  ;;  %v228_v19 = vld [vmem:[%s584_s0 + $0x158] sm:$0xff]  ;;  %v230_v20 = vld [vmem:[%s584_s0 + $0x80] sm:$0xff] }
   0xb   :  { %227 = vst [vmem:[%s585_s1 + $0x20] sm:$0xff] %v226_v18  ;;  %229 = vst [vmem:[%s585_s1 + $0xe0] sm:$0xff] %v228_v19  ;;  %v232_v21 = vld [vmem:[%s584_s0 + $0x140] sm:$0xff]  ;;  %v234_v22 = vld [vmem:[%s584_s0 + $0x68] sm:$0xff] }
   0xc   :  { %231 = vst [vmem:[%s585_s1 + $0x38] sm:$0xff] %v230_v20  ;;  %v236_v23 = vld [vmem:[%s584_s0 + $0x128] sm:$0xff]  ;;  %233 = vst [vmem:[%s585_s1 + $0xf8] sm:$0xff] %v232_v21  ;;  %v238_v24 = vld [vmem:[%s584_s0 + $0x50] sm:$0xff] }
   0xd   :  { %235 = vst [vmem:[%s585_s1 + $0x50] sm:$0xff] %v234_v22  ;;  %237 = vst [vmem:[%s585_s1 + $0x110] sm:$0xff] %v236_v23  ;;  %v240_v25 = vld [vmem:[%s584_s0 + $0x110] sm:$0xff]  ;;  %v242_v26 = vld [vmem:[%s584_s0 + $0x38] sm:$0xff] }
   0xe   :  { %239 = vst [vmem:[%s585_s1 + $0x68] sm:$0xff] %v238_v24  ;;  %241 = vst [vmem:[%s585_s1 + $0x128] sm:$0xff] %v240_v25  ;;  %v244_v27 = vld [vmem:[%s584_s0 + $0xf8] sm:$0xff]  ;;  %v246_v28 = vld [vmem:[%s584_s0 + $0x20] sm:$0xff] }
   0xf   :  { %243 = vst [vmem:[%s585_s1 + $0x80] sm:$0xff] %v242_v26  ;;  %v248_v29 = vld [vmem:[%s584_s0 + $0xe0] sm:$0xff]  ;;  %245 = vst [vmem:[%s585_s1 + $0x140] sm:$0xff] %v244_v27  ;;  %v250_v30 = vld [vmem:[%s584_s0 + $0x8] sm:$0xff] }
  0x10   :  { %247 = vst [vmem:[%s585_s1 + $0x98] sm:$0xff] %v246_v28  ;;  %249 = vst [vmem:[%s585_s1 + $0x158] sm:$0xff] %v248_v29  ;;  %v252_v31 = vld [vmem:[%s584_s0 + $0xc8] sm:$0xff]  ;;  %v254_v32 = vld [vmem:[%s584_s0 + $0xb8] sm:$0xff] }
  0x11   :  { %251 = vst [vmem:[%s585_s1 + $0xb0] sm:$0xff] %v250_v30  ;;  %253 = vst [vmem:[%s585_s1 + $0x170] sm:$0xff] %v252_v31  ;;  %v256_v33 = vld [vmem:[%s584_s0 + $0x178] sm:$0xff]  ;;  %v258_v34 = vld [vmem:[%s584_s0 + $0xa0] sm:$0xff] }
  0x12   :  { %255 = vst [vmem:[%s585_s1 + $0x10] sm:$0xff] %v254_v32  ;;  %v260_v35 = vld [vmem:[%s584_s0 + $0x160] sm:$0xff]  ;;  %257 = vst [vmem:[%s585_s1 + $0xd0] sm:$0xff] %v256_v33  ;;  %v262_v36 = vld [vmem:[%s584_s0 + $0x88] sm:$0xff] }
  0x13   :  { %259 = vst [vmem:[%s585_s1 + $0x28] sm:$0xff] %v258_v34  ;;  %261 = vst [vmem:[%s585_s1 + $0xe8] sm:$0xff] %v260_v35  ;;  %v264_v37 = vld [vmem:[%s584_s0 + $0x148] sm:$0xff]  ;;  %v266_v38 = vld [vmem:[%s584_s0 + $0x70] sm:$0xff] }
  0x14   :  { %263 = vst [vmem:[%s585_s1 + $0x40] sm:$0xff] %v262_v36  ;;  %265 = vst [vmem:[%s585_s1 + $0x100] sm:$0xff] %v264_v37  ;;  %v268_v39 = vld [vmem:[%s584_s0 + $0x130] sm:$0xff]  ;;  %v270_v40 = vld [vmem:[%s584_s0 + $0x58] sm:$0xff] }
  0x15   :  { %267 = vst [vmem:[%s585_s1 + $0x58] sm:$0xff] %v266_v38  ;;  %v272_v41 = vld [vmem:[%s584_s0 + $0x118] sm:$0xff]  ;;  %269 = vst [vmem:[%s585_s1 + $0x118] sm:$0xff] %v268_v39  ;;  %v274_v42 = vld [vmem:[%s584_s0 + $0x40] sm:$0xff] }
  0x16   :  { %271 = vst [vmem:[%s585_s1 + $0x70] sm:$0xff] %v270_v40  ;;  %273 = vst [vmem:[%s585_s1 + $0x130] sm:$0xff] %v272_v41  ;;  %v276_v43 = vld [vmem:[%s584_s0 + $0x100] sm:$0xff]  ;;  %v278_v44 = vld [vmem:[%s584_s0 + $0x28] sm:$0xff] }
  0x17   :  { %275 = vst [vmem:[%s585_s1 + $0x88] sm:$0xff] %v274_v42  ;;  %277 = vst [vmem:[%s585_s1 + $0x148] sm:$0xff] %v276_v43  ;;  %v280_v45 = vld [vmem:[%s584_s0 + $0xe8] sm:$0xff]  ;;  %v282_v46 = vld [vmem:[%s584_s0 + $0x10] sm:$0xff] }
  0x18   :  { %279 = vst [vmem:[%s585_s1 + $0xa0] sm:$0xff] %v278_v44  ;;  %v284_v47 = vld [vmem:[%s584_s0 + $0xd0] sm:$0xff]  ;;  %281 = vst [vmem:[%s585_s1 + $0x160] sm:$0xff] %v280_v45 }
  0x19   :  { %283 = vst [vmem:[%s585_s1 + $0xb8] sm:$0xff] %v282_v46  ;;  %285 = vst [vmem:[%s585_s1 + $0x178] sm:$0xff] %v284_v47 }

// kernel: fno2d_forward.12
= control target key start
LH: loop header
LB: loop body
LE: loop exit
PB: predicated region body
PF: predicated region fallthrough
CT: control target
= control target key end

     0   :  { %s1903_s15 = smov 0   ;;  %s2384_s0 = inlined_call_operand.vmem [shape: bf16[656,128], index: 0, kind: input, shape index: {}]   ;;  %s2385_s1 = inlined_call_operand.vmem [shape: bf16[128,128], index: 1, kind: input, shape index: {}]   ;;  %s2386_s2 = inlined_call_operand.vmem [shape: f32[1,128], index: 2, kind: input, shape index: {}]   ;;  %s2387_s3 = inlined_call_operand.vmem [shape: bf16[656,128], index: 3, kind: input, shape index: {}]   ;;  %s2388_s4 = inlined_call_operand.vmem [shape: bf16[656,128], index: 4, kind: output, shape index: {}]  }
   0x1 LB: > { %s1262_s16 = sadd.s32 4294967295, %s1874_s15   ;;  %p1266_p0 = scmp.ge.s32.totalorder %s1874_s15, 1  ;;  %s1874_s15 = sphi %s1903_s15, %s14_s15  }
   0x2   : > { %p174_p1 = scmp.lt.s32.totalorder %s1874_s15, 3 }
   0x4   : > { %p175_p2 = pnand %p1266_p0, %p174_p1 }
   0x5   : > { %v1757_v0 = vld [vmem:[%s2385_s1] sm:$0xff] (!%p175_p2)   ;;  %v1876_v1 = vmov (!%p175_p2), 0.0   ;;  %v1758_v2 = vld [vmem:[%s2385_s1 + $0x8] sm:$0xff] (!%p175_p2)   ;;  %s205_s21 = smul.u32 (!%p175_p2), 41, %s1262_s16  ;;  %vm1877_vm0 = vmmov (!%p175_p2), 0   ;;  %v1759_v3 = vld [vmem:[%s2385_s1 + $0x10] sm:$0xff] (!%p175_p2)  }
   0x6   : > { %178 = sbr.rel (%p175_p2) target bundleno = 356 (0x164), region = 36  ;;  %1631 = vmatprep.subr.bf16.mxu0 (!%p175_p2), %v1876_v1  ;;  %1731 = vmatprep.subr.bf16.mxu1 (!%p175_p2), %v1876_v1  ;;  %v1760_v4 = vld [vmem:[%s2385_s1 + $0x18] sm:$0xff] (!%p175_p2)   ;;  %v1761_v5 = vld [vmem:[%s2385_s1 + $0x20] sm:$0xff] (!%p175_p2)   ;;  %v1762_v6 = vld [vmem:[%s2385_s1 + $0x28] sm:$0xff] (!%p175_p2)  }
   0x7   : > { %1632 = vmatpush3.bf16.msra.mxu0 (!%p175_p2), %v1757_v0  ;;  %1739 = vmatpush3.bf16.msra.mxu1 (!%p175_p2), %v1757_v0  ;;  %p206_p3 = scmp.lt.s32.totalorder (!%p175_p2), %s205_s21, 81  ;;  %v1763_v7 = vld [vmem:[%s2385_s1 + $0x30] sm:$0xff] (!%p175_p2)   ;;  %v1764_v8 = vld [vmem:[%s2385_s1 + $0x38] sm:$0xff] (!%p175_p2)   ;;  %v2033_v32 = vld [vmem:[%s2386_s2] ss:$0 sm:$0xff] (!%p175_p2) }
   0x8   : > { %1633 = vmatprep.subr.bf16.mxu0 (!%p175_p2), %v1876_v1  ;;  %1732 = vmatprep.subr.bf16.mxu1 (!%p175_p2), %v1876_v1 }
   0x9   : > { %1647 = vmatprep.mubr.msk.bf16.mxu0 (!%p175_p2), %vm1877_vm0, %v1876_v1  ;;  %1691 = vmatprep.mubr.msk.bf16.mxu1 (!%p175_p2), %vm1877_vm0, %v1876_v1 }
   0xb   : > { %1634 = vmatpush3.bf16.msra.mxu0 (!%p175_p2), %v1758_v2  ;;  %1740 = vmatpush3.bf16.msra.mxu1 (!%p175_p2), %v1758_v2 }
   0xc   : > { %1635 = vmatprep.subr.bf16.mxu0 (!%p175_p2), %v1876_v1  ;;  %1733 = vmatprep.subr.bf16.mxu1 (!%p175_p2), %v1876_v1 }
   0xd   : > { %s2390_s21 = smov (!%p206_p3, %s205_s21), 81 }
   0xe   : > { %s1930_s24 = sshll.u32 %s2390_s21, 2 }
   0xf   : > { %s1936_s27 = scalar_lea.vmem %s2384_s0, %s1930_s24  ;;  %1636 = vmatpush3.bf16.msra.mxu0 %v1759_v3  ;;  %1741 = vmatpush3.bf16.msra.mxu1 %v1759_v3  ;;  %s2026_s14 = scalar_lea.vmem %s2387_s3, %s1930_s24 }
  0x10   : > { %1637 = vmatprep.subr.bf16.mxu0 %v1876_v1  ;;  %1734 = vmatprep.subr.bf16.mxu1 %v1876_v1  ;;  %v1765_v9 = vld [vmem:[%s1936_s27] sm:$0xff]   ;;  %v1766_v10 = vld [vmem:[%s1936_s27 + $0x58] sm:$0xff]   ;;  %v1767_v11 = vld [vmem:[%s1936_s27 + $0x8] sm:$0xff]   ;;  %s2139_s20 = scalar_lea.vmem %s2388_s4, %s1930_s24 }
  0x11   : > { %v1768_v12 = vld [vmem:[%s1936_s27 + $0x60] sm:$0xff]   ;;  %v1769_v13 = vld [vmem:[%s1936_s27 + $0x10] sm:$0xff]   ;;  %v1770_v14 = vld [vmem:[%s1936_s27 + $0x68] sm:$0xff]  }
  0x12   : > { %v1771_v15 = vld [vmem:[%s1936_s27 + $0x18] sm:$0xff]   ;;  %v1772_v16 = vld [vmem:[%s1936_s27 + $0x70] sm:$0xff]   ;;  %v1773_v17 = vld [vmem:[%s1936_s27 + $0x20] sm:$0xff]  }
  0x13   : > { %1638 = vmatpush3.bf16.msra.mxu0 %v1760_v4  ;;  %1742 = vmatpush3.bf16.msra.mxu1 %v1760_v4  ;;  %v1774_v18 = vld [vmem:[%s1936_s27 + $0x78] sm:$0xff]   ;;  %v1775_v19 = vld [vmem:[%s1936_s27 + $0x28] sm:$0xff]   ;;  %v1776_v20 = vld [vmem:[%s1936_s27 + $0x80] sm:$0xff]  }
  0x14   : > { %1639 = vmatprep.subr.bf16.mxu0 %v1876_v1  ;;  %1735 = vmatprep.subr.bf16.mxu1 %v1876_v1  ;;  %v1777_v21 = vld [vmem:[%s1936_s27 + $0x30] sm:$0xff]   ;;  %v1778_v22 = vld [vmem:[%s1936_s27 + $0x88] sm:$0xff]   ;;  %v1779_v23 = vld [vmem:[%s1936_s27 + $0x38] sm:$0xff]  }
  0x15   : > { %v1780_v24 = vld [vmem:[%s1936_s27 + $0x90] sm:$0xff]   ;;  %v1781_v25 = vld [vmem:[%s1936_s27 + $0x40] sm:$0xff]   ;;  %v1782_v26 = vld [vmem:[%s1936_s27 + $0x98] sm:$0xff]  }
  0x16   : > { %v1783_v27 = vld [vmem:[%s1936_s27 + $0x48] sm:$0xff]   ;;  %v1784_v28 = vld [vmem:[%s1936_s27 + $0xa0] ss:$0 sps:$4 sm:$0xff]   ;;  %v1785_v29 = vld [vmem:[%s1936_s27 + $0x50] sm:$0xff]  }
  0x17   : > { %1640 = vmatpush3.bf16.msra.mxu0 %v1761_v5  ;;  %1743 = vmatpush3.bf16.msra.mxu1 %v1761_v5  ;;  %v1385_v30 = vld [vmem:[%s2026_s14] sm:$0xff]   ;;  %v1574_v31 = vld [vmem:[%s2026_s14 + $0x58] sm:$0xff]   ;;  %v1564_v51 = vld [vmem:[%s2026_s14 + $0x8] sm:$0xff]  }
  0x18   : > { %1641 = vmatprep.subr.bf16.mxu0 %v1876_v1  ;;  %1736 = vmatprep.subr.bf16.mxu1 %v1876_v1  ;;  %v1386_v33 = vunpack.c.l.bf16 %v1385_v30  ;;  %v1430_v34 = vunpack.c.l.bf16 %v1574_v31  ;;  %v1387_v42 = vunpack.c.h.bf16 %v1385_v30  ;;  %v1431_v44 = vunpack.c.h.bf16 %v1574_v31  ;;  %v1575_v52 = vld [vmem:[%s2026_s14 + $0x60] sm:$0xff]   ;;  %v2052_v59 = vld [vmem:[%s2026_s14 + $0x10] sm:$0xff]   ;;  %v2055_v60 = vld [vmem:[%s2026_s14 + $0x68] sm:$0xff]  }
  0x19   : > { %v1390_v57 = vunpack.c.l.bf16 %v1564_v51  ;;  %v1434_v58 = vunpack.c.l.bf16 %v1575_v52  ;;  %v1391_v5 = vunpack.c.h.bf16 %v1564_v51 }
  0x1b   : > { %1642 = vmatpush3.bf16.msra.mxu0 %v1762_v6  ;;  %1744 = vmatpush3.bf16.msra.mxu1 %v1762_v6  ;;  %v2062_v6 = vld [vmem:[%s2026_s14 + $0x18] sm:$0xff]  }
  0x1c   : > { %1643 = vmatprep.subr.bf16.mxu0 %v1876_v1  ;;  %1737 = vmatprep.subr.bf16.mxu1 %v1876_v1 }
  0x1f   : > { %1644 = vmatpush3.bf16.msra.mxu0 %v1763_v7  ;;  %1745 = vmatpush3.bf16.msra.mxu1 %v1763_v7 }
  0x20   : > { %1645 = vmatprep.subr.bf16.mxu0 %v1876_v1  ;;  %1738 = vmatprep.subr.bf16.mxu1 %v1876_v1 }
  0x23   : > { %1646 = vmatpush3.bf16.msra.mxu0 %v1764_v8  ;;  %1746 = vmatpush3.bf16.msra.mxu1 %v1764_v8 }
  0x26   : > { %1648 = vmatmul.mubr.bf16.vlgmr.msra.gmra.mrb[0].mxu0 %v1765_v9  ;;  %1692 = vmatmul.mubr.bf16.vlgmr.msra.gmra.mrb[0].mxu1 %v1766_v10  ;;  %v1435_v9 = vunpack.c.h.bf16 %v1575_v52  ;;  %v1394_v10 = vunpack.c.l.bf16 %v2052_v59 }
  0x27   : > { %1651 = vmatprep.mubr.msk.bf16.mxu0 %vm1877_vm0, %v1876_v1  ;;  %1695 = vmatprep.mubr.msk.bf16.mxu1 %vm1877_vm0, %v1876_v1 }
  0x2e   : > { %1652 = vmatmul.mubr.bf16.gmra.mrb[4].mxu0 %v1767_v11  ;;  %1696 = vmatmul.mubr.bf16.gmra.mrb[4].mxu1 %v1768_v12  ;;  %v1438_v11 = vunpack.c.l.bf16 %v2055_v60  ;;  %v2067_v12 = vld [vmem:[%s2026_s14 + $0x70] sm:$0xff]  }
  0x2f   : > { %1655 = vmatprep.mubr.msk.bf16.mxu0 %vm1877_vm0, %v1876_v1  ;;  %1699 = vmatprep.mubr.msk.bf16.mxu1 %vm1877_vm0, %v1876_v1 }
  0x36   : > { %1656 = vmatmul.mubr.bf16.gmra.mrb[8].mxu0 %v1769_v13  ;;  %1700 = vmatmul.mubr.bf16.gmra.mrb[8].mxu1 %v1770_v14 }
  0x37   : > { %1659 = vmatprep.mubr.msk.bf16.mxu0 %vm1877_vm0, %v1876_v1  ;;  %1703 = vmatprep.mubr.msk.bf16.mxu1 %vm1877_vm0, %v1876_v1 }
  0x3e   : > { %1660 = vmatmul.mubr.bf16.gmra.mrb[12].mxu0 %v1771_v15  ;;  %1704 = vmatmul.mubr.bf16.gmra.mrb[12].mxu1 %v1772_v16 }
  0x3f   : > { %1663 = vmatprep.mubr.msk.bf16.mxu0 %vm1877_vm0, %v1876_v1  ;;  %1707 = vmatprep.mubr.msk.bf16.mxu1 %vm1877_vm0, %v1876_v1 }
  0x46   : > { %1664 = vmatmul.mubr.bf16.gmra.mrb[16].mxu0 %v1773_v17  ;;  %1708 = vmatmul.mubr.bf16.gmra.mrb[16].mxu1 %v1774_v18  ;;  %v2075_v18 = vld [vmem:[%s2026_s14 + $0x20] sm:$0xff]  }
  0x47   : > { %1667 = vmatprep.mubr.msk.bf16.mxu0 %vm1877_vm0, %v1876_v1  ;;  %1711 = vmatprep.mubr.msk.bf16.mxu1 %vm1877_vm0, %v1876_v1 }
  0x4e   : > { %1668 = vmatmul.mubr.bf16.gmra.mrb[20].mxu0 %v1775_v19  ;;  %1712 = vmatmul.mubr.bf16.gmra.mrb[20].mxu1 %v1776_v20  ;;  %v1395_v20 = vunpack.c.h.bf16 %v2052_v59 }
  0x4f   : > { %1671 = vmatprep.mubr.msk.bf16.mxu0 %vm1877_vm0, %v1876_v1  ;;  %1715 = vmatprep.mubr.msk.bf16.mxu1 %vm1877_vm0, %v1876_v1 }
  0x56   : > { %1672 = vmatmul.mubr.bf16.gmra.mrb[24].mxu0 %v1777_v21  ;;  %1716 = vmatmul.mubr.bf16.gmra.mrb[24].mxu1 %v1778_v22  ;;  %v1439_v21 = vunpack.c.h.bf16 %v2055_v60  ;;  %v1398_v22 = vunpack.c.l.bf16 %v2062_v6 }
  0x57   : > { %1675 = vmatprep.mubr.msk.bf16.mxu0 %vm1877_vm0, %v1876_v1  ;;  %1719 = vmatprep.mubr.msk.bf16.mxu1 %vm1877_vm0, %v1876_v1 }
  0x5e   : > { %1676 = vmatmul.mubr.bf16.gmra.mrb[28].mxu0 %v1779_v23  ;;  %1720 = vmatmul.mubr.bf16.gmra.mrb[28].mxu1 %v1780_v24  ;;  %v2082_v23 = vld [vmem:[%s2026_s14 + $0x78] sm:$0xff]  }
  0x5f   : > { %1679 = vmatprep.mubr.msk.bf16.mxu0 %vm1877_vm0, %v1876_v1  ;;  %1723 = vmatprep.mubr.msk.bf16.mxu1 %vm1877_vm0, %v1876_v1 }
  0x66   : > { %1680 = vmatmul.mubr.bf16.gmra.mrb[32].mxu0 %v1781_v25  ;;  %1724 = vmatmul.mubr.bf16.gmra.mrb[32].mxu1 %v1782_v26  ;;  %v1442_v26 = vunpack.c.l.bf16 %v2067_v12 }
  0x67   : > { %1683 = vmatprep.mubr.msk.bf16.mxu0 %vm1877_vm0, %v1876_v1  ;;  %1727 = vmatprep.mubr.msk.bf16.mxu1 %vm1877_vm0, %v1876_v1 }
  0x6e   : > { %1684 = vmatmul.mubr.bf16.gmra.mrb[36].mxu0 %v1783_v27  ;;  %1728 = vmatmul.mubr.bf16.gmra.mrb[36].mxu1 %v1784_v28  ;;  %v1399_v27 = vunpack.c.h.bf16 %v2062_v6  ;;  %v2089_v28 = vld [vmem:[%s2026_s14 + $0x28] sm:$0xff]  }
  0x6f   : > { %1687 = vmatprep.mubr.msk.bf16.mxu0 %vm1877_vm0, %v1876_v1 }
  0x76   : > { %1688 = vmatmul.mubr.bf16.gmra.mrb[40].mxu0 %v1785_v29  ;;  %v2092_v29 = vld [vmem:[%s2026_s14 + $0x80] sm:$0xff]  }
  0x77   : > { %v1451_v59 = vunpack.c.h.bf16 %v2092_v29 }
  0xf9   : > { %v494_v35 = vpop.f32.mrb[0].mxu0  ;;  %v582_v36 = vpop.f32.mrb[0].mxu1 }
  0xfa   : > { %v495_v37 = vadd.f32 %v2033_v32, %v494_v35  ;;  %v583_v38 = vadd.f32 %v2033_v32, %v582_v36  ;;  %v1649_v39 = vpop.f32.mrb[1].mxu0  ;;  %v1693_v40 = vpop.f32.mrb[1].mxu1  ;;  %v1446_v35 = vunpack.c.l.bf16 %v2082_v23  ;;  %v1403_v36 = vunpack.c.h.bf16 %v2075_v18 }
  0xfb   : > { %v497_v41 = vpop.f32.mrb[2].mxu0  ;;  %v585_v43 = vpop.f32.mrb[2].mxu1  ;;  %v2107_v39 = vld [vmem:[%s2026_s14 + $0x88] sm:$0xff]  }
  0xfc   : > { %v2037_v45 = vadd.f32 %v1386_v33, %v495_v37  ;;  %v2039_v46 = vadd.f32 %v1430_v34, %v583_v38  ;;  %v498_v47 = vadd.f32 %v2033_v32, %v497_v41  ;;  %v586_v48 = vadd.f32 %v2033_v32, %v585_v43  ;;  %v1650_v49 = vpop.f32.mrb[3].mxu0  ;;  %v1694_v50 = vpop.f32.mrb[3].mxu1  ;;  %v2104_v38 = vld [vmem:[%s2026_s14 + $0x30] sm:$0xff]  }
  0xfd   : > { %v1443_v33 = vunpack.c.h.bf16 %v2067_v12  ;;  %v1402_v34 = vunpack.c.l.bf16 %v2075_v18  ;;  %v1447_v37 = vunpack.c.h.bf16 %v2082_v23  ;;  %v1406_v43 = vunpack.c.l.bf16 %v2089_v28 }
  0xfe   : > { %v824_v53 = vmul.f32 0.70710677, %v2037_v45  ;;  %v846_v54 = vmul.f32 0.70710677, %v2039_v46  ;;  %v2047_v55 = vadd.f32 %v1387_v42, %v498_v47  ;;  %v2049_v56 = vadd.f32 %v1431_v44, %v586_v48 }
  0xff   : > { %v1450_v44 = vunpack.c.l.bf16 %v2092_v29  ;;  %v1410_v60 = vunpack.c.l.bf16 %v2104_v38 }
 0x100   : > { %1786 = verf.f32 %v824_v53  ;;  %v825_v61 = vmul.f32 0.70710677, %v2047_v55  ;;  %v847_v0 = vmul.f32 0.70710677, %v2049_v56  ;;  %v1407_v53 = vunpack.c.h.bf16 %v2089_v28 }
 0x101   : > { %1788 = verf.f32 %v846_v54  ;;  %v502_v62 = vpop.f32.mrb[4].mxu0  ;;  %v590_v63 = vpop.f32.mrb[4].mxu1 }
 0x102   : > { %v503_v1 = vadd.f32 %v2033_v32, %v502_v62  ;;  %v591_v2 = vadd.f32 %v2033_v32, %v590_v63  ;;  %v1653_v3 = vpop.f32.mrb[5].mxu0  ;;  %v1697_v4 = vpop.f32.mrb[5].mxu1  ;;  %1790 = verf.f32 %v825_v61  ;;  %v1454_v61 = vunpack.c.l.bf16 %v2107_v39 }
 0x103   : > { %v505_v7 = vpop.f32.mrb[6].mxu0  ;;  %v593_v8 = vpop.f32.mrb[6].mxu1  ;;  %1792 = verf.f32 %v847_v0  ;;  %v783_v4 = vmul.f32 0.5, %v2037_v45 }
 0x104   : > { %v2069_v13 = vadd.f32 %v1390_v57, %v503_v1  ;;  %v2071_v14 = vadd.f32 %v1434_v58, %v591_v2  ;;  %v506_v15 = vadd.f32 %v2033_v32, %v505_v7  ;;  %v1654_v16 = vpop.f32.mrb[7].mxu0  ;;  %v1698_v17 = vpop.f32.mrb[7].mxu1  ;;  %v594_v19 = vadd.f32 %v2033_v32, %v593_v8 }
 0x105   : > { %v784_v16 = vmul.f32 0.5, %v2047_v55  ;;  %v806_v17 = vmul.f32 0.5, %v2049_v56 }
 0x106   : > { %v826_v24 = vmul.f32 0.70710677, %v2069_v13  ;;  %v848_v25 = vmul.f32 0.70710677, %v2071_v14  ;;  %v2094_v30 = vadd.f32 %v1391_v5, %v506_v15  ;;  %v2096_v31 = vadd.f32 %v1435_v9, %v594_v19 }
 0x107   : > { %v805_v15 = vmul.f32 0.5, %v2039_v46 }
 0x108   : > { %1794 = verf.f32 %v826_v24  ;;  %v827_v40 = vmul.f32 0.70710677, %v2094_v30  ;;  %v849_v48 = vmul.f32 0.70710677, %v2096_v31 }
 0x109   : > { %1796 = verf.f32 %v848_v25  ;;  %v510_v41 = vpop.f32.mrb[8].mxu0  ;;  %v598_v42 = vpop.f32.mrb[8].mxu1 }
 0x10a   : > { %v1787_v47 = vpop.eup %1786  ;;  %v511_v49 = vadd.f32 %v2033_v32, %v510_v41  ;;  %v599_v50 = vadd.f32 %v2033_v32, %v598_v42  ;;  %v1657_v51 = vpop.f32.mrb[9].mxu0  ;;  %1798 = verf.f32 %v827_v40 }
 0x10b   : > { %v1701_v52 = vpop.f32.mrb[9].mxu1  ;;  %v1789_v54 = vpop.eup %1788  ;;  %v906_v62 = vadd.f32 1.0, %v1787_v47  ;;  %1800 = verf.f32 %v849_v48 }
 0x10c   : > { %v513_v57 = vpop.f32.mrb[10].mxu0  ;;  %v601_v58 = vpop.f32.mrb[10].mxu1  ;;  %v2119_v63 = vadd.f32 %v1394_v10, %v511_v49  ;;  %v2121_v0 = vadd.f32 %v1438_v11, %v599_v50  ;;  %v928_v5 = vadd.f32 1.0, %v1789_v54  ;;  %v1411_v52 = vunpack.c.h.bf16 %v2104_v38 }
 0x10d   : > { %v1658_v1 = vpop.f32.mrb[11].mxu0  ;;  %v1702_v2 = vpop.f32.mrb[11].mxu1  ;;  %v514_v7 = vadd.f32 %v2033_v32, %v513_v57  ;;  %v602_v8 = vadd.f32 %v2033_v32, %v601_v58  ;;  %v947_v25 = vmul.f32 %v906_v62, %v783_v4 }
 0x10e   : > { %v1791_v3 = vpop.eup %1790  ;;  %v828_v11 = vmul.f32 0.70710677, %v2119_v63  ;;  %v850_v24 = vmul.f32 0.70710677, %v2121_v0  ;;  %v969_v42 = vmul.f32 %v928_v5, %v805_v15  ;;  %v1455_v2 = vunpack.c.h.bf16 %v2107_v39 }
 0x10f   : > { %v1793_v9 = vpop.eup %1792  ;;  %v907_v10 = vadd.f32 1.0, %v1791_v3  ;;  %v2131_v45 = vadd.f32 %v1395_v20, %v514_v7  ;;  %v2133_v41 = vadd.f32 %v1439_v21, %v602_v8  ;;  %v785_v15 = vmul.f32 0.5, %v2069_v13 }
 0x110   : > { %v929_v19 = vadd.f32 1.0, %v1793_v9  ;;  %1802 = verf.f32 %v828_v11 }
 0x111   : > { %v948_v40 = vmul.f32 %v907_v10, %v784_v16  ;;  %1804 = verf.f32 %v850_v24  ;;  %v829_v55 = vmul.f32 0.70710677, %v2131_v45  ;;  %v518_v56 = vpop.f32.mrb[12].mxu0  ;;  %v606_v47 = vpop.f32.mrb[12].mxu1  ;;  %v851_v49 = vmul.f32 0.70710677, %v2133_v41 }
 0x112   : > { %v970_v46 = vmul.f32 %v929_v19, %v806_v17  ;;  %v1795_v20 = vpop.eup %1794  ;;  %v519_v21 = vadd.f32 %v2033_v32, %v518_v56  ;;  %v1661_v50 = vpop.f32.mrb[13].mxu0  ;;  %v607_v58 = vadd.f32 %v2033_v32, %v606_v47  ;;  %v786_v19 = vmul.f32 0.5, %v2094_v30  ;;  %v2177_v30 = vld [vmem:[%s2026_s14 + $0x90] sm:$0xff]  }
 0x113   : > { %v1467_v48 = vpack.c.bf16 %v948_v40, %v947_v25  ;;  %v1705_v51 = vpop.f32.mrb[13].mxu1  ;;  %v1797_v54 = vpop.eup %1796  ;;  %1806 = verf.f32 %v829_v55  ;;  %v908_v3 = vadd.f32 1.0, %v1795_v20  ;;  %v808_v40 = vmul.f32 0.5, %v2096_v31 }
 0x114   : > { %v1522_v57 = vpack.c.bf16 %v970_v46, %v969_v42  ;;  %v521_v62 = vpop.f32.mrb[14].mxu0  ;;  %v609_v1 = vpop.f32.mrb[14].mxu1  ;;  %1808 = verf.f32 %v851_v49  ;;  %v2150_v4 = vadd.f32 %v1398_v22, %v519_v21  ;;  %v930_v16 = vadd.f32 1.0, %v1797_v54  ;;  %v2170_v46 = vld [vmem:[%s2026_s14 + $0x38] sm:$0xff]  }
 0x115   : > { %1468 = vst [vmem:[%s2139_s20] sm:$0xff] %v1467_v48   ;;  %v522_v5 = vadd.f32 %v2033_v32, %v521_v62  ;;  %v1662_v7 = vpop.f32.mrb[15].mxu0  ;;  %v1706_v8 = vpop.f32.mrb[15].mxu1  ;;  %v2157_v10 = vadd.f32 %v1442_v26, %v607_v58  ;;  %v610_v11 = vadd.f32 %v2033_v32, %v609_v1  ;;  %v807_v22 = vmul.f32 0.5, %v2071_v14 }
 0x116   : > { %v1799_v9 = vpop.eup %1798  ;;  %1593 = vst [vmem:[%s2139_s20 + $0x58] sm:$0xff] %v1522_v57   ;;  %v830_v25 = vmul.f32 0.70710677, %v2150_v4  ;;  %v949_v55 = vmul.f32 %v908_v3, %v785_v15  ;;  %v1458_v3 = vunpack.c.l.bf16 %v2177_v30  ;;  %v1415_v23 = vunpack.c.h.bf16 %v2170_v46 }
 0x117   : > { %v1801_v17 = vpop.eup %1800  ;;  %v909_v24 = vadd.f32 1.0, %v1799_v9  ;;  %v852_v13 = vmul.f32 0.70710677, %v2157_v10  ;;  %v2167_v26 = vadd.f32 %v1399_v27, %v522_v5  ;;  %v2174_v14 = vadd.f32 %v1443_v33, %v610_v11 }
 0x118   : > { %v931_v42 = vadd.f32 1.0, %v1801_v17  ;;  %1810 = verf.f32 %v830_v25  ;;  %v971_v47 = vmul.f32 %v930_v16, %v807_v22  ;;  %v1414_v33 = vunpack.c.l.bf16 %v2170_v46 }
 0x119   : > { %v950_v56 = vmul.f32 %v909_v24, %v786_v19  ;;  %1812 = verf.f32 %v852_v13  ;;  %v831_v20 = vmul.f32 0.70710677, %v2167_v26  ;;  %v526_v48 = vpop.f32.mrb[16].mxu0  ;;  %v614_v6 = vpop.f32.mrb[16].mxu1  ;;  %v853_v21 = vmul.f32 0.70710677, %v2174_v14 }
 0x11a   : > { %v972_v31 = vmul.f32 %v931_v42, %v808_v40  ;;  %v1803_v27 = vpop.eup %1802  ;;  %v527_v50 = vadd.f32 %v2033_v32, %v526_v48  ;;  %v1665_v51 = vpop.f32.mrb[17].mxu0  ;;  %v615_v58 = vadd.f32 %v2033_v32, %v614_v6  ;;  %v787_v11 = vmul.f32 0.5, %v2119_v63 }
 0x11b   : > { %v1472_v49 = vpack.c.bf16 %v950_v56, %v949_v55  ;;  %v1709_v12 = vpop.f32.mrb[17].mxu1  ;;  %v1805_v54 = vpop.eup %1804  ;;  %1814 = verf.f32 %v831_v20  ;;  %v910_v5 = vadd.f32 1.0, %v1803_v27  ;;  %v809_v25 = vmul.f32 0.5, %v2121_v0 }
 0x11c   : > { %v1527_v57 = vpack.c.bf16 %v972_v31, %v971_v47  ;;  %v529_v62 = vpop.f32.mrb[18].mxu0  ;;  %v617_v1 = vpop.f32.mrb[18].mxu1  ;;  %1816 = verf.f32 %v853_v21  ;;  %v2188_v7 = vadd.f32 %v1402_v34, %v527_v50  ;;  %v932_v17 = vadd.f32 1.0, %v1805_v54 }
 0x11d   : > { %1583 = vst [vmem:[%s2139_s20 + $0x8] sm:$0xff] %v1472_v49   ;;  %v530_v8 = vadd.f32 %v2033_v32, %v529_v62  ;;  %v1666_v9 = vpop.f32.mrb[19].mxu0  ;;  %v1710_v15 = vpop.f32.mrb[19].mxu1  ;;  %v2195_v22 = vadd.f32 %v1446_v35, %v615_v58  ;;  %v618_v19 = vadd.f32 %v2033_v32, %v617_v1  ;;  %v788_v34 = vmul.f32 0.5, %v2131_v45 }
 0x11e   : > { %v1807_v16 = vpop.eup %1806  ;;  %1594 = vst [vmem:[%s2139_s20 + $0x60] sm:$0xff] %v1527_v57   ;;  %v832_v42 = vmul.f32 0.70710677, %v2188_v7  ;;  %v810_v13 = vmul.f32 0.5, %v2133_v41  ;;  %v951_v35 = vmul.f32 %v910_v5, %v787_v11  ;;  %v973_v45 = vmul.f32 %v932_v17, %v809_v25 }
 0x11f   : > { %v1809_v24 = vpop.eup %1808  ;;  %v911_v40 = vadd.f32 1.0, %v1807_v16  ;;  %v854_v63 = vmul.f32 0.70710677, %v2195_v22  ;;  %v2205_v56 = vadd.f32 %v1403_v36, %v530_v8  ;;  %v2209_v0 = vadd.f32 %v1447_v37, %v618_v19 }
 0x120   : > { %v933_v55 = vadd.f32 1.0, %v1809_v24  ;;  %1818 = verf.f32 %v832_v42  ;;  %v1459_v57 = vunpack.c.h.bf16 %v2177_v30  ;;  %v789_v15 = vmul.f32 0.5, %v2150_v4 }
 0x121   : > { %v952_v47 = vmul.f32 %v911_v40, %v788_v34  ;;  %1820 = verf.f32 %v854_v63  ;;  %v833_v20 = vmul.f32 0.70710677, %v2205_v56  ;;  %v534_v41 = vpop.f32.mrb[20].mxu0  ;;  %v622_v48 = vpop.f32.mrb[20].mxu1  ;;  %v855_v18 = vmul.f32 0.70710677, %v2209_v0 }
 0x122   : > { %v974_v31 = vmul.f32 %v933_v55, %v810_v13  ;;  %v1811_v6 = vpop.eup %1810  ;;  %v535_v36 = vadd.f32 %v2033_v32, %v534_v41  ;;  %v1669_v49 = vpop.f32.mrb[21].mxu0  ;;  %v623_v51 = vadd.f32 %v2033_v32, %v622_v48  ;;  %v790_v24 = vmul.f32 0.5, %v2167_v26  ;;  %v2240_v13 = vld [vmem:[%s2026_s14 + $0x40] sm:$0xff]   ;;  %v2247_v26 = vld [vmem:[%s2026_s14 + $0x98] sm:$0xff]  }
 0x123   : > { %v1477_v27 = vpack.c.bf16 %v952_v47, %v951_v35  ;;  %v1713_v21 = vpop.f32.mrb[21].mxu1  ;;  %v1813_v37 = vpop.eup %1812  ;;  %1822 = verf.f32 %v833_v20  ;;  %v912_v58 = vadd.f32 1.0, %v1811_v6  ;;  %v812_v40 = vmul.f32 0.5, %v2174_v14 }
 0x124   : > { %v1532_v50 = vpack.c.bf16 %v974_v31, %v973_v45  ;;  %v537_v12 = vpop.f32.mrb[22].mxu0  ;;  %v625_v54 = vpop.f32.mrb[22].mxu1  ;;  %1824 = verf.f32 %v855_v18  ;;  %v2220_v62 = vadd.f32 %v1406_v43, %v535_v36  ;;  %v934_v16 = vadd.f32 1.0, %v1813_v37 }
 0x125   : > { %1584 = vst [vmem:[%s2139_s20 + $0x10] sm:$0xff] %v1477_v27   ;;  %v538_v1 = vadd.f32 %v2033_v32, %v537_v12  ;;  %v1670_v5 = vpop.f32.mrb[23].mxu0  ;;  %v1714_v8 = vpop.f32.mrb[23].mxu1  ;;  %v2227_v11 = vadd.f32 %v1450_v44, %v623_v51  ;;  %v626_v17 = vadd.f32 %v2033_v32, %v625_v54  ;;  %v811_v43 = vmul.f32 0.5, %v2157_v10 }
 0x126   : > { %v1815_v9 = vpop.eup %1814  ;;  %1595 = vst [vmem:[%s2139_s20 + $0x68] sm:$0xff] %v1532_v50   ;;  %v834_v34 = vmul.f32 0.70710677, %v2220_v62  ;;  %v953_v55 = vmul.f32 %v912_v58, %v789_v15  ;;  %v1462_v21 = vunpack.c.l.bf16 %v2247_v26  ;;  %v1419_v39 = vunpack.c.h.bf16 %v2240_v13 }
 0x127   : > { %v1817_v19 = vpop.eup %1816  ;;  %v913_v25 = vadd.f32 1.0, %v1815_v9  ;;  %v856_v4 = vmul.f32 0.70710677, %v2227_v11  ;;  %v2237_v44 = vadd.f32 %v1407_v53, %v538_v1  ;;  %v2244_v10 = vadd.f32 %v1451_v59, %v626_v17 }
 0x128   : > { %v935_v42 = vadd.f32 1.0, %v1817_v19  ;;  %1826 = verf.f32 %v834_v34  ;;  %v975_v35 = vmul.f32 %v934_v16, %v811_v43  ;;  %v1418_v59 = vunpack.c.l.bf16 %v2240_v13 }
 0x129   : > { %v954_v63 = vmul.f32 %v913_v25, %v790_v24  ;;  %1828 = verf.f32 %v856_v4  ;;  %v835_v47 = vmul.f32 0.70710677, %v2237_v44  ;;  %v542_v45 = vpop.f32.mrb[24].mxu0  ;;  %v630_v28 = vpop.f32.mrb[24].mxu1  ;;  %v857_v20 = vmul.f32 0.70710677, %v2244_v10 }
 0x12a   : > { %v976_v14 = vmul.f32 %v935_v42, %v812_v40  ;;  %v1819_v53 = vpop.eup %1818  ;;  %v543_v41 = vadd.f32 %v2033_v32, %v542_v45  ;;  %v1673_v48 = vpop.f32.mrb[25].mxu0  ;;  %v631_v18 = vadd.f32 %v2033_v32, %v630_v28  ;;  %v791_v1 = vmul.f32 0.5, %v2188_v7 }
 0x12b   : > { %v1482_v31 = vpack.c.bf16 %v954_v63, %v953_v55  ;;  %v1717_v29 = vpop.f32.mrb[25].mxu1  ;;  %v1821_v6 = vpop.eup %1820  ;;  %1830 = verf.f32 %v835_v47  ;;  %v914_v37 = vadd.f32 1.0, %v1819_v53  ;;  %v813_v16 = vmul.f32 0.5, %v2195_v22 }
 0x12c   : > { %v1537_v27 = vpack.c.bf16 %v976_v14, %v975_v35  ;;  %v545_v36 = vpop.f32.mrb[26].mxu0  ;;  %v633_v49 = vpop.f32.mrb[26].mxu1  ;;  %1832 = verf.f32 %v857_v20  ;;  %v2258_v50 = vadd.f32 %v1410_v60, %v543_v41  ;;  %v936_v5 = vadd.f32 1.0, %v1821_v6 }
 0x12d   : > { %1585 = vst [vmem:[%s2139_s20 + $0x18] sm:$0xff] %v1482_v31   ;;  %v546_v51 = vadd.f32 %v2033_v32, %v545_v36  ;;  %v1674_v12 = vpop.f32.mrb[27].mxu0  ;;  %v1718_v54 = vpop.f32.mrb[27].mxu1  ;;  %v2265_v8 = vadd.f32 %v1454_v61, %v631_v18  ;;  %v634_v9 = vadd.f32 %v2033_v32, %v633_v49  ;;  %v792_v60 = vmul.f32 0.5, %v2205_v56 }
 0x12e   : > { %v1823_v58 = vpop.eup %1822  ;;  %1596 = vst [vmem:[%s2139_s20 + $0x70] sm:$0xff] %v1537_v27   ;;  %v836_v19 = vmul.f32 0.70710677, %v2258_v50  ;;  %v814_v43 = vmul.f32 0.5, %v2209_v0  ;;  %v955_v61 = vmul.f32 %v914_v37, %v791_v1  ;;  %v977_v56 = vmul.f32 %v936_v5, %v813_v16 }
 0x12f   : > { %v1825_v15 = vpop.eup %1824  ;;  %v915_v17 = vadd.f32 1.0, %v1823_v58  ;;  %v858_v7 = vmul.f32 0.70710677, %v2265_v8  ;;  %v2275_v25 = vadd.f32 %v1411_v52, %v546_v51  ;;  %v2279_v22 = vadd.f32 %v1455_v2, %v634_v9  ;;  %v2310_v9 = vld [vmem:[%s2026_s14 + $0x48] sm:$0xff]  }
 0x130   : > { %v937_v24 = vadd.f32 1.0, %v1825_v15  ;;  %1834 = verf.f32 %v836_v19  ;;  %v1463_v31 = vunpack.c.h.bf16 %v2247_v26  ;;  %v793_v18 = vmul.f32 0.5, %v2220_v62 }
 0x131   : > { %v956_v34 = vmul.f32 %v915_v17, %v792_v60  ;;  %1836 = verf.f32 %v858_v7  ;;  %v837_v42 = vmul.f32 0.70710677, %v2275_v25  ;;  %v550_v0 = vpop.f32.mrb[28].mxu0  ;;  %v638_v4 = vpop.f32.mrb[28].mxu1  ;;  %v859_v38 = vmul.f32 0.70710677, %v2279_v22 }
 0x132   : > { %v978_v40 = vmul.f32 %v937_v24, %v814_v43  ;;  %v1827_v55 = vpop.eup %1826  ;;  %v551_v52 = vadd.f32 %v2033_v32, %v550_v0  ;;  %v1677_v35 = vpop.f32.mrb[29].mxu0  ;;  %v639_v45 = vadd.f32 %v2033_v32, %v638_v4  ;;  %v794_v12 = vmul.f32 0.5, %v2237_v44  ;;  %v2317_v44 = vld [vmem:[%s2026_s14 + $0xa0] sm:$0xf] }
 0x133   : > { %v1487_v63 = vpack.c.bf16 %v956_v34, %v955_v61  ;;  %v1721_v14 = vpop.f32.mrb[29].mxu1  ;;  %v1829_v2 = vpop.eup %1828  ;;  %1838 = verf.f32 %v837_v42  ;;  %v916_v20 = vadd.f32 1.0, %v1827_v55  ;;  %v816_v1 = vmul.f32 0.5, %v2244_v10 }
 0x134   : > { %v1542_v47 = vpack.c.bf16 %v978_v40, %v977_v56  ;;  %v553_v28 = vpop.f32.mrb[30].mxu0  ;;  %v641_v53 = vpop.f32.mrb[30].mxu1  ;;  %1840 = verf.f32 %v859_v38  ;;  %v2290_v41 = vadd.f32 %v1414_v33, %v551_v52  ;;  %v938_v36 = vadd.f32 1.0, %v1829_v2 }
 0x135   : > { %1586 = vst [vmem:[%s2139_s20 + $0x20] sm:$0xff] %v1487_v63   ;;  %v554_v48 = vadd.f32 %v2033_v32, %v553_v28  ;;  %v1678_v29 = vpop.f32.mrb[31].mxu0  ;;  %v1722_v6 = vpop.f32.mrb[31].mxu1  ;;  %v2297_v49 = vadd.f32 %v1458_v3, %v639_v45  ;;  %v642_v37 = vadd.f32 %v2033_v32, %v641_v53  ;;  %v815_v33 = vmul.f32 0.5, %v2227_v11 }
 0x136   : > { %v1831_v27 = vpop.eup %1830  ;;  %1597 = vst [vmem:[%s2139_s20 + $0x78] sm:$0xff] %v1542_v47   ;;  %v838_v58 = vmul.f32 0.70710677, %v2290_v41  ;;  %v957_v15 = vmul.f32 %v916_v20, %v793_v18  ;;  %v741_v4 = vunpack.c.l.bf16 %v2317_v44  ;;  %v795_v2 = vmul.f32 0.5, %v2258_v50 }
 0x137   : > { %v1833_v51 = vpop.eup %1832  ;;  %v917_v54 = vadd.f32 1.0, %v1831_v27  ;;  %v860_v62 = vmul.f32 0.70710677, %v2297_v49  ;;  %v2307_v3 = vadd.f32 %v1415_v23, %v554_v48  ;;  %v2314_v11 = vadd.f32 %v1459_v57, %v642_v37 }
 0x138   : > { %v939_v5 = vadd.f32 1.0, %v1833_v51  ;;  %1842 = verf.f32 %v838_v58  ;;  %v979_v60 = vmul.f32 %v938_v36, %v815_v33  ;;  %v1422_v57 = vunpack.c.l.bf16 %v2310_v9 }
 0x139   : > { %v958_v16 = vmul.f32 %v917_v54, %v794_v12  ;;  %1844 = verf.f32 %v860_v62  ;;  %v839_v17 = vmul.f32 0.70710677, %v2307_v3  ;;  %v558_v19 = vpop.f32.mrb[32].mxu0  ;;  %v646_v46 = vpop.f32.mrb[32].mxu1  ;;  %v861_v24 = vmul.f32 0.70710677, %v2314_v11 }
 0x13a   : > { %v980_v10 = vmul.f32 %v939_v5, %v816_v1  ;;  %v1835_v23 = vpop.eup %1834  ;;  %v559_v7 = vadd.f32 %v2033_v32, %v558_v19  ;;  %v1681_v61 = vpop.f32.mrb[33].mxu0  ;;  %v647_v40 = vadd.f32 %v2033_v32, %v646_v46  ;;  %v817_v20 = vmul.f32 0.5, %v2265_v8 }
 0x13b   : > { %v1492_v43 = vpack.c.bf16 %v958_v16, %v957_v15  ;;  %v1725_v30 = vpop.f32.mrb[33].mxu1  ;;  %v1837_v34 = vpop.eup %1836  ;;  %1846 = verf.f32 %v839_v17  ;;  %v918_v55 = vadd.f32 1.0, %v1835_v23  ;;  %v818_v6 = vmul.f32 0.5, %v2279_v22 }
 0x13c   : > { %v1547_v56 = vpack.c.bf16 %v980_v10, %v979_v60  ;;  %v561_v42 = vpop.f32.mrb[34].mxu0  ;;  %v649_v0 = vpop.f32.mrb[34].mxu1  ;;  %1848 = verf.f32 %v861_v24  ;;  %v2328_v63 = vadd.f32 %v1418_v59, %v559_v7  ;;  %v940_v47 = vadd.f32 1.0, %v1837_v34  ;;  %v1573_v7 = vld [vmem:[%s2026_s14 + $0x50] sm:$0xff]  }
 0x13d   : > { %1587 = vst [vmem:[%s2139_s20 + $0x28] sm:$0xff] %v1492_v43   ;;  %v562_v38 = vadd.f32 %v2033_v32, %v561_v42  ;;  %v1682_v52 = vpop.f32.mrb[35].mxu0  ;;  %v1726_v35 = vpop.f32.mrb[35].mxu1  ;;  %v2335_v45 = vadd.f32 %v1462_v21, %v647_v40  ;;  %v650_v28 = vadd.f32 %v2033_v32, %v649_v0  ;;  %v796_v59 = vmul.f32 0.5, %v2275_v25 }
 0x13e   : > { %v1839_v14 = vpop.eup %1838  ;;  %1598 = vst [vmem:[%s2139_s20 + $0x80] sm:$0xff] %v1547_v56   ;;  %v840_v29 = vmul.f32 0.70710677, %v2328_v63  ;;  %v959_v21 = vmul.f32 %v918_v55, %v795_v2  ;;  %v981_v25 = vmul.f32 %v940_v47, %v817_v20  ;;  %v1423_v15 = vunpack.c.h.bf16 %v2310_v9 }
 0x13f   : > { %v1841_v53 = vpop.eup %1840  ;;  %v919_v48 = vadd.f32 1.0, %v1839_v14  ;;  %v862_v50 = vmul.f32 0.70710677, %v2335_v45  ;;  %v2345_v18 = vadd.f32 %v1419_v39, %v562_v38  ;;  %v2349_v8 = vadd.f32 %v1463_v31, %v650_v28 }
 0x140   : > { %v941_v27 = vadd.f32 1.0, %v1841_v53  ;;  %1850 = verf.f32 %v840_v29  ;;  %v797_v23 = vmul.f32 0.5, %v2290_v41  ;;  %v819_v9 = vmul.f32 0.5, %v2297_v49 }
 0x141   : > { %v960_v36 = vmul.f32 %v919_v48, %v796_v59  ;;  %1852 = verf.f32 %v862_v50  ;;  %v841_v51 = vmul.f32 0.70710677, %v2345_v18  ;;  %v566_v22 = vpop.f32.mrb[36].mxu0  ;;  %v654_v33 = vpop.f32.mrb[36].mxu1  ;;  %v863_v13 = vmul.f32 0.70710677, %v2349_v8 }
 0x142   : > { %v982_v37 = vmul.f32 %v941_v27, %v818_v6  ;;  %v1843_v12 = vpop.eup %1842  ;;  %v567_v39 = vadd.f32 %v2033_v32, %v566_v22  ;;  %v1685_v58 = vpop.f32.mrb[37].mxu0  ;;  %v655_v5 = vadd.f32 %v2033_v32, %v654_v33  ;;  %v798_v30 = vmul.f32 0.5, %v2307_v3 }
 0x143   : > { %v1497_v54 = vpack.c.bf16 %v960_v36, %v959_v21  ;;  %v1729_v1 = vpop.f32.mrb[37].mxu1  ;;  %v1845_v26 = vpop.eup %1844  ;;  %1854 = verf.f32 %v841_v51  ;;  %v920_v44 = vadd.f32 1.0, %v1843_v12  ;;  %v820_v56 = vmul.f32 0.5, %v2314_v11 }
 0x144   : > { %v1552_v31 = vpack.c.bf16 %v982_v37, %v981_v25  ;;  %v569_v62 = vpop.f32.mrb[38].mxu0  ;;  %v657_v16 = vpop.f32.mrb[38].mxu1  ;;  %1856 = verf.f32 %v863_v13  ;;  %v2357_v60 = vadd.f32 %v1422_v57, %v567_v39  ;;  %v942_v43 = vadd.f32 1.0, %v1845_v26 }
 0x145   : > { %1588 = vst [vmem:[%s2139_s20 + $0x30] sm:$0xff] %v1497_v54   ;;  %v570_v10 = vadd.f32 %v2033_v32, %v569_v62  ;;  %v1686_v17 = vpop.f32.mrb[39].mxu0  ;;  %v1730_v19 = vpop.f32.mrb[39].mxu1  ;;  %v782_v24 = vadd.f32 %v741_v4, %v655_v5  ;;  %v961_v55 = vmul.f32 %v920_v44, %v797_v23  ;;  %v1426_v41 = vunpack.c.l.bf16 %v1573_v7 }
 0x146   : > { %v1847_v46 = vpop.eup %1846  ;;  %1599 = vst [vmem:[%s2139_s20 + $0x88] sm:$0xff] %v1552_v31   ;;  %v842_v57 = vmul.f32 0.70710677, %v2357_v60  ;;  %v983_v4 = vmul.f32 %v942_v43, %v819_v9  ;;  %v1427_v20 = vunpack.c.h.bf16 %v1573_v7  ;;  %v799_v36 = vmul.f32 0.5, %v2328_v63 }
 0x147   : > { %v1849_v61 = vpop.eup %1848  ;;  %v921_v34 = vadd.f32 1.0, %v1847_v46  ;;  %v864_v42 = vmul.f32 0.70710677, %v782_v24  ;;  %v761_v0 = vadd.f32 %v1423_v15, %v570_v10  ;;  %v800_v25 = vmul.f32 0.5, %v2345_v18 }
 0x148   : > { %v943_v40 = vadd.f32 1.0, %v1849_v61  ;;  %1858 = verf.f32 %v842_v57  ;;  %v821_v22 = vmul.f32 0.5, %v2335_v45  ;;  %v822_v33 = vmul.f32 0.5, %v2349_v8 }
 0x149   : > { %v962_v38 = vmul.f32 %v921_v34, %v798_v30  ;;  %1860 = verf.f32 %v864_v42  ;;  %v843_v35 = vmul.f32 0.70710677, %v761_v0  ;;  %v574_v49 = vpop.f32.mrb[40].mxu0  ;;  %v823_v5 = vmul.f32 0.5, %v782_v24 }
 0x14a   : > { %v984_v52 = vmul.f32 %v943_v40, %v820_v56  ;;  %v1851_v3 = vpop.eup %1850  ;;  %v575_v2 = vadd.f32 %v2033_v32, %v574_v49  ;;  %v1689_v47 = vpop.f32.mrb[41].mxu0  ;;  %v801_v15 = vmul.f32 0.5, %v2357_v60  ;;  %v802_v44 = vmul.f32 0.5, %v761_v0 }
 0x14b   : > { %v1502_v14 = vpack.c.bf16 %v962_v38, %v961_v55  ;;  %v1853_v11 = vpop.eup %1852  ;;  %1862 = verf.f32 %v843_v35  ;;  %v577_v53 = vpop.f32.mrb[42].mxu0  ;;  %v922_v59 = vadd.f32 1.0, %v1851_v3 }
 0x14c   : > { %v1557_v28 = vpack.c.bf16 %v984_v52, %v983_v4  ;;  %v762_v48 = vadd.f32 %v1426_v41, %v575_v2  ;;  %v578_v29 = vadd.f32 %v2033_v32, %v577_v53  ;;  %v1690_v6 = vpop.f32.mrb[43].mxu0  ;;  %v944_v50 = vadd.f32 1.0, %v1853_v11 }
 0x14d   : > { %1589 = vst [vmem:[%s2139_s20 + $0x38] sm:$0xff] %v1502_v14   ;;  %v1855_v27 = vpop.eup %1854  ;;  %v963_v13 = vmul.f32 %v922_v59, %v799_v36 }
 0x14e   : > { %1600 = vst [vmem:[%s2139_s20 + $0x90] sm:$0xff] %v1557_v28   ;;  %v1857_v21 = vpop.eup %1856  ;;  %v923_v37 = vadd.f32 1.0, %v1855_v27  ;;  %v844_v51 = vmul.f32 0.70710677, %v762_v48  ;;  %v763_v54 = vadd.f32 %v1427_v20, %v578_v29  ;;  %v985_v39 = vmul.f32 %v944_v50, %v821_v22 }
 0x14f   : > { %v945_v12 = vadd.f32 1.0, %v1857_v21  ;;  %v803_v9 = vmul.f32 0.5, %v762_v48 }
 0x150   : > { %v964_v32 = vmul.f32 %v923_v37, %v800_v25  ;;  %1864 = verf.f32 %v844_v51  ;;  %v845_v1 = vmul.f32 0.70710677, %v763_v54  ;;  %v804_v24 = vmul.f32 0.5, %v763_v54 }
 0x151   : > { %v986_v58 = vmul.f32 %v945_v12, %v822_v33 }
 0x152   : > { %v1859_v26 = vpop.eup %1858  ;;  %v1507_v63 = vpack.c.bf16 %v964_v32, %v963_v13  ;;  %1866 = verf.f32 %v845_v1 }
 0x153   : > { %v1861_v31 = vpop.eup %1860  ;;  %v1562_v18 = vpack.c.bf16 %v986_v58, %v985_v39  ;;  %v924_v45 = vadd.f32 1.0, %v1859_v26 }
 0x154   : > { %1590 = vst [vmem:[%s2139_s20 + $0x40] sm:$0xff] %v1507_v63   ;;  %v946_v8 = vadd.f32 1.0, %v1861_v31 }
 0x155   : > { %v1863_v62 = vpop.eup %1862  ;;  %1601 = vst [vmem:[%s2139_s20 + $0x98] sm:$0xff] %v1562_v18   ;;  %v965_v17 = vmul.f32 %v924_v45, %v801_v15 }
 0x156   : > { %v987_v16 = vmul.f32 %v946_v8, %v823_v5  ;;  %v925_v10 = vadd.f32 1.0, %v1863_v62 }
 0x158   : > { %v1383_v19 = vpack.c.bf16 %v987_v16, %v987_v16  ;;  %v966_v46 = vmul.f32 %v925_v10, %v802_v44 }
 0x15a   : > { %v1865_v23 = vpop.eup %1864  ;;  %1193 = vst [vmem:[%s2139_s20 + $0xa0] sm:$0xf] %v1383_v19  ;;  %v1512_v43 = vpack.c.bf16 %v966_v46, %v965_v17 }
 0x15b   : > { %v926_v7 = vadd.f32 1.0, %v1865_v23 }
 0x15c   : > { %1591 = vst [vmem:[%s2139_s20 + $0x48] sm:$0xff] %v1512_v43   ;;  %v1867_v61 = vpop.eup %1866 }
 0x15d   : > { %v927_v30 = vadd.f32 1.0, %v1867_v61  ;;  %v967_v34 = vmul.f32 %v926_v7, %v803_v9 }
 0x15f   : > { %v968_v57 = vmul.f32 %v927_v30, %v804_v24 }
 0x161   : > { %v1517_v56 = vpack.c.bf16 %v968_v57, %v967_v34 }
 0x163   : > { %1592 = vst [vmem:[%s2139_s20 + $0x50] sm:$0xff] %v1517_v56  }
 0x164 PF: > { %s14_s15 = sadd.s32 1, %s1874_s15  }
 0x165   : > { %p11_p4 = scmp.ge.s32.totalorder %s14_s15, 4  }
 0x167   :  { %13 = sbr.rel (!%p11_p4) target bundleno = 1 (0x1), region = 69 }

// kernel: fno2d_forward.18
= control target key start
LH: loop header
LB: loop body
LE: loop exit
PB: predicated region body
PF: predicated region fallthrough
CT: control target
= control target key end

     0   :  { %s1616_s15 = smov 0   ;;  %s1838_s0 = inlined_call_operand.vmem [shape: bf16[656,128], index: 0, kind: input, shape index: {}]   ;;  %s1839_s1 = inlined_call_operand.vmem [shape: bf16[128,128], index: 1, kind: input, shape index: {}]   ;;  %s1840_s2 = inlined_call_operand.vmem [shape: f32[1,128], index: 2, kind: input, shape index: {}]   ;;  %s1841_s3 = inlined_call_operand.vmem [shape: bf16[656,128], index: 3, kind: input, shape index: {}]   ;;  %s1842_s4 = inlined_call_operand.vmem [shape: bf16[656,128], index: 4, kind: output, shape index: {}]  }
   0x1 LB: > { %s1057_s16 = sadd.s32 4294967295, %s1587_s15   ;;  %p1061_p0 = scmp.ge.s32.totalorder %s1587_s15, 1  ;;  %s1587_s15 = sphi %s1616_s15, %s14_s15  }
   0x2   : > { %p174_p1 = scmp.lt.s32.totalorder %s1587_s15, 3 }
   0x4   : > { %p175_p2 = pnand %p1061_p0, %p174_p1 }
   0x5   : > { %v1552_v0 = vld [vmem:[%s1839_s1] sm:$0xff] (!%p175_p2)   ;;  %v1589_v1 = vmov (!%p175_p2), 0.0   ;;  %v1553_v2 = vld [vmem:[%s1839_s1 + $0x8] sm:$0xff] (!%p175_p2)   ;;  %s205_s21 = smul.u32 (!%p175_p2), 41, %s1057_s16  ;;  %vm1590_vm0 = vmmov (!%p175_p2), 0   ;;  %v1554_v3 = vld [vmem:[%s1839_s1 + $0x10] sm:$0xff] (!%p175_p2)  }
   0x6   : > { %178 = sbr.rel (%p175_p2) target bundleno = 339 (0x153), region = 36  ;;  %1426 = vmatprep.subr.bf16.mxu0 (!%p175_p2), %v1589_v1  ;;  %1526 = vmatprep.subr.bf16.mxu1 (!%p175_p2), %v1589_v1  ;;  %v1555_v4 = vld [vmem:[%s1839_s1 + $0x18] sm:$0xff] (!%p175_p2)   ;;  %v1556_v5 = vld [vmem:[%s1839_s1 + $0x20] sm:$0xff] (!%p175_p2)   ;;  %v1557_v6 = vld [vmem:[%s1839_s1 + $0x28] sm:$0xff] (!%p175_p2)  }
   0x7   : > { %1427 = vmatpush3.bf16.msra.mxu0 (!%p175_p2), %v1552_v0  ;;  %1534 = vmatpush3.bf16.msra.mxu1 (!%p175_p2), %v1552_v0  ;;  %p206_p3 = scmp.lt.s32.totalorder (!%p175_p2), %s205_s21, 81  ;;  %v1558_v7 = vld [vmem:[%s1839_s1 + $0x30] sm:$0xff] (!%p175_p2)   ;;  %v1559_v8 = vld [vmem:[%s1839_s1 + $0x38] sm:$0xff] (!%p175_p2)   ;;  %v1746_v32 = vld [vmem:[%s1840_s2] ss:$0 sm:$0xff] (!%p175_p2) }
   0x8   : > { %1428 = vmatprep.subr.bf16.mxu0 (!%p175_p2), %v1589_v1  ;;  %1527 = vmatprep.subr.bf16.mxu1 (!%p175_p2), %v1589_v1 }
   0x9   : > { %1442 = vmatprep.mubr.msk.bf16.mxu0 (!%p175_p2), %vm1590_vm0, %v1589_v1  ;;  %1486 = vmatprep.mubr.msk.bf16.mxu1 (!%p175_p2), %vm1590_vm0, %v1589_v1 }
   0xb   : > { %1429 = vmatpush3.bf16.msra.mxu0 (!%p175_p2), %v1553_v2  ;;  %1535 = vmatpush3.bf16.msra.mxu1 (!%p175_p2), %v1553_v2 }
   0xc   : > { %1430 = vmatprep.subr.bf16.mxu0 (!%p175_p2), %v1589_v1  ;;  %1528 = vmatprep.subr.bf16.mxu1 (!%p175_p2), %v1589_v1 }
   0xd   : > { %s1844_s21 = smov (!%p206_p3, %s205_s21), 81 }
   0xe   : > { %s1643_s24 = sshll.u32 %s1844_s21, 2 }
   0xf   : > { %s1649_s27 = scalar_lea.vmem %s1838_s0, %s1643_s24  ;;  %1431 = vmatpush3.bf16.msra.mxu0 %v1554_v3  ;;  %1536 = vmatpush3.bf16.msra.mxu1 %v1554_v3  ;;  %s1739_s14 = scalar_lea.vmem %s1841_s3, %s1643_s24 }
  0x10   : > { %1432 = vmatprep.subr.bf16.mxu0 %v1589_v1  ;;  %1529 = vmatprep.subr.bf16.mxu1 %v1589_v1  ;;  %v1560_v9 = vld [vmem:[%s1649_s27] sm:$0xff]   ;;  %v1561_v10 = vld [vmem:[%s1649_s27 + $0x58] sm:$0xff]   ;;  %v1562_v11 = vld [vmem:[%s1649_s27 + $0x8] sm:$0xff]   ;;  %s1758_s20 = scalar_lea.vmem %s1842_s4, %s1643_s24 }
  0x11   : > { %v1563_v12 = vld [vmem:[%s1649_s27 + $0x60] sm:$0xff]   ;;  %v1564_v13 = vld [vmem:[%s1649_s27 + $0x10] sm:$0xff]   ;;  %v1565_v14 = vld [vmem:[%s1649_s27 + $0x68] sm:$0xff]  }
  0x12   : > { %v1566_v15 = vld [vmem:[%s1649_s27 + $0x18] sm:$0xff]   ;;  %v1567_v16 = vld [vmem:[%s1649_s27 + $0x70] sm:$0xff]   ;;  %v1568_v17 = vld [vmem:[%s1649_s27 + $0x20] sm:$0xff]  }
  0x13   : > { %1433 = vmatpush3.bf16.msra.mxu0 %v1555_v4  ;;  %1537 = vmatpush3.bf16.msra.mxu1 %v1555_v4  ;;  %v1569_v18 = vld [vmem:[%s1649_s27 + $0x78] sm:$0xff]   ;;  %v1570_v19 = vld [vmem:[%s1649_s27 + $0x28] sm:$0xff]   ;;  %v1571_v20 = vld [vmem:[%s1649_s27 + $0x80] sm:$0xff]  }
  0x14   : > { %1434 = vmatprep.subr.bf16.mxu0 %v1589_v1  ;;  %1530 = vmatprep.subr.bf16.mxu1 %v1589_v1  ;;  %v1572_v21 = vld [vmem:[%s1649_s27 + $0x30] sm:$0xff]   ;;  %v1573_v22 = vld [vmem:[%s1649_s27 + $0x88] sm:$0xff]   ;;  %v1574_v23 = vld [vmem:[%s1649_s27 + $0x38] sm:$0xff]  }
  0x15   : > { %v1575_v24 = vld [vmem:[%s1649_s27 + $0x90] sm:$0xff]   ;;  %v1576_v25 = vld [vmem:[%s1649_s27 + $0x40] sm:$0xff]   ;;  %v1577_v26 = vld [vmem:[%s1649_s27 + $0x98] sm:$0xff]  }
  0x16   : > { %v1578_v27 = vld [vmem:[%s1649_s27 + $0x48] sm:$0xff]   ;;  %v1579_v28 = vld [vmem:[%s1649_s27 + $0xa0] ss:$0 sps:$4 sm:$0xff]   ;;  %v1580_v29 = vld [vmem:[%s1649_s27 + $0x50] sm:$0xff]  }
  0x17   : > { %1435 = vmatpush3.bf16.msra.mxu0 %v1556_v5  ;;  %1538 = vmatpush3.bf16.msra.mxu1 %v1556_v5  ;;  %v1369_v30 = vld [vmem:[%s1739_s14 + $0x58] sm:$0xff]   ;;  %v1180_v31 = vld [vmem:[%s1739_s14] sm:$0xff]   ;;  %v1359_v53 = vld [vmem:[%s1739_s14 + $0x8] sm:$0xff]  }
  0x18   : > { %1436 = vmatprep.subr.bf16.mxu0 %v1589_v1  ;;  %1531 = vmatprep.subr.bf16.mxu1 %v1589_v1  ;;  %v1225_v33 = vunpack.c.l.bf16 %v1369_v30  ;;  %v1181_v35 = vunpack.c.l.bf16 %v1180_v31  ;;  %v1182_v39 = vunpack.c.h.bf16 %v1180_v31  ;;  %v1226_v42 = vunpack.c.h.bf16 %v1369_v30  ;;  %v1370_v50 = vld [vmem:[%s1739_s14 + $0x60] sm:$0xff]  }
  0x19   : > { %v1229_v57 = vunpack.c.l.bf16 %v1370_v50  ;;  %v1185_v59 = vunpack.c.l.bf16 %v1359_v53  ;;  %v1186_v63 = vunpack.c.h.bf16 %v1359_v53  ;;  %v1230_v2 = vunpack.c.h.bf16 %v1370_v50 }
  0x1b   : > { %1437 = vmatpush3.bf16.msra.mxu0 %v1557_v6  ;;  %1539 = vmatpush3.bf16.msra.mxu1 %v1557_v6 }
  0x1c   : > { %1438 = vmatprep.subr.bf16.mxu0 %v1589_v1  ;;  %1532 = vmatprep.subr.bf16.mxu1 %v1589_v1 }
  0x1f   : > { %1439 = vmatpush3.bf16.msra.mxu0 %v1558_v7  ;;  %1540 = vmatpush3.bf16.msra.mxu1 %v1558_v7 }
  0x20   : > { %1440 = vmatprep.subr.bf16.mxu0 %v1589_v1  ;;  %1533 = vmatprep.subr.bf16.mxu1 %v1589_v1 }
  0x23   : > { %1441 = vmatpush3.bf16.msra.mxu0 %v1559_v8  ;;  %1541 = vmatpush3.bf16.msra.mxu1 %v1559_v8 }
  0x26   : > { %1443 = vmatmul.mubr.bf16.vlgmr.msra.gmra.mrb[0].mxu0 %v1560_v9  ;;  %1487 = vmatmul.mubr.bf16.vlgmr.msra.gmra.mrb[0].mxu1 %v1561_v10  ;;  %v1371_v10 = vld [vmem:[%s1739_s14 + $0x68] sm:$0xff]  }
  0x27   : > { %1446 = vmatprep.mubr.msk.bf16.mxu0 %vm1590_vm0, %v1589_v1  ;;  %1490 = vmatprep.mubr.msk.bf16.mxu1 %vm1590_vm0, %v1589_v1 }
  0x2e   : > { %1447 = vmatmul.mubr.bf16.gmra.mrb[4].mxu0 %v1562_v11  ;;  %1491 = vmatmul.mubr.bf16.gmra.mrb[4].mxu1 %v1563_v12 }
  0x2f   : > { %1450 = vmatprep.mubr.msk.bf16.mxu0 %vm1590_vm0, %v1589_v1  ;;  %1494 = vmatprep.mubr.msk.bf16.mxu1 %vm1590_vm0, %v1589_v1 }
  0x36   : > { %1451 = vmatmul.mubr.bf16.gmra.mrb[8].mxu0 %v1564_v13  ;;  %1495 = vmatmul.mubr.bf16.gmra.mrb[8].mxu1 %v1565_v14  ;;  %v1360_v13 = vld [vmem:[%s1739_s14 + $0x10] sm:$0xff]  }
  0x37   : > { %1454 = vmatprep.mubr.msk.bf16.mxu0 %vm1590_vm0, %v1589_v1  ;;  %1498 = vmatprep.mubr.msk.bf16.mxu1 %vm1590_vm0, %v1589_v1 }
  0x3e   : > { %1455 = vmatmul.mubr.bf16.gmra.mrb[12].mxu0 %v1566_v15  ;;  %1499 = vmatmul.mubr.bf16.gmra.mrb[12].mxu1 %v1567_v16 }
  0x3f   : > { %1458 = vmatprep.mubr.msk.bf16.mxu0 %vm1590_vm0, %v1589_v1  ;;  %1502 = vmatprep.mubr.msk.bf16.mxu1 %vm1590_vm0, %v1589_v1 }
  0x46   : > { %1459 = vmatmul.mubr.bf16.gmra.mrb[16].mxu0 %v1568_v17  ;;  %1503 = vmatmul.mubr.bf16.gmra.mrb[16].mxu1 %v1569_v18  ;;  %v1233_v17 = vunpack.c.l.bf16 %v1371_v10 }
  0x47   : > { %1462 = vmatprep.mubr.msk.bf16.mxu0 %vm1590_vm0, %v1589_v1  ;;  %1506 = vmatprep.mubr.msk.bf16.mxu1 %vm1590_vm0, %v1589_v1 }
  0x4e   : > { %1463 = vmatmul.mubr.bf16.gmra.mrb[20].mxu0 %v1570_v19  ;;  %1507 = vmatmul.mubr.bf16.gmra.mrb[20].mxu1 %v1571_v20  ;;  %v1189_v19 = vunpack.c.l.bf16 %v1360_v13 }
  0x4f   : > { %1466 = vmatprep.mubr.msk.bf16.mxu0 %vm1590_vm0, %v1589_v1  ;;  %1510 = vmatprep.mubr.msk.bf16.mxu1 %vm1590_vm0, %v1589_v1 }
  0x56   : > { %1467 = vmatmul.mubr.bf16.gmra.mrb[24].mxu0 %v1572_v21  ;;  %1511 = vmatmul.mubr.bf16.gmra.mrb[24].mxu1 %v1573_v22 }
  0x57   : > { %1470 = vmatprep.mubr.msk.bf16.mxu0 %vm1590_vm0, %v1589_v1  ;;  %1514 = vmatprep.mubr.msk.bf16.mxu1 %vm1590_vm0, %v1589_v1 }
  0x5e   : > { %1471 = vmatmul.mubr.bf16.gmra.mrb[28].mxu0 %v1574_v23  ;;  %1515 = vmatmul.mubr.bf16.gmra.mrb[28].mxu1 %v1575_v24  ;;  %v1190_v23 = vunpack.c.h.bf16 %v1360_v13 }
  0x5f   : > { %1474 = vmatprep.mubr.msk.bf16.mxu0 %vm1590_vm0, %v1589_v1  ;;  %1518 = vmatprep.mubr.msk.bf16.mxu1 %vm1590_vm0, %v1589_v1 }
  0x66   : > { %1475 = vmatmul.mubr.bf16.gmra.mrb[32].mxu0 %v1576_v25  ;;  %1519 = vmatmul.mubr.bf16.gmra.mrb[32].mxu1 %v1577_v26  ;;  %v1234_v26 = vunpack.c.h.bf16 %v1371_v10 }
  0x67   : > { %1478 = vmatprep.mubr.msk.bf16.mxu0 %vm1590_vm0, %v1589_v1  ;;  %1522 = vmatprep.mubr.msk.bf16.mxu1 %vm1590_vm0, %v1589_v1 }
  0x6e   : > { %1479 = vmatmul.mubr.bf16.gmra.mrb[36].mxu0 %v1578_v27  ;;  %1523 = vmatmul.mubr.bf16.gmra.mrb[36].mxu1 %v1579_v28 }
  0x6f   : > { %1482 = vmatprep.mubr.msk.bf16.mxu0 %vm1590_vm0, %v1589_v1 }
  0x76   : > { %1483 = vmatmul.mubr.bf16.gmra.mrb[40].mxu0 %v1580_v29 }
  0xf9   : > { %v494_v34 = vpop.f32.mrb[0].mxu0  ;;  %v582_v36 = vpop.f32.mrb[0].mxu1 }
  0xfa   : > { %v495_v37 = vadd.f32 %v1746_v32, %v494_v34  ;;  %v1444_v38 = vpop.f32.mrb[1].mxu0  ;;  %v583_v40 = vadd.f32 %v1746_v32, %v582_v36  ;;  %v1488_v41 = vpop.f32.mrb[1].mxu1 }
  0xfb   : > { %v497_v43 = vpop.f32.mrb[2].mxu0  ;;  %v585_v44 = vpop.f32.mrb[2].mxu1  ;;  %v1361_v38 = vld [vmem:[%s1739_s14 + $0x18] sm:$0xff]  }
  0xfc   : > { %v498_v45 = vadd.f32 %v1746_v32, %v497_v43  ;;  %v1445_v46 = vpop.f32.mrb[3].mxu0  ;;  %v764_v47 = vadd.f32 %v1225_v33, %v583_v40  ;;  %v586_v48 = vadd.f32 %v1746_v32, %v585_v44  ;;  %v1489_v49 = vpop.f32.mrb[3].mxu1  ;;  %v742_v51 = vadd.f32 %v1181_v35, %v495_v37  ;;  %v1372_v35 = vld [vmem:[%s1739_s14 + $0x70] sm:$0xff]  }
  0xfd   : > { %v1193_v44 = vunpack.c.l.bf16 %v1361_v38 }
  0xfe   : > { %v743_v52 = vadd.f32 %v1182_v39, %v498_v45  ;;  %v765_v54 = vadd.f32 %v1226_v42, %v586_v48  ;;  %v1237_v42 = vunpack.c.l.bf16 %v1372_v35  ;;  %v1194_v48 = vunpack.c.h.bf16 %v1361_v38 }
 0x100   : > { %v1262_v55 = vpack.c.bf16 %v743_v52, %v742_v51  ;;  %v1317_v56 = vpack.c.bf16 %v765_v54, %v764_v47  ;;  %v1238_v51 = vunpack.c.h.bf16 %v1372_v35 }
 0x101   : > { %v502_v58 = vpop.f32.mrb[4].mxu0  ;;  %v590_v60 = vpop.f32.mrb[4].mxu1 }
 0x102   : > { %1263 = vst [vmem:[%s1758_s20] sm:$0xff] %v1262_v55   ;;  %v503_v61 = vadd.f32 %v1746_v32, %v502_v58  ;;  %v1448_v62 = vpop.f32.mrb[5].mxu0  ;;  %1388 = vst [vmem:[%s1758_s20 + $0x58] sm:$0xff] %v1317_v56   ;;  %v591_v0 = vadd.f32 %v1746_v32, %v590_v60  ;;  %v1492_v1 = vpop.f32.mrb[5].mxu1 }
 0x103   : > { %v505_v3 = vpop.f32.mrb[6].mxu0  ;;  %v593_v4 = vpop.f32.mrb[6].mxu1  ;;  %v1362_v62 = vld [vmem:[%s1739_s14 + $0x20] sm:$0xff]  }
 0x104   : > { %v506_v5 = vadd.f32 %v1746_v32, %v505_v3  ;;  %v1449_v6 = vpop.f32.mrb[7].mxu0  ;;  %v766_v7 = vadd.f32 %v1229_v57, %v591_v0  ;;  %v594_v8 = vadd.f32 %v1746_v32, %v593_v4  ;;  %v1493_v9 = vpop.f32.mrb[7].mxu1  ;;  %v744_v11 = vadd.f32 %v1185_v59, %v503_v61  ;;  %v1373_v59 = vld [vmem:[%s1739_s14 + $0x78] sm:$0xff]  }
 0x105   : > { %v1197_v4 = vunpack.c.l.bf16 %v1362_v62 }
 0x106   : > { %v745_v12 = vadd.f32 %v1186_v63, %v506_v5  ;;  %v767_v14 = vadd.f32 %v1230_v2, %v594_v8  ;;  %v1241_v2 = vunpack.c.l.bf16 %v1373_v59  ;;  %v1198_v8 = vunpack.c.h.bf16 %v1362_v62 }
 0x108   : > { %v1267_v15 = vpack.c.bf16 %v745_v12, %v744_v11  ;;  %v1322_v16 = vpack.c.bf16 %v767_v14, %v766_v7  ;;  %v1242_v11 = vunpack.c.h.bf16 %v1373_v59 }
 0x109   : > { %v510_v18 = vpop.f32.mrb[8].mxu0  ;;  %v598_v20 = vpop.f32.mrb[8].mxu1 }
 0x10a   : > { %1378 = vst [vmem:[%s1758_s20 + $0x8] sm:$0xff] %v1267_v15   ;;  %v511_v21 = vadd.f32 %v1746_v32, %v510_v18  ;;  %v1452_v22 = vpop.f32.mrb[9].mxu0  ;;  %1389 = vst [vmem:[%s1758_s20 + $0x60] sm:$0xff] %v1322_v16   ;;  %v599_v24 = vadd.f32 %v1746_v32, %v598_v20  ;;  %v1496_v25 = vpop.f32.mrb[9].mxu1 }
 0x10b   : > { %v513_v27 = vpop.f32.mrb[10].mxu0  ;;  %v601_v28 = vpop.f32.mrb[10].mxu1  ;;  %v1363_v22 = vld [vmem:[%s1739_s14 + $0x28] sm:$0xff]  }
 0x10c   : > { %v514_v29 = vadd.f32 %v1746_v32, %v513_v27  ;;  %v1453_v30 = vpop.f32.mrb[11].mxu0  ;;  %v768_v31 = vadd.f32 %v1233_v17, %v599_v24  ;;  %v602_v33 = vadd.f32 %v1746_v32, %v601_v28  ;;  %v1497_v34 = vpop.f32.mrb[11].mxu1  ;;  %v746_v36 = vadd.f32 %v1189_v19, %v511_v21  ;;  %v1374_v19 = vld [vmem:[%s1739_s14 + $0x80] sm:$0xff]  }
 0x10d   : > { %v1201_v28 = vunpack.c.l.bf16 %v1363_v22 }
 0x10e   : > { %v747_v37 = vadd.f32 %v1190_v23, %v514_v29  ;;  %v769_v39 = vadd.f32 %v1234_v26, %v602_v33  ;;  %v1245_v26 = vunpack.c.l.bf16 %v1374_v19  ;;  %v1202_v33 = vunpack.c.h.bf16 %v1363_v22 }
 0x110   : > { %v1272_v40 = vpack.c.bf16 %v747_v37, %v746_v36  ;;  %v1327_v41 = vpack.c.bf16 %v769_v39, %v768_v31  ;;  %v1246_v36 = vunpack.c.h.bf16 %v1374_v19 }
 0x111   : > { %v518_v43 = vpop.f32.mrb[12].mxu0  ;;  %v606_v45 = vpop.f32.mrb[12].mxu1 }
 0x112   : > { %1379 = vst [vmem:[%s1758_s20 + $0x10] sm:$0xff] %v1272_v40   ;;  %v519_v46 = vadd.f32 %v1746_v32, %v518_v43  ;;  %v1456_v47 = vpop.f32.mrb[13].mxu0  ;;  %1390 = vst [vmem:[%s1758_s20 + $0x68] sm:$0xff] %v1327_v41   ;;  %v607_v49 = vadd.f32 %v1746_v32, %v606_v45  ;;  %v1500_v50 = vpop.f32.mrb[13].mxu1 }
 0x113   : > { %v521_v52 = vpop.f32.mrb[14].mxu0  ;;  %v609_v53 = vpop.f32.mrb[14].mxu1  ;;  %v1364_v47 = vld [vmem:[%s1739_s14 + $0x30] sm:$0xff]  }
 0x114   : > { %v522_v54 = vadd.f32 %v1746_v32, %v521_v52  ;;  %v1457_v55 = vpop.f32.mrb[15].mxu0  ;;  %v770_v56 = vadd.f32 %v1237_v42, %v607_v49  ;;  %v610_v57 = vadd.f32 %v1746_v32, %v609_v53  ;;  %v1501_v58 = vpop.f32.mrb[15].mxu1  ;;  %v748_v60 = vadd.f32 %v1193_v44, %v519_v46  ;;  %v1375_v44 = vld [vmem:[%s1739_s14 + $0x88] sm:$0xff]  }
 0x115   : > { %v1205_v53 = vunpack.c.l.bf16 %v1364_v47 }
 0x116   : > { %v749_v61 = vadd.f32 %v1194_v48, %v522_v54  ;;  %v771_v63 = vadd.f32 %v1238_v51, %v610_v57  ;;  %v1249_v51 = vunpack.c.l.bf16 %v1375_v44  ;;  %v1206_v57 = vunpack.c.h.bf16 %v1364_v47 }
 0x118   : > { %v1277_v0 = vpack.c.bf16 %v749_v61, %v748_v60  ;;  %v1332_v1 = vpack.c.bf16 %v771_v63, %v770_v56  ;;  %v1250_v60 = vunpack.c.h.bf16 %v1375_v44 }
 0x119   : > { %v526_v3 = vpop.f32.mrb[16].mxu0  ;;  %v614_v5 = vpop.f32.mrb[16].mxu1 }
 0x11a   : > { %1380 = vst [vmem:[%s1758_s20 + $0x18] sm:$0xff] %v1277_v0   ;;  %v527_v6 = vadd.f32 %v1746_v32, %v526_v3  ;;  %v1460_v7 = vpop.f32.mrb[17].mxu0  ;;  %1391 = vst [vmem:[%s1758_s20 + $0x70] sm:$0xff] %v1332_v1   ;;  %v615_v9 = vadd.f32 %v1746_v32, %v614_v5  ;;  %v1504_v10 = vpop.f32.mrb[17].mxu1 }
 0x11b   : > { %v529_v12 = vpop.f32.mrb[18].mxu0  ;;  %v617_v13 = vpop.f32.mrb[18].mxu1  ;;  %v1365_v7 = vld [vmem:[%s1739_s14 + $0x38] sm:$0xff]  }
 0x11c   : > { %v530_v14 = vadd.f32 %v1746_v32, %v529_v12  ;;  %v1461_v15 = vpop.f32.mrb[19].mxu0  ;;  %v772_v16 = vadd.f32 %v1241_v2, %v615_v9  ;;  %v618_v17 = vadd.f32 %v1746_v32, %v617_v13  ;;  %v1505_v18 = vpop.f32.mrb[19].mxu1  ;;  %v750_v20 = vadd.f32 %v1197_v4, %v527_v6  ;;  %v1376_v4 = vld [vmem:[%s1739_s14 + $0x90] sm:$0xff]  }
 0x11d   : > { %v1209_v13 = vunpack.c.l.bf16 %v1365_v7 }
 0x11e   : > { %v751_v21 = vadd.f32 %v1198_v8, %v530_v14  ;;  %v773_v23 = vadd.f32 %v1242_v11, %v618_v17  ;;  %v1253_v11 = vunpack.c.l.bf16 %v1376_v4  ;;  %v1210_v17 = vunpack.c.h.bf16 %v1365_v7 }
 0x120   : > { %v1282_v24 = vpack.c.bf16 %v751_v21, %v750_v20  ;;  %v1337_v25 = vpack.c.bf16 %v773_v23, %v772_v16  ;;  %v1254_v20 = vunpack.c.h.bf16 %v1376_v4 }
 0x121   : > { %v534_v27 = vpop.f32.mrb[20].mxu0  ;;  %v622_v29 = vpop.f32.mrb[20].mxu1 }
 0x122   : > { %1381 = vst [vmem:[%s1758_s20 + $0x20] sm:$0xff] %v1282_v24   ;;  %v535_v30 = vadd.f32 %v1746_v32, %v534_v27  ;;  %v1464_v31 = vpop.f32.mrb[21].mxu0  ;;  %1392 = vst [vmem:[%s1758_s20 + $0x78] sm:$0xff] %v1337_v25   ;;  %v623_v34 = vadd.f32 %v1746_v32, %v622_v29  ;;  %v1508_v35 = vpop.f32.mrb[21].mxu1 }
 0x123   : > { %v537_v37 = vpop.f32.mrb[22].mxu0  ;;  %v625_v38 = vpop.f32.mrb[22].mxu1  ;;  %v1366_v31 = vld [vmem:[%s1739_s14 + $0x40] sm:$0xff]  }
 0x124   : > { %v538_v39 = vadd.f32 %v1746_v32, %v537_v37  ;;  %v1465_v40 = vpop.f32.mrb[23].mxu0  ;;  %v774_v41 = vadd.f32 %v1245_v26, %v623_v34  ;;  %v626_v42 = vadd.f32 %v1746_v32, %v625_v38  ;;  %v1509_v43 = vpop.f32.mrb[23].mxu1  ;;  %v752_v45 = vadd.f32 %v1201_v28, %v535_v30  ;;  %v1377_v28 = vld [vmem:[%s1739_s14 + $0x98] sm:$0xff]  }
 0x125   : > { %v1213_v38 = vunpack.c.l.bf16 %v1366_v31 }
 0x126   : > { %v753_v46 = vadd.f32 %v1202_v33, %v538_v39  ;;  %v775_v48 = vadd.f32 %v1246_v36, %v626_v42  ;;  %v1257_v36 = vunpack.c.l.bf16 %v1377_v28  ;;  %v1214_v42 = vunpack.c.h.bf16 %v1366_v31 }
 0x128   : > { %v1287_v49 = vpack.c.bf16 %v753_v46, %v752_v45  ;;  %v1342_v50 = vpack.c.bf16 %v775_v48, %v774_v41  ;;  %v1258_v45 = vunpack.c.h.bf16 %v1377_v28 }
 0x129   : > { %v542_v52 = vpop.f32.mrb[24].mxu0  ;;  %v630_v54 = vpop.f32.mrb[24].mxu1 }
 0x12a   : > { %1382 = vst [vmem:[%s1758_s20 + $0x28] sm:$0xff] %v1287_v49   ;;  %v543_v55 = vadd.f32 %v1746_v32, %v542_v52  ;;  %v1468_v56 = vpop.f32.mrb[25].mxu0  ;;  %1393 = vst [vmem:[%s1758_s20 + $0x80] sm:$0xff] %v1342_v50   ;;  %v631_v58 = vadd.f32 %v1746_v32, %v630_v54  ;;  %v1512_v59 = vpop.f32.mrb[25].mxu1 }
 0x12b   : > { %v545_v61 = vpop.f32.mrb[26].mxu0  ;;  %v633_v62 = vpop.f32.mrb[26].mxu1 }
 0x12c   : > { %v546_v63 = vadd.f32 %v1746_v32, %v545_v61  ;;  %v1469_v0 = vpop.f32.mrb[27].mxu0  ;;  %v776_v1 = vadd.f32 %v1249_v51, %v631_v58  ;;  %v634_v2 = vadd.f32 %v1746_v32, %v633_v62  ;;  %v1513_v3 = vpop.f32.mrb[27].mxu1  ;;  %v754_v5 = vadd.f32 %v1205_v53, %v543_v55  ;;  %v700_v53 = vld [vmem:[%s1739_s14 + $0xa0] sm:$0xf] }
 0x12e   : > { %v755_v6 = vadd.f32 %v1206_v57, %v546_v63  ;;  %v777_v8 = vadd.f32 %v1250_v60, %v634_v2  ;;  %v1367_v57 = vld [vmem:[%s1739_s14 + $0x48] sm:$0xff]   ;;  %v741_v60 = vunpack.c.l.bf16 %v700_v53 }
 0x12f   : > { %v1217_v0 = vunpack.c.l.bf16 %v1367_v57  ;;  %v1218_v2 = vunpack.c.h.bf16 %v1367_v57 }
 0x130   : > { %v1292_v9 = vpack.c.bf16 %v755_v6, %v754_v5  ;;  %v1347_v10 = vpack.c.bf16 %v777_v8, %v776_v1 }
 0x131   : > { %v550_v12 = vpop.f32.mrb[28].mxu0  ;;  %v638_v14 = vpop.f32.mrb[28].mxu1 }
 0x132   : > { %1383 = vst [vmem:[%s1758_s20 + $0x30] sm:$0xff] %v1292_v9   ;;  %v551_v15 = vadd.f32 %v1746_v32, %v550_v12  ;;  %v1472_v16 = vpop.f32.mrb[29].mxu0  ;;  %1394 = vst [vmem:[%s1758_s20 + $0x88] sm:$0xff] %v1347_v10   ;;  %v639_v18 = vadd.f32 %v1746_v32, %v638_v14  ;;  %v1516_v19 = vpop.f32.mrb[29].mxu1  ;;  %v1368_v14 = vld [vmem:[%s1739_s14 + $0x50] sm:$0xff]  }
 0x133   : > { %v553_v21 = vpop.f32.mrb[30].mxu0  ;;  %v641_v22 = vpop.f32.mrb[30].mxu1 }
 0x134   : > { %v554_v23 = vadd.f32 %v1746_v32, %v553_v21  ;;  %v1473_v24 = vpop.f32.mrb[31].mxu0  ;;  %v778_v25 = vadd.f32 %v1253_v11, %v639_v18  ;;  %v642_v26 = vadd.f32 %v1746_v32, %v641_v22  ;;  %v1517_v27 = vpop.f32.mrb[31].mxu1  ;;  %v756_v29 = vadd.f32 %v1209_v13, %v551_v15 }
 0x135   : > { %v1221_v18 = vunpack.c.l.bf16 %v1368_v14 }
 0x136   : > { %v757_v30 = vadd.f32 %v1210_v17, %v554_v23  ;;  %v779_v33 = vadd.f32 %v1254_v20, %v642_v26  ;;  %v1222_v20 = vunpack.c.h.bf16 %v1368_v14 }
 0x138   : > { %v1297_v34 = vpack.c.bf16 %v757_v30, %v756_v29  ;;  %v1352_v35 = vpack.c.bf16 %v779_v33, %v778_v25 }
 0x139   : > { %v558_v37 = vpop.f32.mrb[32].mxu0  ;;  %v646_v39 = vpop.f32.mrb[32].mxu1 }
 0x13a   : > { %1384 = vst [vmem:[%s1758_s20 + $0x38] sm:$0xff] %v1297_v34   ;;  %v559_v40 = vadd.f32 %v1746_v32, %v558_v37  ;;  %v1476_v41 = vpop.f32.mrb[33].mxu0  ;;  %1395 = vst [vmem:[%s1758_s20 + $0x90] sm:$0xff] %v1352_v35   ;;  %v647_v43 = vadd.f32 %v1746_v32, %v646_v39  ;;  %v1520_v44 = vpop.f32.mrb[33].mxu1 }
 0x13b   : > { %v561_v46 = vpop.f32.mrb[34].mxu0  ;;  %v649_v47 = vpop.f32.mrb[34].mxu1 }
 0x13c   : > { %v562_v48 = vadd.f32 %v1746_v32, %v561_v46  ;;  %v1477_v49 = vpop.f32.mrb[35].mxu0  ;;  %v780_v50 = vadd.f32 %v1257_v36, %v647_v43  ;;  %v650_v51 = vadd.f32 %v1746_v32, %v649_v47  ;;  %v1521_v52 = vpop.f32.mrb[35].mxu1  ;;  %v758_v54 = vadd.f32 %v1213_v38, %v559_v40 }
 0x13e   : > { %v759_v55 = vadd.f32 %v1214_v42, %v562_v48  ;;  %v781_v56 = vadd.f32 %v1258_v45, %v650_v51 }
 0x140   : > { %v1302_v58 = vpack.c.bf16 %v759_v55, %v758_v54  ;;  %v1357_v59 = vpack.c.bf16 %v781_v56, %v780_v50 }
 0x141   : > { %v566_v61 = vpop.f32.mrb[36].mxu0  ;;  %v654_v62 = vpop.f32.mrb[36].mxu1 }
 0x142   : > { %1385 = vst [vmem:[%s1758_s20 + $0x40] sm:$0xff] %v1302_v58   ;;  %v567_v63 = vadd.f32 %v1746_v32, %v566_v61  ;;  %v1480_v1 = vpop.f32.mrb[37].mxu0  ;;  %1396 = vst [vmem:[%s1758_s20 + $0x98] sm:$0xff] %v1357_v59   ;;  %v655_v3 = vadd.f32 %v1746_v32, %v654_v62  ;;  %v1524_v4 = vpop.f32.mrb[37].mxu1 }
 0x143   : > { %v569_v5 = vpop.f32.mrb[38].mxu0  ;;  %v657_v6 = vpop.f32.mrb[38].mxu1 }
 0x144   : > { %v570_v7 = vadd.f32 %v1746_v32, %v569_v5  ;;  %v1481_v8 = vpop.f32.mrb[39].mxu0  ;;  %v782_v9 = vadd.f32 %v741_v60, %v655_v3  ;;  %v1525_v10 = vpop.f32.mrb[39].mxu1  ;;  %v760_v11 = vadd.f32 %v1217_v0, %v567_v63 }
 0x146   : > { %v761_v12 = vadd.f32 %v1218_v2, %v570_v7  ;;  %v1178_v13 = vpack.c.bf16 %v782_v9, %v782_v9 }
 0x148   : > { %v1307_v15 = vpack.c.bf16 %v761_v12, %v760_v11  ;;  %988 = vst [vmem:[%s1758_s20 + $0xa0] sm:$0xf] %v1178_v13 }
 0x149   : > { %v574_v16 = vpop.f32.mrb[40].mxu0 }
 0x14a   : > { %1386 = vst [vmem:[%s1758_s20 + $0x48] sm:$0xff] %v1307_v15   ;;  %v575_v17 = vadd.f32 %v1746_v32, %v574_v16  ;;  %v1484_v19 = vpop.f32.mrb[41].mxu0 }
 0x14b   : > { %v577_v21 = vpop.f32.mrb[42].mxu0 }
 0x14c   : > { %v578_v22 = vadd.f32 %v1746_v32, %v577_v21  ;;  %v1485_v23 = vpop.f32.mrb[43].mxu0  ;;  %v762_v24 = vadd.f32 %v1221_v18, %v575_v17 }
 0x14e   : > { %v763_v25 = vadd.f32 %v1222_v20, %v578_v22 }
 0x150   : > { %v1312_v26 = vpack.c.bf16 %v763_v25, %v762_v24 }
 0x152   : > { %1387 = vst [vmem:[%s1758_s20 + $0x50] sm:$0xff] %v1312_v26  }
 0x153 PF: > { %s14_s15 = sadd.s32 1, %s1587_s15  }
 0x154   : > { %p11_p4 = scmp.ge.s32.totalorder %s14_s15, 4  }
 0x156   :  { %13 = sbr.rel (!%p11_p4) target bundleno = 1 (0x1), region = 69 }

// kernel: fno2d_forward.19
= control target key start
LH: loop header
LB: loop body
LE: loop exit
PB: predicated region body
PF: predicated region fallthrough
CT: control target
= control target key end

     0   :  { %s1417_s18 = smov 0   ;;  %s1700_s0 = inlined_call_operand.vmem [shape: bf16[512,128], index: 0, kind: input, shape index: {}]   ;;  %s1701_s1 = inlined_call_operand.vmem [shape: bf16[128,128], index: 1, kind: input, shape index: {}]   ;;  %s1702_s2 = inlined_call_operand.vmem [shape: f32[1,128], index: 2, kind: input, shape index: {}]   ;;  %s1703_s3 = inlined_call_operand.vmem [shape: bf16[128,128], index: 3, kind: input, shape index: {}]   ;;  %s1704_s4 = inlined_call_operand.vmem [shape: f32[1,128], index: 4, kind: input, shape index: {}]   ;;  %s1705_s5 = inlined_call_operand.vmem [shape: f32[512,1], index: 5, kind: output, shape index: {}]  }
   0x1 LB: > { %s1086_s19 = sadd.s32 4294967295, %s1385_s18   ;;  %p1090_p0 = scmp.ge.s32.totalorder %s1385_s18, 1  ;;  %s1385_s18 = sphi %s1417_s18, %s15_s18  }
   0x2   : > { %p188_p1 = scmp.lt.s32.totalorder %s1385_s18, 3 }
   0x4   : > { %p189_p2 = pnand %p1090_p0, %p188_p1 }
   0x5   : > { %v1283_v0 = vld [vmem:[%s1701_s1] sm:$0xff] (!%p189_p2)   ;;  %s1091_s22 = sshll.u32 (!%p189_p2), %s1086_s19, 5  ;;  %v1284_v1 = vld [vmem:[%s1701_s1 + $0x8] sm:$0xff] (!%p189_p2)   ;;  %v1285_v2 = vld [vmem:[%s1701_s1 + $0x10] sm:$0xff] (!%p189_p2)   ;;  %vm997_vm0 = vcmask (!%p189_p2), 7168  }
   0x6   : > { %192 = sbr.rel (%p189_p2) target bundleno = 549 (0x225), region = 40  ;;  %p217_p3 = scmp.lt.s32.totalorder (!%p189_p2), %s1091_s22, 63  ;;  %1179 = vmatprep.subr.bf16.mxu0 (!%p189_p2), %v1283_v0  ;;  %v1286_v3 = vld [vmem:[%s1701_s1 + $0x18] sm:$0xff] (!%p189_p2)   ;;  %v1287_v5 = vld [vmem:[%s1701_s1 + $0x20] sm:$0xff] (!%p189_p2)   ;;  %v1288_v6 = vld [vmem:[%s1701_s1 + $0x28] sm:$0xff] (!%p189_p2)  }
   0x7   : > { %1180 = vmatpush3.bf16.msra.mxu0 (!%p189_p2), %v1283_v0  ;;  %v1289_v7 = vld [vmem:[%s1701_s1 + $0x30] sm:$0xff] (!%p189_p2)   ;;  %v1290_v8 = vld [vmem:[%s1701_s1 + $0x38] sm:$0xff] (!%p189_p2)   ;;  %v1307_v9 = vld [vmem:[%s1703_s3] sm:$0xff] (!%p189_p2)  }
   0x8   : > { %1181 = vmatprep.subr.bf16.mxu0 (!%p189_p2), %v1284_v1  ;;  %v1308_v10 = vld [vmem:[%s1703_s3 + $0x8] sm:$0xff] (!%p189_p2)   ;;  %1227 = vmatprep.subr.bf16.mxu1 (!%p189_p2), %v1307_v9  ;;  %v1309_v26 = vld [vmem:[%s1703_s3 + $0x10] sm:$0xff] (!%p189_p2)   ;;  %v1310_v27 = vld [vmem:[%s1703_s3 + $0x18] sm:$0xff] (!%p189_p2)  }
   0x9   : > { %1228 = vmatpush3.bf16.msra.mxu1 (!%p189_p2), %v1307_v9  ;;  %v1311_v28 = vld [vmem:[%s1703_s3 + $0x20] sm:$0xff] (!%p189_p2)   ;;  %v1312_v29 = vld [vmem:[%s1703_s3 + $0x28] sm:$0xff] (!%p189_p2)   ;;  %v1313_v30 = vld [vmem:[%s1703_s3 + $0x30] sm:$0xff] (!%p189_p2)  }
   0xa   : > { %1229 = vmatprep.subr.bf16.mxu1 (!%p189_p2), %v1308_v10  ;;  %v1314_v31 = vld [vmem:[%s1703_s3 + $0x38] sm:$0xff] (!%p189_p2)   ;;  %v1500_v32 = vld [vmem:[%s1702_s2] ss:$0 sm:$0xff] (!%p189_p2) }
   0xb   : > { %1182 = vmatpush3.bf16.msra.mxu0 (!%p189_p2), %v1284_v1 }
   0xc   : > { %1183 = vmatprep.subr.bf16.mxu0 (!%p189_p2), %v1285_v2 }
   0xd   : > { %s1707_s22 = smov (!%p217_p3, %s1091_s22), 63  ;;  %1230 = vmatpush3.bf16.msra.mxu1 %v1308_v10 }
   0xe   : > { %s1092_s27 = sshll.u32 %s1707_s22, 2  ;;  %1231 = vmatprep.subr.bf16.mxu1 %v1309_v26  ;;  %s1094_s11 = sshll.u32 %s1707_s22, 3 }
   0xf   : > { %s1440_s30 = scalar_lea.vmem %s1700_s0, %s1092_s27  ;;  %1184 = vmatpush3.bf16.msra.mxu0 %v1285_v2  ;;  %s1599_s16 = scalar_lea.vmem %s1705_s5, %s1094_s11 }
  0x10   : > { %v1291_v4 = vld [vmem:[%s1440_s30] sm:$0xff]   ;;  %1185 = vmatprep.subr.bf16.mxu0 %v1286_v3  ;;  %v1292_v11 = vld [vmem:[%s1440_s30 + $0x8] sm:$0xff]   ;;  %v1293_v12 = vld [vmem:[%s1440_s30 + $0x10] sm:$0xff]  }
  0x11   : > { %1195 = vmatprep.mubr.bf16.mxu0 %v1291_v4  ;;  %v1294_v13 = vld [vmem:[%s1440_s30 + $0x18] sm:$0xff]   ;;  %v1295_v14 = vld [vmem:[%s1440_s30 + $0x20] sm:$0xff]   ;;  %v1296_v15 = vld [vmem:[%s1440_s30 + $0x28] sm:$0xff]   ;;  %1232 = vmatpush3.bf16.msra.mxu1 %v1309_v26 }
  0x12   : > { %v1297_v16 = vld [vmem:[%s1440_s30 + $0x30] sm:$0xff]   ;;  %v1298_v17 = vld [vmem:[%s1440_s30 + $0x38] sm:$0xff]   ;;  %v1299_v18 = vld [vmem:[%s1440_s30 + $0x40] sm:$0xff]   ;;  %1233 = vmatprep.subr.bf16.mxu1 %v1310_v27 }
  0x13   : > { %1186 = vmatpush3.bf16.msra.mxu0 %v1286_v3  ;;  %v1300_v19 = vld [vmem:[%s1440_s30 + $0x48] sm:$0xff]   ;;  %v1301_v20 = vld [vmem:[%s1440_s30 + $0x50] sm:$0xff]   ;;  %v1302_v21 = vld [vmem:[%s1440_s30 + $0x58] sm:$0xff]  }
  0x14   : > { %1187 = vmatprep.subr.bf16.mxu0 %v1287_v5  ;;  %v1303_v22 = vld [vmem:[%s1440_s30 + $0x60] sm:$0xff]   ;;  %v1304_v23 = vld [vmem:[%s1440_s30 + $0x68] sm:$0xff]   ;;  %v1305_v24 = vld [vmem:[%s1440_s30 + $0x70] sm:$0xff]  }
  0x15   : > { %v1306_v25 = vld [vmem:[%s1440_s30 + $0x78] sm:$0xff]   ;;  %1234 = vmatpush3.bf16.msra.mxu1 %v1310_v27 }
  0x16   : > { %1235 = vmatprep.subr.bf16.mxu1 %v1311_v28 }
  0x17   : > { %1188 = vmatpush3.bf16.msra.mxu0 %v1287_v5 }
  0x18   : > { %1189 = vmatprep.subr.bf16.mxu0 %v1288_v6 }
  0x19   : > { %1236 = vmatpush3.bf16.msra.mxu1 %v1311_v28 }
  0x1a   : > { %1237 = vmatprep.subr.bf16.mxu1 %v1312_v29 }
  0x1b   : > { %1190 = vmatpush3.bf16.msra.mxu0 %v1288_v6 }
  0x1c   : > { %1191 = vmatprep.subr.bf16.mxu0 %v1289_v7 }
  0x1d   : > { %1238 = vmatpush3.bf16.msra.mxu1 %v1312_v29 }
  0x1e   : > { %1239 = vmatprep.subr.bf16.mxu1 %v1313_v30 }
  0x1f   : > { %1192 = vmatpush3.bf16.msra.mxu0 %v1289_v7 }
  0x20   : > { %1193 = vmatprep.subr.bf16.mxu0 %v1290_v8 }
  0x21   : > { %1240 = vmatpush3.bf16.msra.mxu1 %v1313_v30 }
  0x22   : > { %1241 = vmatprep.subr.bf16.mxu1 %v1314_v31 }
  0x23   : > { %1194 = vmatpush3.bf16.msra.mxu0 %v1290_v8 }
  0x25   : > { %1242 = vmatpush3.bf16.msra.mxu1 %v1314_v31 }
  0x26   : > { %1196 = vmatmul.mubr.bf16.vlgmr.msra.gmra.mrb[0].mxu0 %v1292_v11 }
  0x27   : > { %1199 = vmatprep.mubr.bf16.mxu0 %v1293_v12 }
  0x2e   : > { %1200 = vmatmul.mubr.bf16.gmra.mrb[4].mxu0 %v1294_v13 }
  0x2f   : > { %1203 = vmatprep.mubr.bf16.mxu0 %v1295_v14 }
  0x36   : > { %1204 = vmatmul.mubr.bf16.gmra.mrb[8].mxu0 %v1296_v15 }
  0x37   : > { %1207 = vmatprep.mubr.bf16.mxu0 %v1297_v16 }
  0x3e   : > { %1208 = vmatmul.mubr.bf16.gmra.mrb[12].mxu0 %v1298_v17 }
  0x3f   : > { %1211 = vmatprep.mubr.bf16.mxu0 %v1299_v18 }
  0x46   : > { %1212 = vmatmul.mubr.bf16.gmra.mrb[16].mxu0 %v1300_v19 }
  0x47   : > { %1215 = vmatprep.mubr.bf16.mxu0 %v1301_v20 }
  0x4e   : > { %1216 = vmatmul.mubr.bf16.gmra.mrb[20].mxu0 %v1302_v21 }
  0x4f   : > { %1219 = vmatprep.mubr.bf16.mxu0 %v1303_v22 }
  0x56   : > { %1220 = vmatmul.mubr.bf16.gmra.mrb[24].mxu0 %v1304_v23 }
  0x57   : > { %1223 = vmatprep.mubr.bf16.mxu0 %v1305_v24 }
  0x5e   : > { %1224 = vmatmul.mubr.bf16.gmra.mrb[28].mxu0 %v1306_v25 }
  0xf9   : > { %v1197_v33 = vpop.f32.mrb[0].mxu0 }
  0xfa   : > { %v471_v34 = vadd.f32 %v1197_v33, %v1500_v32  ;;  %v462_v35 = vpop.f32.mrb[1].mxu0 }
  0xfb   : > { %v463_v36 = vadd.f32 %v1500_v32, %v462_v35  ;;  %v1198_v37 = vpop.f32.mrb[2].mxu0 }
  0xfc   : > { %v623_v38 = vmul.f32 0.70710677, %v471_v34  ;;  %v474_v39 = vadd.f32 %v1198_v37, %v1500_v32  ;;  %v465_v40 = vpop.f32.mrb[3].mxu0  ;;  %v591_v61 = vmul.f32 0.5, %v471_v34 }
  0xfd   : > { %v621_v41 = vmul.f32 0.70710677, %v463_v36  ;;  %v466_v42 = vadd.f32 %v1500_v32, %v465_v40  ;;  %v589_v7 = vmul.f32 0.5, %v463_v36 }
  0xfe   : > { %1315 = verf.f32 %v623_v38  ;;  %v624_v43 = vmul.f32 0.70710677, %v474_v39  ;;  %v592_v2 = vmul.f32 0.5, %v474_v39 }
  0xff   : > { %1317 = verf.f32 %v621_v41  ;;  %v622_v44 = vmul.f32 0.70710677, %v466_v42  ;;  %v590_v13 = vmul.f32 0.5, %v466_v42 }
 0x100   : > { %1319 = verf.f32 %v624_v43 }
 0x101   : > { %1321 = verf.f32 %v622_v44  ;;  %v1201_v45 = vpop.f32.mrb[4].mxu0 }
 0x102   : > { %v487_v46 = vadd.f32 %v1201_v45, %v1500_v32  ;;  %v478_v47 = vpop.f32.mrb[5].mxu0 }
 0x103   : > { %v479_v48 = vadd.f32 %v1500_v32, %v478_v47  ;;  %v1202_v49 = vpop.f32.mrb[6].mxu0 }
 0x104   : > { %v627_v50 = vmul.f32 0.70710677, %v487_v46  ;;  %v490_v51 = vadd.f32 %v1202_v49, %v1500_v32  ;;  %v481_v52 = vpop.f32.mrb[7].mxu0  ;;  %v595_v33 = vmul.f32 0.5, %v487_v46 }
 0x105   : > { %v625_v53 = vmul.f32 0.70710677, %v479_v48  ;;  %v482_v54 = vadd.f32 %v1500_v32, %v481_v52  ;;  %v593_v38 = vmul.f32 0.5, %v479_v48 }
 0x106   : > { %1323 = verf.f32 %v627_v50  ;;  %v628_v55 = vmul.f32 0.70710677, %v490_v51  ;;  %v596_v34 = vmul.f32 0.5, %v490_v51 }
 0x107   : > { %1325 = verf.f32 %v625_v53  ;;  %v626_v56 = vmul.f32 0.70710677, %v482_v54  ;;  %v594_v39 = vmul.f32 0.5, %v482_v54 }
 0x108   : > { %v1316_v57 = vpop.eup %1315  ;;  %1327 = verf.f32 %v628_v55 }
 0x109   : > { %v1318_v58 = vpop.eup %1317  ;;  %1329 = verf.f32 %v626_v56  ;;  %v1205_v59 = vpop.f32.mrb[8].mxu0  ;;  %v687_v62 = vadd.f32 1.0, %v1316_v57 }
 0x10a   : > { %v1320_v60 = vpop.eup %1319  ;;  %v1511_v63 = vadd.f32 %v1205_v59, %v1500_v32  ;;  %v494_v0 = vpop.f32.mrb[9].mxu0  ;;  %v685_v6 = vadd.f32 1.0, %v1318_v58 }
 0x10b   : > { %v1322_v1 = vpop.eup %1321  ;;  %v688_v3 = vadd.f32 1.0, %v1320_v60  ;;  %v1514_v4 = vadd.f32 %v1500_v32, %v494_v0  ;;  %v1206_v5 = vpop.f32.mrb[10].mxu0  ;;  %v719_v16 = vmul.f32 %v687_v62, %v591_v61 }
 0x10c   : > { %v631_v8 = vmul.f32 0.70710677, %v1511_v63  ;;  %v1518_v9 = vadd.f32 %v1206_v5, %v1500_v32  ;;  %v497_v10 = vpop.f32.mrb[11].mxu0  ;;  %v686_v11 = vadd.f32 1.0, %v1322_v1  ;;  %v717_v19 = vmul.f32 %v685_v6, %v589_v7 }
 0x10d   : > { %v720_v12 = vmul.f32 %v688_v3, %v592_v2  ;;  %v629_v14 = vmul.f32 0.70710677, %v1514_v4  ;;  %v1522_v15 = vadd.f32 %v1500_v32, %v497_v10  ;;  %v599_v0 = vmul.f32 0.5, %v1511_v63 }
 0x10e   : > { %1331 = verf.f32 %v631_v8  ;;  %v632_v17 = vmul.f32 0.70710677, %v1518_v9  ;;  %v718_v20 = vmul.f32 %v686_v11, %v590_v13  ;;  %v600_v1 = vmul.f32 0.5, %v1518_v9 }
 0x10f   : > { %1333 = verf.f32 %v629_v14  ;;  %v630_v18 = vmul.f32 0.70710677, %v1522_v15  ;;  %v750_v22 = vpack.c.bf16 %v720_v12, %v719_v16  ;;  %v597_v6 = vmul.f32 0.5, %v1514_v4 }
 0x110   : > { %v1324_v21 = vpop.eup %1323  ;;  %1335 = verf.f32 %v632_v17  ;;  %v749_v26 = vpack.c.bf16 %v718_v20, %v717_v19  ;;  %v598_v7 = vmul.f32 0.5, %v1522_v15 }
 0x111   : > { %v1326_v23 = vpop.eup %1325  ;;  %v691_v24 = vadd.f32 1.0, %v1324_v21  ;;  %1337 = verf.f32 %v630_v18  ;;  %v1209_v25 = vpop.f32.mrb[12].mxu0 }
 0x112   : > { %v1328_v27 = vpop.eup %1327  ;;  %v689_v28 = vadd.f32 1.0, %v1326_v23  ;;  %v1527_v29 = vadd.f32 %v1209_v25, %v1500_v32  ;;  %v510_v30 = vpop.f32.mrb[13].mxu0  ;;  %1243 = vmatprep.mubr.bf16.mxu1 %v749_v26 }
 0x113   : > { %v1330_v31 = vpop.eup %1329  ;;  %v692_v35 = vadd.f32 1.0, %v1328_v27  ;;  %v1530_v36 = vadd.f32 %v1500_v32, %v510_v30  ;;  %v1210_v37 = vpop.f32.mrb[14].mxu0  ;;  %1244 = vmatmul.mubr.bf16.vlgmr.msra.gmra.mrb[0].mxu1 %v750_v22  ;;  %v723_v43 = vmul.f32 %v691_v24, %v595_v33 }
 0x114   : > { %v690_v40 = vadd.f32 1.0, %v1330_v31  ;;  %v635_v41 = vmul.f32 0.70710677, %v1527_v29  ;;  %v513_v42 = vpop.f32.mrb[15].mxu0  ;;  %v522_v46 = vadd.f32 %v1210_v37, %v1500_v32  ;;  %v721_v47 = vmul.f32 %v689_v28, %v593_v38 }
 0x115   : > { %v724_v44 = vmul.f32 %v692_v35, %v596_v34  ;;  %v633_v45 = vmul.f32 0.70710677, %v1530_v36  ;;  %v514_v50 = vadd.f32 %v1500_v32, %v513_v42  ;;  %v603_v27 = vmul.f32 0.5, %v1527_v29 }
 0x116   : > { %v722_v49 = vmul.f32 %v690_v40, %v594_v39  ;;  %1339 = verf.f32 %v635_v41  ;;  %v636_v51 = vmul.f32 0.70710677, %v522_v46  ;;  %v601_v34 = vmul.f32 0.5, %v1530_v36 }
 0x117   : > { %1341 = verf.f32 %v633_v45  ;;  %v752_v48 = vpack.c.bf16 %v724_v44, %v723_v43  ;;  %v634_v53 = vmul.f32 0.70710677, %v514_v50  ;;  %v604_v35 = vmul.f32 0.5, %v522_v46 }
 0x118   : > { %v1332_v52 = vpop.eup %1331  ;;  %v751_v54 = vpack.c.bf16 %v722_v49, %v721_v47  ;;  %1343 = verf.f32 %v636_v51  ;;  %v602_v40 = vmul.f32 0.5, %v514_v50 }
 0x119   : > { %v1334_v55 = vpop.eup %1333  ;;  %v695_v56 = vadd.f32 1.0, %v1332_v52  ;;  %v1213_v57 = vpop.f32.mrb[16].mxu0  ;;  %1345 = verf.f32 %v634_v53 }
 0x11a   : > { %v1336_v58 = vpop.eup %1335  ;;  %v693_v59 = vadd.f32 1.0, %v1334_v55  ;;  %v1537_v60 = vadd.f32 %v1213_v57, %v1500_v32  ;;  %v526_v61 = vpop.f32.mrb[17].mxu0  ;;  %1247 = vmatprep.mubr.bf16.mxu1 %v751_v54 }
 0x11b   : > { %v1338_v62 = vpop.eup %1337  ;;  %v696_v2 = vadd.f32 1.0, %v1336_v58  ;;  %v1542_v3 = vadd.f32 %v1500_v32, %v526_v61  ;;  %v1214_v5 = vpop.f32.mrb[18].mxu0  ;;  %1248 = vmatmul.mubr.bf16.gmra.mrb[4].mxu1 %v752_v48  ;;  %v727_v12 = vmul.f32 %v695_v56, %v599_v0 }
 0x11c   : > { %v694_v8 = vadd.f32 1.0, %v1338_v62  ;;  %v639_v10 = vmul.f32 0.70710677, %v1537_v60  ;;  %v529_v11 = vpop.f32.mrb[19].mxu0  ;;  %v538_v9 = vadd.f32 %v1214_v5, %v1500_v32  ;;  %v725_v14 = vmul.f32 %v693_v59, %v597_v6 }
 0x11d   : > { %v728_v13 = vmul.f32 %v696_v2, %v600_v1  ;;  %v637_v63 = vmul.f32 0.70710677, %v1542_v3  ;;  %v530_v17 = vadd.f32 %v1500_v32, %v529_v11  ;;  %v607_v58 = vmul.f32 0.5, %v1537_v60 }
 0x11e   : > { %v726_v16 = vmul.f32 %v694_v8, %v598_v7  ;;  %1347 = verf.f32 %v639_v10  ;;  %v640_v4 = vmul.f32 0.70710677, %v538_v9  ;;  %v605_v1 = vmul.f32 0.5, %v1542_v3 }
 0x11f   : > { %1349 = verf.f32 %v637_v63  ;;  %v754_v18 = vpack.c.bf16 %v728_v13, %v727_v12  ;;  %v638_v19 = vmul.f32 0.70710677, %v530_v17  ;;  %v608_v2 = vmul.f32 0.5, %v538_v9 }
 0x120   : > { %v1340_v15 = vpop.eup %1339  ;;  %v753_v20 = vpack.c.bf16 %v726_v16, %v725_v14  ;;  %1351 = verf.f32 %v640_v4  ;;  %v606_v8 = vmul.f32 0.5, %v530_v17 }
 0x121   : > { %v1342_v21 = vpop.eup %1341  ;;  %v1217_v22 = vpop.f32.mrb[20].mxu0  ;;  %v699_v23 = vadd.f32 1.0, %v1340_v15  ;;  %1353 = verf.f32 %v638_v19 }
 0x122   : > { %v1551_v24 = vadd.f32 %v1217_v22, %v1500_v32  ;;  %v542_v25 = vpop.f32.mrb[21].mxu0  ;;  %1251 = vmatprep.mubr.bf16.mxu1 %v753_v20  ;;  %v1344_v26 = vpop.eup %1343  ;;  %v697_v28 = vadd.f32 1.0, %v1342_v21 }
 0x123   : > { %v1555_v30 = vadd.f32 %v1500_v32, %v542_v25  ;;  %v1218_v31 = vpop.f32.mrb[22].mxu0  ;;  %v1346_v33 = vpop.eup %1345  ;;  %v700_v37 = vadd.f32 1.0, %v1344_v26  ;;  %1252 = vmatmul.mubr.bf16.gmra.mrb[8].mxu1 %v754_v18  ;;  %v731_v43 = vmul.f32 %v699_v23, %v603_v27 }
 0x124   : > { %v643_v38 = vmul.f32 0.70710677, %v1551_v24  ;;  %v545_v39 = vpop.f32.mrb[23].mxu0  ;;  %v698_v41 = vadd.f32 1.0, %v1346_v33  ;;  %v1561_v29 = vadd.f32 %v1218_v31, %v1500_v32  ;;  %v729_v36 = vmul.f32 %v697_v28, %v601_v34 }
 0x125   : > { %v641_v42 = vmul.f32 0.70710677, %v1555_v30  ;;  %v732_v44 = vmul.f32 %v700_v37, %v604_v35  ;;  %v1564_v45 = vadd.f32 %v1500_v32, %v545_v39  ;;  %v611_v25 = vmul.f32 0.5, %v1551_v24 }
 0x126   : > { %1355 = verf.f32 %v643_v38  ;;  %v730_v46 = vmul.f32 %v698_v41, %v602_v40  ;;  %v644_v47 = vmul.f32 0.70710677, %v1561_v29  ;;  %v609_v33 = vmul.f32 0.5, %v1555_v30 }
 0x127   : > { %1357 = verf.f32 %v641_v42  ;;  %v642_v50 = vmul.f32 0.70710677, %v1564_v45  ;;  %v756_v51 = vpack.c.bf16 %v732_v44, %v731_v43  ;;  %v612_v34 = vmul.f32 0.5, %v1561_v29 }
 0x128   : > { %v1348_v49 = vpop.eup %1347  ;;  %1359 = verf.f32 %v644_v47  ;;  %v755_v53 = vpack.c.bf16 %v730_v46, %v729_v36  ;;  %v610_v39 = vmul.f32 0.5, %v1564_v45 }
 0x129   : > { %v1350_v48 = vpop.eup %1349  ;;  %v1221_v52 = vpop.f32.mrb[24].mxu0  ;;  %v703_v54 = vadd.f32 1.0, %v1348_v49  ;;  %1361 = verf.f32 %v642_v50 }
 0x12a   : > { %v1569_v55 = vadd.f32 %v1221_v52, %v1500_v32  ;;  %v558_v56 = vpop.f32.mrb[25].mxu0  ;;  %v1352_v57 = vpop.eup %1351  ;;  %v701_v59 = vadd.f32 1.0, %v1350_v48  ;;  %1255 = vmatprep.mubr.bf16.mxu1 %v755_v53 }
 0x12b   : > { %v1573_v61 = vadd.f32 %v1500_v32, %v558_v56  ;;  %v1222_v62 = vpop.f32.mrb[26].mxu0  ;;  %v1354_v0 = vpop.eup %1353  ;;  %v704_v5 = vadd.f32 1.0, %v1352_v57  ;;  %1256 = vmatmul.mubr.bf16.gmra.mrb[12].mxu1 %v756_v51  ;;  %v735_v12 = vmul.f32 %v703_v54, %v607_v58 }
 0x12c   : > { %v647_v6 = vmul.f32 0.70710677, %v1569_v55  ;;  %v561_v7 = vpop.f32.mrb[27].mxu0  ;;  %v702_v10 = vadd.f32 1.0, %v1354_v0  ;;  %v570_v60 = vadd.f32 %v1222_v62, %v1500_v32  ;;  %v733_v14 = vmul.f32 %v701_v59, %v605_v1 }
 0x12d   : > { %v645_v11 = vmul.f32 0.70710677, %v1573_v61  ;;  %v736_v13 = vmul.f32 %v704_v5, %v608_v2  ;;  %v562_v63 = vadd.f32 %v1500_v32, %v561_v7  ;;  %v615_v54 = vmul.f32 0.5, %v1569_v55 }
 0x12e   : > { %1363 = verf.f32 %v647_v6  ;;  %v734_v16 = vmul.f32 %v702_v10, %v606_v8  ;;  %v648_v3 = vmul.f32 0.70710677, %v570_v60  ;;  %v616_v56 = vmul.f32 0.5, %v570_v60 }
 0x12f   : > { %1365 = verf.f32 %v645_v11  ;;  %v646_v4 = vmul.f32 0.70710677, %v562_v63  ;;  %v758_v18 = vpack.c.bf16 %v736_v13, %v735_v12  ;;  %v613_v57 = vmul.f32 0.5, %v1573_v61 }
 0x130   : > { %v1356_v9 = vpop.eup %1355  ;;  %1367 = verf.f32 %v648_v3  ;;  %v757_v19 = vpack.c.bf16 %v734_v16, %v733_v14  ;;  %v614_v58 = vmul.f32 0.5, %v562_v63 }
 0x131   : > { %v1358_v15 = vpop.eup %1357  ;;  %v1225_v17 = vpop.f32.mrb[28].mxu0  ;;  %v707_v20 = vadd.f32 1.0, %v1356_v9  ;;  %1369 = verf.f32 %v646_v4 }
 0x132   : > { %v583_v21 = vadd.f32 %v1225_v17, %v1500_v32  ;;  %v574_v22 = vpop.f32.mrb[29].mxu0  ;;  %v1360_v23 = vpop.eup %1359  ;;  %v705_v26 = vadd.f32 1.0, %v1358_v15  ;;  %1259 = vmatprep.mubr.bf16.mxu1 %v757_v19  ;;  %v1594_v19 = vld [vmem:[%s1704_s4] ss:$0 sm:$0xff] }
 0x133   : > { %v575_v27 = vadd.f32 %v1500_v32, %v574_v22  ;;  %v1226_v28 = vpop.f32.mrb[30].mxu0  ;;  %v1362_v31 = vpop.eup %1361  ;;  %v708_v35 = vadd.f32 1.0, %v1360_v23  ;;  %1260 = vmatmul.mubr.bf16.gmra.mrb[16].mxu1 %v758_v18  ;;  %v739_v42 = vmul.f32 %v707_v20, %v611_v25 }
 0x134   : > { %v651_v37 = vmul.f32 0.70710677, %v583_v21  ;;  %v577_v38 = vpop.f32.mrb[31].mxu0  ;;  %v706_v40 = vadd.f32 1.0, %v1362_v31  ;;  %v586_v24 = vadd.f32 %v1226_v28, %v1500_v32  ;;  %v737_v36 = vmul.f32 %v705_v26, %v609_v33 }
 0x135   : > { %v649_v41 = vmul.f32 0.70710677, %v575_v27  ;;  %v740_v43 = vmul.f32 %v708_v35, %v612_v34  ;;  %v578_v44 = vadd.f32 %v1500_v32, %v577_v38  ;;  %v619_v60 = vmul.f32 0.5, %v583_v21 }
 0x136   : > { %1371 = verf.f32 %v651_v37  ;;  %v738_v46 = vmul.f32 %v706_v40, %v610_v39  ;;  %v652_v30 = vmul.f32 0.70710677, %v586_v24  ;;  %v620_v13 = vmul.f32 0.5, %v586_v24 }
 0x137   : > { %1373 = verf.f32 %v649_v41  ;;  %v650_v47 = vmul.f32 0.70710677, %v578_v44  ;;  %v760_v49 = vpack.c.bf16 %v740_v43, %v739_v42  ;;  %v617_v61 = vmul.f32 0.5, %v575_v27 }
 0x138   : > { %v1364_v29 = vpop.eup %1363  ;;  %1375 = verf.f32 %v652_v30  ;;  %v759_v51 = vpack.c.bf16 %v738_v46, %v737_v36  ;;  %v618_v63 = vmul.f32 0.5, %v578_v44 }
 0x139   : > { %v1366_v50 = vpop.eup %1365  ;;  %v711_v45 = vadd.f32 1.0, %v1364_v29  ;;  %1377 = verf.f32 %v650_v47 }
 0x13a   : > { %v1368_v48 = vpop.eup %1367  ;;  %v709_v52 = vadd.f32 1.0, %v1366_v50  ;;  %1263 = vmatprep.mubr.bf16.mxu1 %v759_v51 }
 0x13b   : > { %v1370_v53 = vpop.eup %1369  ;;  %v712_v32 = vadd.f32 1.0, %v1368_v48  ;;  %1264 = vmatmul.mubr.bf16.gmra.mrb[20].mxu1 %v760_v49  ;;  %v743_v62 = vmul.f32 %v711_v45, %v615_v54 }
 0x13c   : > { %v710_v59 = vadd.f32 1.0, %v1370_v53  ;;  %v741_v1 = vmul.f32 %v709_v52, %v613_v57 }
 0x13d   : > { %v744_v0 = vmul.f32 %v712_v32, %v616_v56 }
 0x13e   : > { %v742_v2 = vmul.f32 %v710_v59, %v614_v58 }
 0x13f   : > { %v762_v6 = vpack.c.bf16 %v744_v0, %v743_v62 }
 0x140   : > { %v1372_v5 = vpop.eup %1371  ;;  %v761_v8 = vpack.c.bf16 %v742_v2, %v741_v1 }
 0x141   : > { %v1374_v7 = vpop.eup %1373  ;;  %v715_v10 = vadd.f32 1.0, %v1372_v5 }
 0x142   : > { %v1376_v11 = vpop.eup %1375  ;;  %v713_v12 = vadd.f32 1.0, %v1374_v7  ;;  %1267 = vmatprep.mubr.bf16.mxu1 %v761_v8 }
 0x143   : > { %v1378_v55 = vpop.eup %1377  ;;  %v716_v14 = vadd.f32 1.0, %v1376_v11  ;;  %1268 = vmatmul.mubr.bf16.gmra.mrb[24].mxu1 %v762_v6  ;;  %v747_v3 = vmul.f32 %v715_v10, %v619_v60 }
 0x144   : > { %v714_v16 = vadd.f32 1.0, %v1378_v55  ;;  %v745_v4 = vmul.f32 %v713_v12, %v617_v61 }
 0x145   : > { %v748_v9 = vmul.f32 %v716_v14, %v620_v13 }
 0x146   : > { %v746_v18 = vmul.f32 %v714_v16, %v618_v63 }
 0x147   : > { %v764_v15 = vpack.c.bf16 %v748_v9, %v747_v3 }
 0x148   : > { %v763_v17 = vpack.c.bf16 %v746_v18, %v745_v4 }
 0x14a   : > { %1271 = vmatprep.mubr.bf16.mxu1 %v763_v17 }
 0x14b   : > { %1272 = vmatmul.mubr.bf16.gmra.mrb[28].mxu1 %v764_v15 }
 0x1e6   : > { %v1245_v20 = vpop.f32.mrb[0].mxu1 }
 0x1e7   : > { %v879_v21 = vadd.f32 %v1245_v20, %v1594_v19  ;;  %v870_v22 = vpop.f32.mrb[1].mxu1 }
 0x1e8   : > { %v871_v23 = vadd.f32 %v1594_v19, %v870_v22  ;;  %v1246_v25 = vpop.f32.mrb[2].mxu1 }
 0x1e9   : > { %1000 = vst.msk [vmem:[%s1599_s16 + $0x10] sm:$0xff] %vm997_vm0, %v879_v21  ;;  %v882_v26 = vadd.f32 %v1246_v25, %v1594_v19  ;;  %v873_v27 = vpop.f32.mrb[3].mxu1 }
 0x1ea   : > { %998 = vst.msk [vmem:[%s1599_s16] sm:$0xff] %vm997_vm0, %v871_v23  ;;  %v874_v28 = vadd.f32 %v1594_v19, %v873_v27 }
 0x1eb   : > { %1001 = vst.msk [vmem:[%s1599_s16 + $0x18] sm:$0xff] %vm997_vm0, %v882_v26 }
 0x1ec   : > { %999 = vst.msk [vmem:[%s1599_s16 + $0x8] sm:$0xff] %vm997_vm0, %v874_v28 }
 0x1ee   : > { %v1249_v31 = vpop.f32.mrb[4].mxu1 }
 0x1ef   : > { %v895_v33 = vadd.f32 %v1249_v31, %v1594_v19  ;;  %v886_v34 = vpop.f32.mrb[5].mxu1 }
 0x1f0   : > { %v887_v35 = vadd.f32 %v1594_v19, %v886_v34  ;;  %v1250_v37 = vpop.f32.mrb[6].mxu1 }
 0x1f1   : > { %1004 = vst.msk [vmem:[%s1599_s16 + $0x30] sm:$0xff] %vm997_vm0, %v895_v33  ;;  %v898_v38 = vadd.f32 %v1250_v37, %v1594_v19  ;;  %v889_v39 = vpop.f32.mrb[7].mxu1 }
 0x1f2   : > { %1002 = vst.msk [vmem:[%s1599_s16 + $0x20] sm:$0xff] %vm997_vm0, %v887_v35  ;;  %v890_v40 = vadd.f32 %v1594_v19, %v889_v39 }
 0x1f3   : > { %1005 = vst.msk [vmem:[%s1599_s16 + $0x38] sm:$0xff] %vm997_vm0, %v898_v38 }
 0x1f4   : > { %1003 = vst.msk [vmem:[%s1599_s16 + $0x28] sm:$0xff] %vm997_vm0, %v890_v40 }
 0x1f6   : > { %v1253_v41 = vpop.f32.mrb[8].mxu1 }
 0x1f7   : > { %v911_v24 = vadd.f32 %v1253_v41, %v1594_v19  ;;  %v902_v42 = vpop.f32.mrb[9].mxu1 }
 0x1f8   : > { %v903_v43 = vadd.f32 %v1594_v19, %v902_v42  ;;  %v1254_v44 = vpop.f32.mrb[10].mxu1 }
 0x1f9   : > { %1008 = vst.msk [vmem:[%s1599_s16 + $0x50] sm:$0xff] %vm997_vm0, %v911_v24  ;;  %v914_v36 = vadd.f32 %v1254_v44, %v1594_v19  ;;  %v905_v46 = vpop.f32.mrb[11].mxu1 }
 0x1fa   : > { %1006 = vst.msk [vmem:[%s1599_s16 + $0x40] sm:$0xff] %vm997_vm0, %v903_v43  ;;  %v906_v30 = vadd.f32 %v1594_v19, %v905_v46 }
 0x1fb   : > { %1009 = vst.msk [vmem:[%s1599_s16 + $0x58] sm:$0xff] %vm997_vm0, %v914_v36 }
 0x1fc   : > { %1007 = vst.msk [vmem:[%s1599_s16 + $0x48] sm:$0xff] %vm997_vm0, %v906_v30 }
 0x1fe   : > { %v1257_v29 = vpop.f32.mrb[12].mxu1 }
 0x1ff   : > { %v927_v47 = vadd.f32 %v1257_v29, %v1594_v19  ;;  %v918_v49 = vpop.f32.mrb[13].mxu1 }
 0x200   : > { %v919_v50 = vadd.f32 %v1594_v19, %v918_v49  ;;  %v1258_v51 = vpop.f32.mrb[14].mxu1 }
 0x201   : > { %1012 = vst.msk [vmem:[%s1599_s16 + $0x70] sm:$0xff] %vm997_vm0, %v927_v47  ;;  %v930_v45 = vadd.f32 %v1258_v51, %v1594_v19  ;;  %v921_v48 = vpop.f32.mrb[15].mxu1 }
 0x202   : > { %1010 = vst.msk [vmem:[%s1599_s16 + $0x60] sm:$0xff] %vm997_vm0, %v919_v50  ;;  %v922_v52 = vadd.f32 %v1594_v19, %v921_v48 }
 0x203   : > { %1013 = vst.msk [vmem:[%s1599_s16 + $0x78] sm:$0xff] %vm997_vm0, %v930_v45 }
 0x204   : > { %1011 = vst.msk [vmem:[%s1599_s16 + $0x68] sm:$0xff] %vm997_vm0, %v922_v52 }
 0x206   : > { %v1261_v53 = vpop.f32.mrb[16].mxu1 }
 0x207   : > { %v943_v54 = vadd.f32 %v1261_v53, %v1594_v19  ;;  %v934_v56 = vpop.f32.mrb[17].mxu1 }
 0x208   : > { %v935_v32 = vadd.f32 %v1594_v19, %v934_v56  ;;  %v1262_v57 = vpop.f32.mrb[18].mxu1 }
 0x209   : > { %1016 = vst.msk [vmem:[%s1599_s16 + $0x90] sm:$0xff] %vm997_vm0, %v943_v54  ;;  %v946_v58 = vadd.f32 %v1262_v57, %v1594_v19  ;;  %v937_v59 = vpop.f32.mrb[19].mxu1 }
 0x20a   : > { %1014 = vst.msk [vmem:[%s1599_s16 + $0x80] sm:$0xff] %vm997_vm0, %v935_v32  ;;  %v938_v62 = vadd.f32 %v1594_v19, %v937_v59 }
 0x20b   : > { %1017 = vst.msk [vmem:[%s1599_s16 + $0x98] sm:$0xff] %vm997_vm0, %v946_v58 }
 0x20c   : > { %1015 = vst.msk [vmem:[%s1599_s16 + $0x88] sm:$0xff] %vm997_vm0, %v938_v62 }
 0x20e   : > { %v1265_v0 = vpop.f32.mrb[20].mxu1 }
 0x20f   : > { %v959_v1 = vadd.f32 %v1265_v0, %v1594_v19  ;;  %v950_v2 = vpop.f32.mrb[21].mxu1 }
 0x210   : > { %v951_v5 = vadd.f32 %v1594_v19, %v950_v2  ;;  %v1266_v6 = vpop.f32.mrb[22].mxu1 }
 0x211   : > { %1020 = vst.msk [vmem:[%s1599_s16 + $0xb0] sm:$0xff] %vm997_vm0, %v959_v1  ;;  %v962_v7 = vadd.f32 %v1266_v6, %v1594_v19  ;;  %v953_v8 = vpop.f32.mrb[23].mxu1 }
 0x212   : > { %1018 = vst.msk [vmem:[%s1599_s16 + $0xa0] sm:$0xff] %vm997_vm0, %v951_v5  ;;  %v954_v10 = vadd.f32 %v1594_v19, %v953_v8 }
 0x213   : > { %1021 = vst.msk [vmem:[%s1599_s16 + $0xb8] sm:$0xff] %vm997_vm0, %v962_v7 }
 0x214   : > { %1019 = vst.msk [vmem:[%s1599_s16 + $0xa8] sm:$0xff] %vm997_vm0, %v954_v10 }
 0x216   : > { %v1269_v11 = vpop.f32.mrb[24].mxu1 }
 0x217   : > { %v975_v12 = vadd.f32 %v1269_v11, %v1594_v19  ;;  %v966_v55 = vpop.f32.mrb[25].mxu1 }
 0x218   : > { %v967_v60 = vadd.f32 %v1594_v19, %v966_v55  ;;  %v1270_v13 = vpop.f32.mrb[26].mxu1 }
 0x219   : > { %1024 = vst.msk [vmem:[%s1599_s16 + $0xd0] sm:$0xff] %vm997_vm0, %v975_v12  ;;  %v978_v14 = vadd.f32 %v1270_v13, %v1594_v19  ;;  %v969_v61 = vpop.f32.mrb[27].mxu1 }
 0x21a   : > { %1022 = vst.msk [vmem:[%s1599_s16 + $0xc0] sm:$0xff] %vm997_vm0, %v967_v60  ;;  %v970_v63 = vadd.f32 %v1594_v19, %v969_v61 }
 0x21b   : > { %1025 = vst.msk [vmem:[%s1599_s16 + $0xd8] sm:$0xff] %vm997_vm0, %v978_v14 }
 0x21c   : > { %1023 = vst.msk [vmem:[%s1599_s16 + $0xc8] sm:$0xff] %vm997_vm0, %v970_v63 }
 0x21e   : > { %v1273_v16 = vpop.f32.mrb[28].mxu1 }
 0x21f   : > { %v991_v3 = vadd.f32 %v1273_v16, %v1594_v19  ;;  %v982_v9 = vpop.f32.mrb[29].mxu1 }
 0x220   : > { %v983_v4 = vadd.f32 %v1594_v19, %v982_v9  ;;  %v1274_v18 = vpop.f32.mrb[30].mxu1 }
 0x221   : > { %1028 = vst.msk [vmem:[%s1599_s16 + $0xf0] sm:$0xff] %vm997_vm0, %v991_v3  ;;  %v994_v15 = vadd.f32 %v1274_v18, %v1594_v19  ;;  %v985_v17 = vpop.f32.mrb[31].mxu1 }
 0x222   : > { %1026 = vst.msk [vmem:[%s1599_s16 + $0xe0] sm:$0xff] %vm997_vm0, %v983_v4  ;;  %v986_v20 = vadd.f32 %v1594_v19, %v985_v17 }
 0x223   : > { %1029 = vst.msk [vmem:[%s1599_s16 + $0xf8] sm:$0xff] %vm997_vm0, %v994_v15 }
 0x224   : > { %1027 = vst.msk [vmem:[%s1599_s16 + $0xe8] sm:$0xff] %vm997_vm0, %v986_v20 }
 0x225 PF: > { %s15_s18 = sadd.s32 1, %s1385_s18  }
 0x226   : > { %p12_p4 = scmp.ge.s32.totalorder %s15_s18, 4  }
 0x228   :  { %14 = sbr.rel (!%p12_p4) target bundleno = 1 (0x1), region = 70 }

</bundles_post_ra>
